<compile_context>
chip_gen: v7x
topology: tpu7x:2x2x1
jax: 0.10.0
libtpu: 0.0.40
codegen_flags: <defaults>
</compile_context>

<pallas_src>
import math

import jax
import jax.numpy as jnp
from jax.experimental import pallas as pl
from jax.experimental.pallas import tpu as pltpu


def _draft_kernel(kv_ref, q_ref, wins_ref, ranks_ref, wr_ref, wkvT_ref, sw_ref,
                  sb_ref, out_ref):
    """One batch tile of TB draft states, batch in the lane dimension.

    kv_ref   : (P, 2D, TB)  f32  pre-gathered pool [K | V] rows (tables, pre-scaled)
    q_ref    : (K, D, TB)   f32  pre-gathered pack queries (1/sqrt(D) folded in)
    wins_ref : (1, TB)      f32  wins per batch element
    ranks_ref: (1, TB)      f32  ranks per batch element
    wr_ref   : (E, 4)       f32  columns [w_win, b_win, w_rank, b_rank]
    wkvT_ref : (2D, E)      f32  [Wk | Wv] transposed
    sw_ref   : (D, 1)       f32  scorer weight
    sb_ref   : (1, 1)       f32  scorer bias (SMEM)
    out_ref  : (1, K, TB)   f32  logits, lane-dense
    """
    f32 = jnp.float32
    K, D, TB = q_ref.shape

    # ---- win/rank rows: Linear(1, E) + ReLU + [Wk|Wv] projection, in-kernel ----
    wr = wr_ref[...]
    wins = wins_ref[...]                                              # (1, TB)
    ranks = ranks_ref[...]                                            # (1, TB)
    row_win = jnp.maximum(wr[:, 0:1] * wins + wr[:, 1:2], 0.0)        # (E, TB)
    row_rank = jnp.maximum(wr[:, 2:3] * ranks + wr[:, 3:4], 0.0)      # (E, TB)
    wkvT = wkvT_ref[...]                                              # (2D, E)
    kv_win = jnp.dot(wkvT, row_win, preferred_element_type=f32)       # (2D, TB)
    kv_rank = jnp.dot(wkvT, row_rank, preferred_element_type=f32)     # (2D, TB)

    # ---- assemble the full P+2 key/value set (concat along leading axis = free) --
    kv_pool = kv_ref[...]                                             # (P, 2D, TB)
    k_all = jnp.concatenate(
        [kv_pool[:, :D, :], kv_win[:D][None], kv_rank[:D][None]], axis=0)  # (P+2,D,TB)
    v_all = jnp.concatenate(
        [kv_pool[:, D:, :], kv_win[D:][None], kv_rank[D:][None]], axis=0)  # (P+2,D,TB)

    q3 = q_ref[...]                                                   # (K, D, TB)
    sw_b = jnp.broadcast_to(sw_ref[...], (D, TB))                     # hoisted (no per-k re-broadcast)
    bias = sb_ref[0, 0]

    # ---- attention + softmax + LeakyReLU + scorer, one query row at a time ------
    # (small K, fully unrolled; bounds live vregs to ~a dozen per iteration)
    rows = []
    for k in range(K):
        qk = q3[k]                                                    # (D, TB)
        s_k = jnp.maximum(jnp.sum(qk * k_all, axis=1), 0.0)           # (P+2, TB)
        m_k = jnp.max(s_k, axis=0, keepdims=True)                     # (1, TB)
        e_k = jnp.exp(s_k - m_k)                                      # (P+2, TB)  EUP
        denom_k = jnp.sum(e_k, axis=0, keepdims=True)                 # (1, TB)
        ctx_k = jnp.sum(e_k[:, None, :] * v_all, axis=0)              # (D, TB) unnormalized
        lk = jnp.where(ctx_k > 0, ctx_k, 0.01 * ctx_k)                # LeakyReLU (pos.-homogeneous)
        num_k = jnp.sum(lk * sw_b, axis=0, keepdims=True)             # (1, TB) scorer dot
        # deferred softmax normalization: divide once per (query, batch)
        rows.append(num_k * pl.reciprocal(denom_k, approx=True))
    out_ref[0] = jnp.concatenate(rows, axis=0) + bias                 # (K, TB) lane-dense


def _round_up(x, m):
    return (x + m - 1) // m * m


def _pick_batch_tile(B):
    """Batch lives in the lane dim, so the tile must be a multiple of 128.
    v7x (2 TensorCores): aim for >= 2 grid steps so both cores get work.
    v5e/v6e (single TC): one big step for small B (avoids ~0.35us/step overhead)."""
    b128 = _round_up(max(B, 1), 128)
    try:
        kind = jax.devices()[0].device_kind.lower()
    except Exception:
        kind = ""
    if "v7" in kind:
        return max(128, min(512, _round_up(max(B // 4, 1), 128)))
    return min(b128, 1024)


def draft_picker_forward(pool, pack, wins, ranks, params, *, batch_tile=None):
    """pool:(B,P) int32, pack:(B,K) int32, wins:(B,), ranks:(B,) -> logits (B,K) f32."""
    B, P = pool.shape
    _, K = pack.shape
    D = params["wq"].shape[1]
    f32 = jnp.float32

    if batch_tile is None:
        TB = _pick_batch_tile(B)
    else:
        TB = _round_up(max(int(batch_tile), 128), 128)
    TB = min(TB, _round_up(B, 128))
    G = pl.cdiv(B, TB)
    Bp = G * TB
    if Bp != B:                                    # pad batch to a multiple of TB
        pad = Bp - B
        pool = jnp.pad(pool, ((0, pad), (0, 0)))
        pack = jnp.pad(pack, ((0, pad), (0, 0)))
        wins = jnp.pad(wins, (0, pad))
        ranks = jnp.pad(ranks, (0, pad))

    emb = params["card_embedding"].astype(f32)
    wq = params["wq"].astype(f32)
    wkv = jnp.concatenate([params["wk"], params["wv"]], axis=1).astype(f32)   # (E, 2D)

    # Tiny per-card lookup tables: gather + projection fused outside the kernel.
    # relu commutes with row-gather, so relu(emb[i]) @ [Wk|Wv] == kv_table[i] exactly.
    q_table = (emb @ wq) * (1.0 / math.sqrt(D))                               # (C, D)
    kv_table = jnp.maximum(emb, 0.0) @ wkv                                    # (C, 2D)

    # Gather into batch-in-lanes layout: batch becomes the minor (lane) dimension.
    kv_pool = jnp.take(kv_table, pool.reshape(-1), axis=0).reshape(Bp, P, 2 * D)
    kv_pool = jnp.transpose(kv_pool, (1, 2, 0))                               # (P, 2D, Bp)
    q_pack = jnp.take(q_table, pack.reshape(-1), axis=0).reshape(Bp, K, D)
    q_pack = jnp.transpose(q_pack, (1, 2, 0))                                 # (K, D, Bp)

    wins2 = wins.astype(f32).reshape(1, Bp)
    ranks2 = ranks.astype(f32).reshape(1, Bp)
    wr = jnp.stack([params["w_win"], params["b_win"],
                    params["w_rank"], params["b_rank"]], axis=1).astype(f32)  # (E, 4)
    wkvT = wkv.T                                                              # (2D, E)
    sw = params["scorer_w"].reshape(D, 1).astype(f32)
    sb = params["scorer_b"].reshape(1, 1).astype(f32)

    grid_spec = pltpu.PrefetchScalarGridSpec(
        num_scalar_prefetch=0,
        grid=(G,),
        in_specs=[
            pl.BlockSpec((P, 2 * D, TB), lambda g: (0, 0, g)),    # pool K|V, batch-in-lanes
            pl.BlockSpec((K, D, TB), lambda g: (0, 0, g)),        # pack queries
            pl.BlockSpec((1, TB), lambda g: (0, g)),              # wins
            pl.BlockSpec((1, TB), lambda g: (0, g)),              # ranks
            pl.BlockSpec((wr.shape[0], 4), lambda g: (0, 0)),     # win/rank Linear params
            pl.BlockSpec((2 * D, wkvT.shape[1]), lambda g: (0, 0)),  # [Wk|Wv]^T
            pl.BlockSpec((D, 1), lambda g: (0, 0)),               # scorer weight
            pl.BlockSpec(memory_space=pltpu.MemorySpace.SMEM),    # scorer bias
        ],
        out_specs=pl.BlockSpec((1, K, TB), lambda g: (g, 0, 0)),
    )

    # Working set per step is well under 1 MiB, so the default scoped-VMEM limit is
    # never binding on v5e/v6e/v7x; re-derive a vmem_limit_bytes only if shapes scale up.
    out = pl.pallas_call(
        _draft_kernel,
        out_shape=jax.ShapeDtypeStruct((G, K, TB), f32),
        grid_spec=grid_spec,
        compiler_params=pltpu.CompilerParams(dimension_semantics=("parallel",)),
    )(kv_pool, q_pack, wins2, ranks2, wr, wkvT, sw, sb)

    # (G, K, TB) -> (Bp, K): batch g*TB + b lives at out[g, :, b]
    logits = jnp.transpose(out, (0, 2, 1)).reshape(Bp, K)
    return logits[:B]


def draft_picker_reference(pool, pack, wins, ranks, params):
    """Pure-JAX f32 reference of the PyTorch module (sanity check)."""
    emb = params["card_embedding"]
    pool_emb = jnp.take(emb, pool, axis=0)
    pack_emb = jnp.take(emb, pack, axis=0)
    win_emb = wins[:, None] * params["w_win"][None, :] + params["b_win"][None, :]
    rank_emb = ranks[:, None] * params["w_rank"][None, :] + params["b_rank"][None, :]
    pool_cat = jnp.concatenate([pool_emb, win_emb[:, None], rank_emb[:, None]], axis=1)
    pool_cat = jnp.maximum(pool_cat, 0.0)
    q = pack_emb @ params["wq"]
    k = pool_cat @ params["wk"]
    v = pool_cat @ params["wv"]
    d = params["wq"].shape[1]
    scores = jnp.einsum('bkd,bpd->bkp', q, k) / math.sqrt(d)
    scores = jnp.maximum(scores, 0.0)
    attn = jax.nn.softmax(scores, axis=-1)
    ctx = jnp.einsum('bkp,bpd->bkd', attn, v)
    lk = jnp.where(ctx > 0, ctx, 0.01 * ctx)
    return jnp.einsum('bkd,d->bk', lk, params["scorer_w"]) + params["scorer_b"][0]


def init_params(key, num_cards, embedding_dim, internal_dims=8):
    ks = jax.random.split(key, 8)
    scale = 0.1
    return {
        "card_embedding": jax.random.normal(ks[0], (num_cards, embedding_dim),
                                            jnp.float32),
        # nn.Linear(1, E): weight (E,1) stored as (E,), bias (E,)
        "w_win": scale * jax.random.normal(ks[1], (embedding_dim,), jnp.float32),
        "b_win": scale * jax.random.normal(ks[2], (embedding_dim,), jnp.float32),
        "w_rank": scale * jax.random.normal(ks[3], (embedding_dim,), jnp.float32),
        "b_rank": scale * jax.random.normal(ks[4], (embedding_dim,), jnp.float32),
        # nn.Linear(E, D, bias=False): stored transposed so the math is x @ W
        "wq": scale * jax.random.normal(ks[5], (embedding_dim, internal_dims),
                                        jnp.float32),
        "wk": scale * jax.random.normal(ks[6], (embedding_dim, internal_dims),
                                        jnp.float32),
        "wv": scale * jax.random.normal(ks[7], (embedding_dim, internal_dims),
                                        jnp.float32),
        # nn.Linear(D, 1)
        "scorer_w": scale * jax.random.normal(jax.random.fold_in(key, 99),
                                              (internal_dims,), jnp.float32),
        "scorer_b": scale * jax.random.normal(jax.random.fold_in(key, 100),
                                              (1,), jnp.float32),
    }


if __name__ == "__main__":
    key = jax.random.PRNGKey(0)
    # Small per-sample shapes consistent with the module: B drafts, P pool cards,
    # K cards in the pack, E-dim embeddings, D=8 internal dims.
    B, P, K = 256, 8, 8
    E, num_cards, D = 32, 64, 8

    k0, k1, k2, k3, kp = jax.random.split(key, 5)
    pool = jax.random.randint(k0, (B, P), 0, num_cards, dtype=jnp.int32)
    pack = jax.random.randint(k1, (B, K), 0, num_cards, dtype=jnp.int32)
    wins = jax.random.uniform(k2, (B,), jnp.float32, 0.0, 7.0)
    ranks = jax.random.uniform(k3, (B,), jnp.float32, 0.0, 5.0)

    params = init_params(kp, num_cards, E, internal_dims=D)

    fwd = jax.jit(lambda po, pa, w, r: draft_picker_forward(po, pa, w, r, params))
    logits = fwd(pool, pack, wins, ranks)
    jax.block_until_ready(logits)
    assert logits.shape == (B, K) and logits.dtype == jnp.float32

    ref = draft_picker_reference(pool, pack, wins, ranks, params)
    err = float(jnp.max(jnp.abs(logits - ref)))
    assert err < 5e-2, f"max abs error vs f32 reference too large: {err}"
    print("KERNEL_OK")
</pallas_src>

<mosaic_0001>
module attributes {stable_mosaic.version = 11 : i64} {
  func.func @_draft_kernel(%arg0: i32, %arg1: memref<8x16x256xf32, #tpu.memory_space<vmem>>, %arg2: memref<8x8x256xf32, #tpu.memory_space<vmem>>, %arg3: memref<1x256xf32, #tpu.memory_space<vmem>>, %arg4: memref<1x256xf32, #tpu.memory_space<vmem>>, %arg5: memref<32x4xf32, #tpu.memory_space<vmem>>, %arg6: memref<16x32xf32, #tpu.memory_space<vmem>>, %arg7: memref<8x1xf32, #tpu.memory_space<vmem>>, %arg8: memref<1x1xf32, #tpu.memory_space<smem>>, %arg9: memref<1x8x256xf32, #tpu.memory_space<vmem>>) attributes {dimension_semantics = [#tpu.dimension_semantics<parallel>], iteration_bounds = array<i64: 1>, scalar_prefetch = 0 : i64, scratch_operands = 0 : i64, tpu.core_type = #tpu.core_type<tc>, window_params = [{transform_indices = @transform_0, window_bounds = array<i64: 8, 16, 256>}, {transform_indices = @transform_1, window_bounds = array<i64: 8, 8, 256>}, {transform_indices = @transform_2, window_bounds = array<i64: 1, 256>}, {transform_indices = @transform_3, window_bounds = array<i64: 1, 256>}, {pipeline_mode = #tpu.pipeline_mode<synchronous>, transform_indices = @transform_4, window_bounds = array<i64: 32, 4>}, {pipeline_mode = #tpu.pipeline_mode<synchronous>, transform_indices = @transform_5, window_bounds = array<i64: 16, 32>}, {pipeline_mode = #tpu.pipeline_mode<synchronous>, transform_indices = @transform_6, window_bounds = array<i64: 8, 1>}, {transform_indices = @transform_7, window_bounds = array<i64: 1, 1>}, {transform_indices = @transform_8, window_bounds = array<i64: 1, 8, 256>}]} {
    %c0 = arith.constant 0 : index
    %c0_0 = arith.constant 0 : index
    %0 = vector.load %arg5[%c0, %c0_0] : memref<32x4xf32, #tpu.memory_space<vmem>>, vector<32x4xf32>
    %c0_1 = arith.constant 0 : index
    %c0_2 = arith.constant 0 : index
    %1 = vector.load %arg3[%c0_1, %c0_2] : memref<1x256xf32, #tpu.memory_space<vmem>>, vector<1x256xf32>
    %c0_3 = arith.constant 0 : index
    %c0_4 = arith.constant 0 : index
    %2 = vector.load %arg4[%c0_3, %c0_4] : memref<1x256xf32, #tpu.memory_space<vmem>>, vector<1x256xf32>
    %3 = vector.extract_strided_slice %0 {offsets = [0, 0], sizes = [32, 1], strides = [1, 1]} : vector<32x4xf32> to vector<32x1xf32>
    %4 = vector.broadcast %3 : vector<32x1xf32> to vector<32x256xf32>
    %5 = vector.broadcast %1 : vector<1x256xf32> to vector<32x256xf32>
    %6 = arith.mulf %4, %5 : vector<32x256xf32>
    %7 = vector.extract_strided_slice %0 {offsets = [0, 1], sizes = [32, 1], strides = [1, 1]} : vector<32x4xf32> to vector<32x1xf32>
    %8 = vector.broadcast %7 : vector<32x1xf32> to vector<32x256xf32>
    %9 = arith.addf %6, %8 : vector<32x256xf32>
    %cst = arith.constant 0.000000e+00 : f32
    %10 = vector.broadcast %cst : f32 to vector<32x256xf32>
    %11 = arith.maximumf %9, %10 : vector<32x256xf32>
    %12 = vector.extract_strided_slice %0 {offsets = [0, 2], sizes = [32, 1], strides = [1, 1]} : vector<32x4xf32> to vector<32x1xf32>
    %13 = vector.broadcast %12 : vector<32x1xf32> to vector<32x256xf32>
    %14 = vector.broadcast %2 : vector<1x256xf32> to vector<32x256xf32>
    %15 = arith.mulf %13, %14 : vector<32x256xf32>
    %16 = vector.extract_strided_slice %0 {offsets = [0, 3], sizes = [32, 1], strides = [1, 1]} : vector<32x4xf32> to vector<32x1xf32>
    %17 = vector.broadcast %16 : vector<32x1xf32> to vector<32x256xf32>
    %18 = arith.addf %15, %17 : vector<32x256xf32>
    %cst_5 = arith.constant 0.000000e+00 : f32
    %19 = vector.broadcast %cst_5 : f32 to vector<32x256xf32>
    %20 = arith.maximumf %18, %19 : vector<32x256xf32>
    %c0_6 = arith.constant 0 : index
    %c0_7 = arith.constant 0 : index
    %21 = vector.load %arg6[%c0_6, %c0_7] : memref<16x32xf32, #tpu.memory_space<vmem>>, vector<16x32xf32>
    %cst_8 = arith.constant dense<0.000000e+00> : vector<16x256xf32>
    %22 = tpu.matmul %21, %11, %cst_8 {dimension_numbers = #tpu.dot_dimension_numbers<[1], [0], [0], [1], [0, 0, 1, 1], [], []>} : vector<16x32xf32>, vector<32x256xf32>, vector<16x256xf32> -> vector<16x256xf32>
    %cst_9 = arith.constant dense<0.000000e+00> : vector<16x256xf32>
    %23 = tpu.matmul %21, %20, %cst_9 {dimension_numbers = #tpu.dot_dimension_numbers<[1], [0], [0], [1], [0, 0, 1, 1], [], []>} : vector<16x32xf32>, vector<32x256xf32>, vector<16x256xf32> -> vector<16x256xf32>
    %c0_10 = arith.constant 0 : index
    %c0_11 = arith.constant 0 : index
    %c0_12 = arith.constant 0 : index
    %24 = vector.load %arg1[%c0_10, %c0_11, %c0_12] : memref<8x16x256xf32, #tpu.memory_space<vmem>>, vector<8x16x256xf32>
    %25 = vector.extract_strided_slice %24 {offsets = [0, 0, 0], sizes = [8, 8, 256], strides = [1, 1, 1]} : vector<8x16x256xf32> to vector<8x8x256xf32>
    %26 = vector.extract_strided_slice %22 {offsets = [0, 0], sizes = [8, 256], strides = [1, 1]} : vector<16x256xf32> to vector<8x256xf32>
    %27 = vector.shape_cast %26 : vector<8x256xf32> to vector<1x8x256xf32>
    %28 = vector.extract_strided_slice %23 {offsets = [0, 0], sizes = [8, 256], strides = [1, 1]} : vector<16x256xf32> to vector<8x256xf32>
    %29 = vector.shape_cast %28 : vector<8x256xf32> to vector<1x8x256xf32>
    %30 = tpu.concatenate %25, %27, %29 in 0 : vector<8x8x256xf32>, vector<1x8x256xf32>, vector<1x8x256xf32> -> vector<10x8x256xf32>
    %31 = vector.extract_strided_slice %24 {offsets = [0, 8, 0], sizes = [8, 8, 256], strides = [1, 1, 1]} : vector<8x16x256xf32> to vector<8x8x256xf32>
    %32 = vector.extract_strided_slice %22 {offsets = [8, 0], sizes = [8, 256], strides = [1, 1]} : vector<16x256xf32> to vector<8x256xf32>
    %33 = vector.shape_cast %32 : vector<8x256xf32> to vector<1x8x256xf32>
    %34 = vector.extract_strided_slice %23 {offsets = [8, 0], sizes = [8, 256], strides = [1, 1]} : vector<16x256xf32> to vector<8x256xf32>
    %35 = vector.shape_cast %34 : vector<8x256xf32> to vector<1x8x256xf32>
    %36 = tpu.concatenate %31, %33, %35 in 0 : vector<8x8x256xf32>, vector<1x8x256xf32>, vector<1x8x256xf32> -> vector<10x8x256xf32>
    %c0_13 = arith.constant 0 : index
    %c0_14 = arith.constant 0 : index
    %c0_15 = arith.constant 0 : index
    %37 = vector.load %arg2[%c0_13, %c0_14, %c0_15] : memref<8x8x256xf32, #tpu.memory_space<vmem>>, vector<8x8x256xf32>
    %c0_16 = arith.constant 0 : index
    %c0_17 = arith.constant 0 : index
    %38 = vector.load %arg7[%c0_16, %c0_17] : memref<8x1xf32, #tpu.memory_space<vmem>>, vector<8x1xf32>
    %39 = vector.shape_cast %38 : vector<8x1xf32> to vector<8x1xf32>
    %40 = vector.broadcast %39 : vector<8x1xf32> to vector<8x256xf32>
    %c0_18 = arith.constant 0 : index
    %c0_19 = arith.constant 0 : index
    %41 = memref.load %arg8[%c0_18, %c0_19] : memref<1x1xf32, #tpu.memory_space<smem>>
    %42 = vector.extract_strided_slice %37 {offsets = [0, 0, 0], sizes = [1, 8, 256], strides = [1, 1, 1]} : vector<8x8x256xf32> to vector<1x8x256xf32>
    %43 = vector.shape_cast %42 : vector<1x8x256xf32> to vector<8x256xf32>
    %44 = vector.shape_cast %43 : vector<8x256xf32> to vector<1x8x256xf32>
    %45 = vector.broadcast %44 : vector<1x8x256xf32> to vector<10x8x256xf32>
    %46 = arith.mulf %45, %30 : vector<10x8x256xf32>
    %cst_20 = arith.constant dense<0.000000e+00> : vector<10x256xf32>
    %47 = vector.multi_reduction <add>, %46, %cst_20 [1] : vector<10x8x256xf32> to vector<10x256xf32>
    %cst_21 = arith.constant 0.000000e+00 : f32
    %48 = vector.broadcast %cst_21 : f32 to vector<10x256xf32>
    %49 = arith.maximumf %47, %48 : vector<10x256xf32>
    %cst_22 = arith.constant dense<0xFF800000> : vector<256xf32>
    %50 = vector.multi_reduction <maximumf>, %49, %cst_22 [0] : vector<10x256xf32> to vector<256xf32>
    %51 = vector.shape_cast %50 : vector<256xf32> to vector<1x256xf32>
    %52 = vector.broadcast %51 : vector<1x256xf32> to vector<10x256xf32>
    %53 = arith.subf %49, %52 : vector<10x256xf32>
    %54 = math.exp %53 : vector<10x256xf32>
    %cst_23 = arith.constant dense<0.000000e+00> : vector<256xf32>
    %55 = vector.multi_reduction <add>, %54, %cst_23 [0] : vector<10x256xf32> to vector<256xf32>
    %56 = vector.shape_cast %55 : vector<256xf32> to vector<1x256xf32>
    %57 = vector.shape_cast %54 : vector<10x256xf32> to vector<10x1x256xf32>
    %58 = vector.broadcast %57 : vector<10x1x256xf32> to vector<10x8x256xf32>
    %59 = arith.mulf %58, %36 : vector<10x8x256xf32>
    %cst_24 = arith.constant dense<0.000000e+00> : vector<8x256xf32>
    %60 = vector.multi_reduction <add>, %59, %cst_24 [0] : vector<10x8x256xf32> to vector<8x256xf32>
    %cst_25 = arith.constant 0.000000e+00 : f32
    %61 = vector.broadcast %cst_25 : f32 to vector<8x256xf32>
    %62 = arith.cmpf ogt, %60, %61 : vector<8x256xf32>
    %cst_26 = arith.constant 0.00999999977 : f32
    %63 = vector.broadcast %cst_26 : f32 to vector<8x256xf32>
    %64 = arith.mulf %63, %60 : vector<8x256xf32>
    %65 = arith.select %62, %60, %64 : vector<8x256xi1>, vector<8x256xf32>
    %66 = arith.mulf %65, %40 : vector<8x256xf32>
    %cst_27 = arith.constant dense<0.000000e+00> : vector<256xf32>
    %67 = vector.multi_reduction <add>, %66, %cst_27 [0] : vector<8x256xf32> to vector<256xf32>
    %68 = vector.shape_cast %67 : vector<256xf32> to vector<1x256xf32>
    %69 = tpu.reciprocal %56 {approx = true} : vector<1x256xf32> -> vector<1x256xf32>
    %70 = arith.mulf %68, %69 : vector<1x256xf32>
    %71 = vector.extract_strided_slice %37 {offsets = [1, 0, 0], sizes = [1, 8, 256], strides = [1, 1, 1]} : vector<8x8x256xf32> to vector<1x8x256xf32>
    %72 = vector.shape_cast %71 : vector<1x8x256xf32> to vector<8x256xf32>
    %73 = vector.shape_cast %72 : vector<8x256xf32> to vector<1x8x256xf32>
    %74 = vector.broadcast %73 : vector<1x8x256xf32> to vector<10x8x256xf32>
    %75 = arith.mulf %74, %30 : vector<10x8x256xf32>
    %cst_28 = arith.constant dense<0.000000e+00> : vector<10x256xf32>
    %76 = vector.multi_reduction <add>, %75, %cst_28 [1] : vector<10x8x256xf32> to vector<10x256xf32>
    %cst_29 = arith.constant 0.000000e+00 : f32
    %77 = vector.broadcast %cst_29 : f32 to vector<10x256xf32>
    %78 = arith.maximumf %76, %77 : vector<10x256xf32>
    %cst_30 = arith.constant dense<0xFF800000> : vector<256xf32>
    %79 = vector.multi_reduction <maximumf>, %78, %cst_30 [0] : vector<10x256xf32> to vector<256xf32>
    %80 = vector.shape_cast %79 : vector<256xf32> to vector<1x256xf32>
    %81 = vector.broadcast %80 : vector<1x256xf32> to vector<10x256xf32>
    %82 = arith.subf %78, %81 : vector<10x256xf32>
    %83 = math.exp %82 : vector<10x256xf32>
    %cst_31 = arith.constant dense<0.000000e+00> : vector<256xf32>
    %84 = vector.multi_reduction <add>, %83, %cst_31 [0] : vector<10x256xf32> to vector<256xf32>
    %85 = vector.shape_cast %84 : vector<256xf32> to vector<1x256xf32>
    %86 = vector.shape_cast %83 : vector<10x256xf32> to vector<10x1x256xf32>
    %87 = vector.broadcast %86 : vector<10x1x256xf32> to vector<10x8x256xf32>
    %88 = arith.mulf %87, %36 : vector<10x8x256xf32>
    %cst_32 = arith.constant dense<0.000000e+00> : vector<8x256xf32>
    %89 = vector.multi_reduction <add>, %88, %cst_32 [0] : vector<10x8x256xf32> to vector<8x256xf32>
    %cst_33 = arith.constant 0.000000e+00 : f32
    %90 = vector.broadcast %cst_33 : f32 to vector<8x256xf32>
    %91 = arith.cmpf ogt, %89, %90 : vector<8x256xf32>
    %cst_34 = arith.constant 0.00999999977 : f32
    %92 = vector.broadcast %cst_34 : f32 to vector<8x256xf32>
    %93 = arith.mulf %92, %89 : vector<8x256xf32>
    %94 = arith.select %91, %89, %93 : vector<8x256xi1>, vector<8x256xf32>
    %95 = arith.mulf %94, %40 : vector<8x256xf32>
    %cst_35 = arith.constant dense<0.000000e+00> : vector<256xf32>
    %96 = vector.multi_reduction <add>, %95, %cst_35 [0] : vector<8x256xf32> to vector<256xf32>
    %97 = vector.shape_cast %96 : vector<256xf32> to vector<1x256xf32>
    %98 = tpu.reciprocal %85 {approx = true} : vector<1x256xf32> -> vector<1x256xf32>
    %99 = arith.mulf %97, %98 : vector<1x256xf32>
    %100 = vector.extract_strided_slice %37 {offsets = [2, 0, 0], sizes = [1, 8, 256], strides = [1, 1, 1]} : vector<8x8x256xf32> to vector<1x8x256xf32>
    %101 = vector.shape_cast %100 : vector<1x8x256xf32> to vector<8x256xf32>
    %102 = vector.shape_cast %101 : vector<8x256xf32> to vector<1x8x256xf32>
    %103 = vector.broadcast %102 : vector<1x8x256xf32> to vector<10x8x256xf32>
    %104 = arith.mulf %103, %30 : vector<10x8x256xf32>
    %cst_36 = arith.constant dense<0.000000e+00> : vector<10x256xf32>
    %105 = vector.multi_reduction <add>, %104, %cst_36 [1] : vector<10x8x256xf32> to vector<10x256xf32>
    %cst_37 = arith.constant 0.000000e+00 : f32
    %106 = vector.broadcast %cst_37 : f32 to vector<10x256xf32>
    %107 = arith.maximumf %105, %106 : vector<10x256xf32>
    %cst_38 = arith.constant dense<0xFF800000> : vector<256xf32>
    %108 = vector.multi_reduction <maximumf>, %107, %cst_38 [0] : vector<10x256xf32> to vector<256xf32>
    %109 = vector.shape_cast %108 : vector<256xf32> to vector<1x256xf32>
    %110 = vector.broadcast %109 : vector<1x256xf32> to vector<10x256xf32>
    %111 = arith.subf %107, %110 : vector<10x256xf32>
    %112 = math.exp %111 : vector<10x256xf32>
    %cst_39 = arith.constant dense<0.000000e+00> : vector<256xf32>
    %113 = vector.multi_reduction <add>, %112, %cst_39 [0] : vector<10x256xf32> to vector<256xf32>
    %114 = vector.shape_cast %113 : vector<256xf32> to vector<1x256xf32>
    %115 = vector.shape_cast %112 : vector<10x256xf32> to vector<10x1x256xf32>
    %116 = vector.broadcast %115 : vector<10x1x256xf32> to vector<10x8x256xf32>
    %117 = arith.mulf %116, %36 : vector<10x8x256xf32>
    %cst_40 = arith.constant dense<0.000000e+00> : vector<8x256xf32>
    %118 = vector.multi_reduction <add>, %117, %cst_40 [0] : vector<10x8x256xf32> to vector<8x256xf32>
    %cst_41 = arith.constant 0.000000e+00 : f32
    %119 = vector.broadcast %cst_41 : f32 to vector<8x256xf32>
    %120 = arith.cmpf ogt, %118, %119 : vector<8x256xf32>
    %cst_42 = arith.constant 0.00999999977 : f32
    %121 = vector.broadcast %cst_42 : f32 to vector<8x256xf32>
    %122 = arith.mulf %121, %118 : vector<8x256xf32>
    %123 = arith.select %120, %118, %122 : vector<8x256xi1>, vector<8x256xf32>
    %124 = arith.mulf %123, %40 : vector<8x256xf32>
    %cst_43 = arith.constant dense<0.000000e+00> : vector<256xf32>
    %125 = vector.multi_reduction <add>, %124, %cst_43 [0] : vector<8x256xf32> to vector<256xf32>
    %126 = vector.shape_cast %125 : vector<256xf32> to vector<1x256xf32>
    %127 = tpu.reciprocal %114 {approx = true} : vector<1x256xf32> -> vector<1x256xf32>
    %128 = arith.mulf %126, %127 : vector<1x256xf32>
    %129 = vector.extract_strided_slice %37 {offsets = [3, 0, 0], sizes = [1, 8, 256], strides = [1, 1, 1]} : vector<8x8x256xf32> to vector<1x8x256xf32>
    %130 = vector.shape_cast %129 : vector<1x8x256xf32> to vector<8x256xf32>
    %131 = vector.shape_cast %130 : vector<8x256xf32> to vector<1x8x256xf32>
    %132 = vector.broadcast %131 : vector<1x8x256xf32> to vector<10x8x256xf32>
    %133 = arith.mulf %132, %30 : vector<10x8x256xf32>
    %cst_44 = arith.constant dense<0.000000e+00> : vector<10x256xf32>
    %134 = vector.multi_reduction <add>, %133, %cst_44 [1] : vector<10x8x256xf32> to vector<10x256xf32>
    %cst_45 = arith.constant 0.000000e+00 : f32
    %135 = vector.broadcast %cst_45 : f32 to vector<10x256xf32>
    %136 = arith.maximumf %134, %135 : vector<10x256xf32>
    %cst_46 = arith.constant dense<0xFF800000> : vector<256xf32>
    %137 = vector.multi_reduction <maximumf>, %136, %cst_46 [0] : vector<10x256xf32> to vector<256xf32>
    %138 = vector.shape_cast %137 : vector<256xf32> to vector<1x256xf32>
    %139 = vector.broadcast %138 : vector<1x256xf32> to vector<10x256xf32>
    %140 = arith.subf %136, %139 : vector<10x256xf32>
    %141 = math.exp %140 : vector<10x256xf32>
    %cst_47 = arith.constant dense<0.000000e+00> : vector<256xf32>
    %142 = vector.multi_reduction <add>, %141, %cst_47 [0] : vector<10x256xf32> to vector<256xf32>
    %143 = vector.shape_cast %142 : vector<256xf32> to vector<1x256xf32>
    %144 = vector.shape_cast %141 : vector<10x256xf32> to vector<10x1x256xf32>
    %145 = vector.broadcast %144 : vector<10x1x256xf32> to vector<10x8x256xf32>
    %146 = arith.mulf %145, %36 : vector<10x8x256xf32>
    %cst_48 = arith.constant dense<0.000000e+00> : vector<8x256xf32>
    %147 = vector.multi_reduction <add>, %146, %cst_48 [0] : vector<10x8x256xf32> to vector<8x256xf32>
    %cst_49 = arith.constant 0.000000e+00 : f32
    %148 = vector.broadcast %cst_49 : f32 to vector<8x256xf32>
    %149 = arith.cmpf ogt, %147, %148 : vector<8x256xf32>
    %cst_50 = arith.constant 0.00999999977 : f32
    %150 = vector.broadcast %cst_50 : f32 to vector<8x256xf32>
    %151 = arith.mulf %150, %147 : vector<8x256xf32>
    %152 = arith.select %149, %147, %151 : vector<8x256xi1>, vector<8x256xf32>
    %153 = arith.mulf %152, %40 : vector<8x256xf32>
    %cst_51 = arith.constant dense<0.000000e+00> : vector<256xf32>
    %154 = vector.multi_reduction <add>, %153, %cst_51 [0] : vector<8x256xf32> to vector<256xf32>
    %155 = vector.shape_cast %154 : vector<256xf32> to vector<1x256xf32>
    %156 = tpu.reciprocal %143 {approx = true} : vector<1x256xf32> -> vector<1x256xf32>
    %157 = arith.mulf %155, %156 : vector<1x256xf32>
    %158 = vector.extract_strided_slice %37 {offsets = [4, 0, 0], sizes = [1, 8, 256], strides = [1, 1, 1]} : vector<8x8x256xf32> to vector<1x8x256xf32>
    %159 = vector.shape_cast %158 : vector<1x8x256xf32> to vector<8x256xf32>
    %160 = vector.shape_cast %159 : vector<8x256xf32> to vector<1x8x256xf32>
    %161 = vector.broadcast %160 : vector<1x8x256xf32> to vector<10x8x256xf32>
    %162 = arith.mulf %161, %30 : vector<10x8x256xf32>
    %cst_52 = arith.constant dense<0.000000e+00> : vector<10x256xf32>
    %163 = vector.multi_reduction <add>, %162, %cst_52 [1] : vector<10x8x256xf32> to vector<10x256xf32>
    %cst_53 = arith.constant 0.000000e+00 : f32
    %164 = vector.broadcast %cst_53 : f32 to vector<10x256xf32>
    %165 = arith.maximumf %163, %164 : vector<10x256xf32>
    %cst_54 = arith.constant dense<0xFF800000> : vector<256xf32>
    %166 = vector.multi_reduction <maximumf>, %165, %cst_54 [0] : vector<10x256xf32> to vector<256xf32>
    %167 = vector.shape_cast %166 : vector<256xf32> to vector<1x256xf32>
    %168 = vector.broadcast %167 : vector<1x256xf32> to vector<10x256xf32>
    %169 = arith.subf %165, %168 : vector<10x256xf32>
    %170 = math.exp %169 : vector<10x256xf32>
    %cst_55 = arith.constant dense<0.000000e+00> : vector<256xf32>
    %171 = vector.multi_reduction <add>, %170, %cst_55 [0] : vector<10x256xf32> to vector<256xf32>
    %172 = vector.shape_cast %171 : vector<256xf32> to vector<1x256xf32>
    %173 = vector.shape_cast %170 : vector<10x256xf32> to vector<10x1x256xf32>
    %174 = vector.broadcast %173 : vector<10x1x256xf32> to vector<10x8x256xf32>
    %175 = arith.mulf %174, %36 : vector<10x8x256xf32>
    %cst_56 = arith.constant dense<0.000000e+00> : vector<8x256xf32>
    %176 = vector.multi_reduction <add>, %175, %cst_56 [0] : vector<10x8x256xf32> to vector<8x256xf32>
    %cst_57 = arith.constant 0.000000e+00 : f32
    %177 = vector.broadcast %cst_57 : f32 to vector<8x256xf32>
    %178 = arith.cmpf ogt, %176, %177 : vector<8x256xf32>
    %cst_58 = arith.constant 0.00999999977 : f32
    %179 = vector.broadcast %cst_58 : f32 to vector<8x256xf32>
    %180 = arith.mulf %179, %176 : vector<8x256xf32>
    %181 = arith.select %178, %176, %180 : vector<8x256xi1>, vector<8x256xf32>
    %182 = arith.mulf %181, %40 : vector<8x256xf32>
    %cst_59 = arith.constant dense<0.000000e+00> : vector<256xf32>
    %183 = vector.multi_reduction <add>, %182, %cst_59 [0] : vector<8x256xf32> to vector<256xf32>
    %184 = vector.shape_cast %183 : vector<256xf32> to vector<1x256xf32>
    %185 = tpu.reciprocal %172 {approx = true} : vector<1x256xf32> -> vector<1x256xf32>
    %186 = arith.mulf %184, %185 : vector<1x256xf32>
    %187 = vector.extract_strided_slice %37 {offsets = [5, 0, 0], sizes = [1, 8, 256], strides = [1, 1, 1]} : vector<8x8x256xf32> to vector<1x8x256xf32>
    %188 = vector.shape_cast %187 : vector<1x8x256xf32> to vector<8x256xf32>
    %189 = vector.shape_cast %188 : vector<8x256xf32> to vector<1x8x256xf32>
    %190 = vector.broadcast %189 : vector<1x8x256xf32> to vector<10x8x256xf32>
    %191 = arith.mulf %190, %30 : vector<10x8x256xf32>
    %cst_60 = arith.constant dense<0.000000e+00> : vector<10x256xf32>
    %192 = vector.multi_reduction <add>, %191, %cst_60 [1] : vector<10x8x256xf32> to vector<10x256xf32>
    %cst_61 = arith.constant 0.000000e+00 : f32
    %193 = vector.broadcast %cst_61 : f32 to vector<10x256xf32>
    %194 = arith.maximumf %192, %193 : vector<10x256xf32>
    %cst_62 = arith.constant dense<0xFF800000> : vector<256xf32>
    %195 = vector.multi_reduction <maximumf>, %194, %cst_62 [0] : vector<10x256xf32> to vector<256xf32>
    %196 = vector.shape_cast %195 : vector<256xf32> to vector<1x256xf32>
    %197 = vector.broadcast %196 : vector<1x256xf32> to vector<10x256xf32>
    %198 = arith.subf %194, %197 : vector<10x256xf32>
    %199 = math.exp %198 : vector<10x256xf32>
    %cst_63 = arith.constant dense<0.000000e+00> : vector<256xf32>
    %200 = vector.multi_reduction <add>, %199, %cst_63 [0] : vector<10x256xf32> to vector<256xf32>
    %201 = vector.shape_cast %200 : vector<256xf32> to vector<1x256xf32>
    %202 = vector.shape_cast %199 : vector<10x256xf32> to vector<10x1x256xf32>
    %203 = vector.broadcast %202 : vector<10x1x256xf32> to vector<10x8x256xf32>
    %204 = arith.mulf %203, %36 : vector<10x8x256xf32>
    %cst_64 = arith.constant dense<0.000000e+00> : vector<8x256xf32>
    %205 = vector.multi_reduction <add>, %204, %cst_64 [0] : vector<10x8x256xf32> to vector<8x256xf32>
    %cst_65 = arith.constant 0.000000e+00 : f32
    %206 = vector.broadcast %cst_65 : f32 to vector<8x256xf32>
    %207 = arith.cmpf ogt, %205, %206 : vector<8x256xf32>
    %cst_66 = arith.constant 0.00999999977 : f32
    %208 = vector.broadcast %cst_66 : f32 to vector<8x256xf32>
    %209 = arith.mulf %208, %205 : vector<8x256xf32>
    %210 = arith.select %207, %205, %209 : vector<8x256xi1>, vector<8x256xf32>
    %211 = arith.mulf %210, %40 : vector<8x256xf32>
    %cst_67 = arith.constant dense<0.000000e+00> : vector<256xf32>
    %212 = vector.multi_reduction <add>, %211, %cst_67 [0] : vector<8x256xf32> to vector<256xf32>
    %213 = vector.shape_cast %212 : vector<256xf32> to vector<1x256xf32>
    %214 = tpu.reciprocal %201 {approx = true} : vector<1x256xf32> -> vector<1x256xf32>
    %215 = arith.mulf %213, %214 : vector<1x256xf32>
    %216 = vector.extract_strided_slice %37 {offsets = [6, 0, 0], sizes = [1, 8, 256], strides = [1, 1, 1]} : vector<8x8x256xf32> to vector<1x8x256xf32>
    %217 = vector.shape_cast %216 : vector<1x8x256xf32> to vector<8x256xf32>
    %218 = vector.shape_cast %217 : vector<8x256xf32> to vector<1x8x256xf32>
    %219 = vector.broadcast %218 : vector<1x8x256xf32> to vector<10x8x256xf32>
    %220 = arith.mulf %219, %30 : vector<10x8x256xf32>
    %cst_68 = arith.constant dense<0.000000e+00> : vector<10x256xf32>
    %221 = vector.multi_reduction <add>, %220, %cst_68 [1] : vector<10x8x256xf32> to vector<10x256xf32>
    %cst_69 = arith.constant 0.000000e+00 : f32
    %222 = vector.broadcast %cst_69 : f32 to vector<10x256xf32>
    %223 = arith.maximumf %221, %222 : vector<10x256xf32>
    %cst_70 = arith.constant dense<0xFF800000> : vector<256xf32>
    %224 = vector.multi_reduction <maximumf>, %223, %cst_70 [0] : vector<10x256xf32> to vector<256xf32>
    %225 = vector.shape_cast %224 : vector<256xf32> to vector<1x256xf32>
    %226 = vector.broadcast %225 : vector<1x256xf32> to vector<10x256xf32>
    %227 = arith.subf %223, %226 : vector<10x256xf32>
    %228 = math.exp %227 : vector<10x256xf32>
    %cst_71 = arith.constant dense<0.000000e+00> : vector<256xf32>
    %229 = vector.multi_reduction <add>, %228, %cst_71 [0] : vector<10x256xf32> to vector<256xf32>
    %230 = vector.shape_cast %229 : vector<256xf32> to vector<1x256xf32>
    %231 = vector.shape_cast %228 : vector<10x256xf32> to vector<10x1x256xf32>
    %232 = vector.broadcast %231 : vector<10x1x256xf32> to vector<10x8x256xf32>
    %233 = arith.mulf %232, %36 : vector<10x8x256xf32>
    %cst_72 = arith.constant dense<0.000000e+00> : vector<8x256xf32>
    %234 = vector.multi_reduction <add>, %233, %cst_72 [0] : vector<10x8x256xf32> to vector<8x256xf32>
    %cst_73 = arith.constant 0.000000e+00 : f32
    %235 = vector.broadcast %cst_73 : f32 to vector<8x256xf32>
    %236 = arith.cmpf ogt, %234, %235 : vector<8x256xf32>
    %cst_74 = arith.constant 0.00999999977 : f32
    %237 = vector.broadcast %cst_74 : f32 to vector<8x256xf32>
    %238 = arith.mulf %237, %234 : vector<8x256xf32>
    %239 = arith.select %236, %234, %238 : vector<8x256xi1>, vector<8x256xf32>
    %240 = arith.mulf %239, %40 : vector<8x256xf32>
    %cst_75 = arith.constant dense<0.000000e+00> : vector<256xf32>
    %241 = vector.multi_reduction <add>, %240, %cst_75 [0] : vector<8x256xf32> to vector<256xf32>
    %242 = vector.shape_cast %241 : vector<256xf32> to vector<1x256xf32>
    %243 = tpu.reciprocal %230 {approx = true} : vector<1x256xf32> -> vector<1x256xf32>
    %244 = arith.mulf %242, %243 : vector<1x256xf32>
    %245 = vector.extract_strided_slice %37 {offsets = [7, 0, 0], sizes = [1, 8, 256], strides = [1, 1, 1]} : vector<8x8x256xf32> to vector<1x8x256xf32>
    %246 = vector.shape_cast %245 : vector<1x8x256xf32> to vector<8x256xf32>
    %247 = vector.shape_cast %246 : vector<8x256xf32> to vector<1x8x256xf32>
    %248 = vector.broadcast %247 : vector<1x8x256xf32> to vector<10x8x256xf32>
    %249 = arith.mulf %248, %30 : vector<10x8x256xf32>
    %cst_76 = arith.constant dense<0.000000e+00> : vector<10x256xf32>
    %250 = vector.multi_reduction <add>, %249, %cst_76 [1] : vector<10x8x256xf32> to vector<10x256xf32>
    %cst_77 = arith.constant 0.000000e+00 : f32
    %251 = vector.broadcast %cst_77 : f32 to vector<10x256xf32>
    %252 = arith.maximumf %250, %251 : vector<10x256xf32>
    %cst_78 = arith.constant dense<0xFF800000> : vector<256xf32>
    %253 = vector.multi_reduction <maximumf>, %252, %cst_78 [0] : vector<10x256xf32> to vector<256xf32>
    %254 = vector.shape_cast %253 : vector<256xf32> to vector<1x256xf32>
    %255 = vector.broadcast %254 : vector<1x256xf32> to vector<10x256xf32>
    %256 = arith.subf %252, %255 : vector<10x256xf32>
    %257 = math.exp %256 : vector<10x256xf32>
    %cst_79 = arith.constant dense<0.000000e+00> : vector<256xf32>
    %258 = vector.multi_reduction <add>, %257, %cst_79 [0] : vector<10x256xf32> to vector<256xf32>
    %259 = vector.shape_cast %258 : vector<256xf32> to vector<1x256xf32>
    %260 = vector.shape_cast %257 : vector<10x256xf32> to vector<10x1x256xf32>
    %261 = vector.broadcast %260 : vector<10x1x256xf32> to vector<10x8x256xf32>
    %262 = arith.mulf %261, %36 : vector<10x8x256xf32>
    %cst_80 = arith.constant dense<0.000000e+00> : vector<8x256xf32>
    %263 = vector.multi_reduction <add>, %262, %cst_80 [0] : vector<10x8x256xf32> to vector<8x256xf32>
    %cst_81 = arith.constant 0.000000e+00 : f32
    %264 = vector.broadcast %cst_81 : f32 to vector<8x256xf32>
    %265 = arith.cmpf ogt, %263, %264 : vector<8x256xf32>
    %cst_82 = arith.constant 0.00999999977 : f32
    %266 = vector.broadcast %cst_82 : f32 to vector<8x256xf32>
    %267 = arith.mulf %266, %263 : vector<8x256xf32>
    %268 = arith.select %265, %263, %267 : vector<8x256xi1>, vector<8x256xf32>
    %269 = arith.mulf %268, %40 : vector<8x256xf32>
    %cst_83 = arith.constant dense<0.000000e+00> : vector<256xf32>
    %270 = vector.multi_reduction <add>, %269, %cst_83 [0] : vector<8x256xf32> to vector<256xf32>
    %271 = vector.shape_cast %270 : vector<256xf32> to vector<1x256xf32>
    %272 = tpu.reciprocal %259 {approx = true} : vector<1x256xf32> -> vector<1x256xf32>
    %273 = arith.mulf %271, %272 : vector<1x256xf32>
    %274 = tpu.concatenate %70, %99, %128, %157, %186, %215, %244, %273 in 0 : vector<1x256xf32>, vector<1x256xf32>, vector<1x256xf32>, vector<1x256xf32>, vector<1x256xf32>, vector<1x256xf32>, vector<1x256xf32>, vector<1x256xf32> -> vector<8x256xf32>
    %275 = vector.broadcast %41 : f32 to vector<8x256xf32>
    %276 = arith.addf %274, %275 : vector<8x256xf32>
    %c0_84 = arith.constant 0 : index
    %c0_85 = arith.constant 0 : index
    %c0_86 = arith.constant 0 : index
    %277 = vector.load %arg9[%c0_84, %c0_85, %c0_86] : memref<1x8x256xf32, #tpu.memory_space<vmem>>, vector<1x8x256xf32>
    %278 = vector.shape_cast %277 : vector<1x8x256xf32> to vector<8x256xf32>
    %279 = vector.shape_cast %276 : vector<8x256xf32> to vector<1x8x256xf32>
    tpu.vector_store %arg9[%c0_84, %c0_85, %c0_86], %279 {strides = array<i32>} : memref<1x8x256xf32, #tpu.memory_space<vmem>>, vector<1x8x256xf32>,
    return
  }
  func.func @transform_0(%arg0: i32) -> (i32, i32, i32) {
    %c0_i32 = arith.constant 0 : i32
    %c0_i32_0 = arith.constant 0 : i32
    %c0_i32_1 = arith.constant 0 : i32
    return %c0_i32, %c0_i32_0, %arg0 : i32, i32, i32
  }
  func.func @transform_1(%arg0: i32) -> (i32, i32, i32) {
    %c0_i32 = arith.constant 0 : i32
    %c0_i32_0 = arith.constant 0 : i32
    %c0_i32_1 = arith.constant 0 : i32
    return %c0_i32, %c0_i32_0, %arg0 : i32, i32, i32
  }
  func.func @transform_2(%arg0: i32) -> (i32, i32) {
    %c0_i32 = arith.constant 0 : i32
    %c0_i32_0 = arith.constant 0 : i32
    return %c0_i32, %arg0 : i32, i32
  }
  func.func @transform_3(%arg0: i32) -> (i32, i32) {
    %c0_i32 = arith.constant 0 : i32
    %c0_i32_0 = arith.constant 0 : i32
    return %c0_i32, %arg0 : i32, i32
  }
  func.func @transform_4(%arg0: i32) -> (i32, i32) {
    %c0_i32 = arith.constant 0 : i32
    %c0_i32_0 = arith.constant 0 : i32
    %c0_i32_1 = arith.constant 0 : i32
    return %c0_i32, %c0_i32_0 : i32, i32
  }
  func.func @transform_5(%arg0: i32) -> (i32, i32) {
    %c0_i32 = arith.constant 0 : i32
    %c0_i32_0 = arith.constant 0 : i32
    %c0_i32_1 = arith.constant 0 : i32
    return %c0_i32, %c0_i32_0 : i32, i32
  }
  func.func @transform_6(%arg0: i32) -> (i32, i32) {
    %c0_i32 = arith.constant 0 : i32
    %c0_i32_0 = arith.constant 0 : i32
    %c0_i32_1 = arith.constant 0 : i32
    return %c0_i32, %c0_i32_0 : i32, i32
  }
  func.func @transform_7(%arg0: i32) -> (i32, i32) {
    %c0_i32 = arith.constant 0 : i32
    %c0_i32_0 = arith.constant 0 : i32
    %c0_i32_1 = arith.constant 0 : i32
    return %c0_i32, %c0_i32_0 : i32, i32
  }
  func.func @transform_8(%arg0: i32) -> (i32, i32, i32) {
    %c0_i32 = arith.constant 0 : i32
    %c0_i32_0 = arith.constant 0 : i32
    %c0_i32_1 = arith.constant 0 : i32
    return %arg0, %c0_i32, %c0_i32_0 : i32, i32, i32
  }
}

</mosaic_0001>

<bundles_post_ra>
// kernel: _lambda_.1
= control target key start
LH: loop header
LB: loop body
LE: loop exit
PB: predicated region body
PF: predicated region fallthrough
CT: control target
= control target key end

     0   :  { %v4528_v1 = vmov 2   ;;  %v4529_v2 = vmov 0   ;;  %s7759_s0 = inlined_call_operand.vmem [shape: f32[8,16,256], index: 0, kind: input, shape index: {}]   ;;  %s7760_s1 = inlined_call_operand.vmem [shape: f32[8,8,256], index: 1, kind: input, shape index: {}]   ;;  %s7761_s2 = inlined_call_operand.vmem [shape: f32[1,256], index: 2, kind: input, shape index: {}]   ;;  %s7762_s3 = inlined_call_operand.vmem [shape: f32[1,256], index: 3, kind: input, shape index: {}]   ;;  %s7763_s4 = inlined_call_operand.vmem [shape: f32[32,4], index: 4, kind: input, shape index: {}]   ;;  %s7764_s5 = inlined_call_operand.vmem [shape: f32[16,32], index: 5, kind: input, shape index: {}]   ;;  %s7765_s6 = inlined_call_operand.vmem [shape: f32[8,1], index: 6, kind: input, shape index: {}]   ;;  %s7766_s7 = inlined_call_operand.<no memory space> [shape: f32[1,1], index: 7, kind: input, shape index: {}]   ;;  %s7767_s8 = inlined_call_operand.hbm [shape: f32[1,8,256], index: 8, kind: output, shape index: {}]  }
   0x1   :  { %v31_v0 = vld [vmem:[%s7763_s4] sm:$0xff]  ;;  %4125 = vset.pattern.permute.xlu1 %v4528_v1  ;;  %4124 = vset.pattern.permute.xlu0 %v4529_v2 }
   0x2   :  { %109 = vperm.xlu1 %4125, %v31_v0   ;;  %39 = vperm.xlu0 %4124, %v31_v0  }
   0x3   :  { %14 = vsyncpa [#allocation4], 0  ;;  %v32_v3 = vld [vmem:[%s7763_s4 + $0x8] sm:$0xff]  ;;  %v4530_v4 = vmov 1   ;;  %v4531_v5 = vmov 3   ;;  %v33_v6 = vld [vmem:[%s7763_s4 + $0x10] sm:$0xff]  ;;  %v58_v10 = vlaneseq }
   0x4   :  { %v34_v7 = vld [vmem:[%s7763_s4 + $0x18] sm:$0xff]  ;;  %v4532_v8 = vmov 0.0   ;;  %v386_v9 = vld [vmem:[%s7765_s6] sm:$0xff]  ;;  %vm177_vm0 = vcmask 261120   ;;  %vm652_vm5 = vcmask 1041409   ;;  %vm655_vm6 = vcmask 1042434  }
   0x5   :  { %248 = vmatprep.mubr.f32.mxu0 %v4532_v8  ;;  %325 = vmatprep.mubr.f32.mxu1 %v4532_v8  ;;  %v59_v13 = vshrl.u32 %v58_v10, 7  ;;  %v36_v18 = vld [vmem:[%s7762_s3] sm:$0x3]  ;;  %vm658_vm7 = vcmask 1043459   ;;  %vm661_vm8 = vcmask 1044484   ;;  %vm664_vm9 = vcmask 1045509  }
   0x6   :  { %113 = vperm.xlu1 %4125, %v32_v3   ;;  %44 = vperm.xlu0 %4124, %v32_v3   ;;  %v35_v19 = vld [vmem:[%s7761_s2] sm:$0x3]  ;;  %vm667_vm10 = vcmask 1046534   ;;  %vm670_vm11 = vcmask 1047559   ;;  %s4533_s4 = smov [#allocation3]  }
   0x7   :  { %v4596_v16 = vsub.s32 0, %v59_v13  ;;  %v64_v17 = vsub.s32 1, %v59_v13  ;;  %s4090_s15 = sshll.u32 %s4533_s4, 4  ;;  %s4091_s15 = int_to_ptr.vmem [resolvable:$true] %s4090_s15 }
   0x8   :  { %s4504_s16 = scalar_lea.vmem %s4091_s15, 256  ;;  %p4509_p1 = scmp.lt.s32.totalorder %s4091_s15, %s4091_s15 }
   0x9   :  { %8087 = vst [vmem:[#allocation6_spill] sm:$0xff] %v4596_v16  ;;  %v4605_v20 = vrot.slane %v36_v18, %v4596_v16  ;;  %v4607_v21 = vrot.slane %v36_v18, %v64_v17  ;;  %v61_v23 = vrot.slane %v35_v19, %v4596_v16  ;;  %v65_v24 = vrot.slane %v35_v19, %v64_v17  ;;  %p4505_p0 = scmp.ne.s32.totalorder %s4091_s15, %s4504_s16  ;;  %p4510_p2 = scmp.lt.s32.totalorder %s4504_s16, %s4504_s16 }
   0xa   :  { %4126 = vset.pattern.permute.xlu1 %v4530_v4  ;;  %4128 = vset.pattern.permute.xlu0 %v4531_v5 }
   0xb   :  { %81 = vperm.xlu1 %4126, %v32_v3   ;;  %148 = vperm.xlu0 %4128, %v32_v3   ;;  %p4511_p3 = por %p4510_p2, %p4509_p1 }
   0xd   :  { %p4512_p4 = pnand %p4511_p3, %p4505_p0 }
   0xf   :  { %4127 = vset.pattern.permute.xlu1 %v4531_v5  ;;  %4130 = vset.pattern.permute.xlu0 %v4528_v1 }
  0x10   :  { %144 = vperm.xlu1 %4127, %v31_v0   ;;  %117 = vperm.xlu0 %4130, %v33_v6  }
  0x14   :  { %4129 = vset.pattern.permute.xlu1 %v4529_v2  ;;  %4131 = vset.pattern.permute.xlu0 %v4530_v4 }
  0x15   :  { %49 = vperm.xlu1 %4129, %v33_v6   ;;  %77 = vperm.xlu0 %4131, %v31_v0  }
  0x19   :  { %54 = vperm.xlu1 %4129, %v34_v7   ;;  %89 = vperm.xlu0 %4131, %v34_v7  }
  0x1d   :  { %4132 = vset.pattern.permute.xlu1 %v4528_v1  ;;  %4135 = vset.pattern.permute.xlu0 %v4529_v2 }
  0x1e   :  { %121 = vperm.xlu1 %4132, %v34_v7   ;;  %389 = vperm.xlu0 %4135, %v386_v9  }
  0x22   :  { %4133 = vset.pattern.permute.xlu1 %v4530_v4 }
  0x23   :  { %85 = vperm.xlu1 %4133, %v33_v6  }
  0x27   :  { %4134 = vset.pattern.permute.xlu1 %v4531_v5 }
  0x28   :  { %152 = vperm.xlu1 %4134, %v33_v6  }
  0x2c   :  { %156 = vperm.xlu1 %4134, %v34_v7  }
  0x81   :  { %v110_v11 = vpop.permute.xlu1 %109  ;;  %v40_v12 = vpop.permute.xlu0 %39 }
  0x82   :  { %v135_v28 = vmul.f32 %v4605_v20, %v110_v11  ;;  %v136_v29 = vmul.f32 %v4607_v21, %v110_v11  ;;  %v68_v38 = vmul.f32 %v61_v23, %v40_v12  ;;  %v69_v39 = vmul.f32 %v65_v24, %v40_v12 }
  0x85   :  { %v114_v14 = vpop.permute.xlu1 %113  ;;  %v45_v15 = vpop.permute.xlu0 %44 }
  0x86   :  { %v137_v26 = vmul.f32 %v4605_v20, %v114_v14  ;;  %v138_v27 = vmul.f32 %v4607_v21, %v114_v14  ;;  %v70_v32 = vmul.f32 %v61_v23, %v45_v15  ;;  %v71_v33 = vmul.f32 %v65_v24, %v45_v15 }
  0x8a   :  { %v82_v22 = vpop.permute.xlu1 %81  ;;  %v149_v25 = vpop.permute.xlu0 %148 }
  0x8b   :  { %v161_v30 = vadd.f32 %v149_v25, %v137_v26  ;;  %v162_v31 = vadd.f32 %v149_v25, %v138_v27  ;;  %v94_v44 = vadd.f32 %v82_v22, %v70_v32  ;;  %v95_v45 = vadd.f32 %v82_v22, %v71_v33  ;;  %v4633_v32 = vld [vmem:[%s7759_s0] sm:$0xff] }
  0x8c   :  { %v4638_v33 = vld [vmem:[%s7759_s0 + $0x40] sm:$0xff] }
  0x8d   :  { %v169_v40 = vmax.f32 %v161_v30, 0.0  ;;  %v170_v43 = vmax.f32 %v162_v31, 0.0  ;;  %v102_v52 = vmax.f32 %v94_v44, 0.0  ;;  %v103_v55 = vmax.f32 %v95_v45, 0.0 }
  0x8f   :  { %v145_v34 = vpop.permute.xlu1 %144  ;;  %v118_v35 = vpop.permute.xlu0 %117 }
  0x90   :  { %v159_v36 = vadd.f32 %v145_v34, %v135_v28  ;;  %v160_v37 = vadd.f32 %v145_v34, %v136_v29  ;;  %v139_v14 = vmul.f32 %v4605_v20, %v118_v35  ;;  %v140_v15 = vmul.f32 %v4607_v21, %v118_v35  ;;  %v370_v34 = vld [vmem:[%s7760_s1] sm:$0xff] }
  0x91   :  { %v4649_v35 = vld [vmem:[%s7760_s1 + $0x20] sm:$0xff] }
  0x92   :  { %v167_v41 = vmax.f32 %v159_v36, 0.0  ;;  %v168_v42 = vmax.f32 %v160_v37, 0.0  ;;  %v393_v36 = vmul.f32 %v370_v34, %v4633_v32  ;;  %v397_v37 = vmul.f32 %v370_v34, %v4638_v33 }
  0x94   :  { %v50_v46 = vpop.permute.xlu1 %49  ;;  %v78_v47 = vpop.permute.xlu0 %77  ;;  %v4110_v48 = vpack.c.bf16 %v170_v43, %v168_v42  ;;  %v4112_v49 = vpack.c.bf16 %v169_v40, %v167_v41  ;;  %v4662_v41 = vmul.f32 %v4649_v35, %v4633_v32  ;;  %v4666_v42 = vmul.f32 %v4649_v35, %v4638_v33  ;;  %v4671_v43 = vld [vmem:[%s7759_s0 + $0xc0] sm:$0xff] }
  0x95   :  { %v92_v50 = vadd.f32 %v78_v47, %v68_v38  ;;  %v93_v51 = vadd.f32 %v78_v47, %v69_v39  ;;  %v72_v63 = vmul.f32 %v61_v23, %v50_v46  ;;  %v73_v0 = vmul.f32 %v65_v24, %v50_v46  ;;  %v4656_v38 = vld [vmem:[%s7759_s0 + $0x80] sm:$0xff] }
  0x96   :  { %4111 = vmatprep.subr.bf16.mxu1 %v4110_v48  ;;  %v401_v44 = vmul.f32 %v370_v34, %v4656_v38  ;;  %v413_v45 = vrot.slane %v393_v36, 4  ;;  %v437_v46 = vrot.slane %v397_v37, 4  ;;  %v405_v48 = vmul.f32 %v370_v34, %v4671_v43 }
  0x97   :  { %v100_v53 = vmax.f32 %v92_v50, 0.0  ;;  %4113 = vmatpush1.bf16.msra.mxu1 %v4112_v49  ;;  %v101_v54 = vmax.f32 %v93_v51, 0.0  ;;  %v4678_v51 = vmul.f32 %v4649_v35, %v4656_v38 }
  0x98   :  { %v55_v56 = vpop.permute.xlu1 %54  ;;  %v90_v62 = vpop.permute.xlu0 %89 }
  0x99   :  { %v4102_v57 = vpack.c.bf16 %v103_v55, %v101_v54  ;;  %v4104_v58 = vpack.c.bf16 %v102_v52, %v100_v53  ;;  %v74_v59 = vmul.f32 %v61_v23, %v55_v56  ;;  %v75_v60 = vmul.f32 %v65_v24, %v55_v56  ;;  %v175_v23 = vld [vmem:[%s7764_s5] sm:$0xff] }
  0x9a   :  { %v414_v52 = vadd.f32 %v413_v45, %v393_v36  ;;  %v438_v53 = vadd.f32 %v437_v46, %v397_v37  ;;  %v461_v54 = vrot.slane %v401_v44, 4  ;;  %v485_v56 = vrot.slane %v405_v48, 4 }
  0x9b   :  { %4103 = vmatprep.subr.bf16.mxu0 %v4102_v57  ;;  %v98_v1 = vadd.f32 %v90_v62, %v74_v59  ;;  %v99_v2 = vadd.f32 %v90_v62, %v75_v60  ;;  %v1317_v45 = vmul.f32 %v4649_v35, %v4671_v43 }
  0x9c   :  { %4105 = vmatpush1.bf16.msra.mxu0 %v4104_v58  ;;  %v415_v60 = vrot.slane %v414_v52, 2  ;;  %v462_v62 = vadd.f32 %v461_v54, %v401_v44 }
  0x9d   :  { %v122_v61 = vpop.permute.xlu1 %121  ;;  %v106_v6 = vmax.f32 %v98_v1, 0.0  ;;  %v107_v7 = vmax.f32 %v99_v2, 0.0 }
  0x9e   :  { %v141_v17 = vmul.f32 %v4605_v20, %v122_v61  ;;  %v142_v18 = vmul.f32 %v4607_v21, %v122_v61  ;;  %v176_v20 = vld [vmem:[%s7764_s5 + $0x8] sm:$0xff]  ;;  %v439_v61 = vrot.slane %v438_v53, 2 }
  0xa2   :  { %v86_v3 = vpop.permute.xlu1 %85 }
  0xa3   :  { %v96_v4 = vadd.f32 %v86_v3, %v72_v63  ;;  %v97_v5 = vadd.f32 %v86_v3, %v73_v0  ;;  %v486_v0 = vadd.f32 %v485_v56, %v405_v48  ;;  %v1325_v48 = vrot.slane %v4662_v41, 4 }
  0xa5   :  { %v104_v9 = vmax.f32 %v96_v4, 0.0  ;;  %v105_v10 = vmax.f32 %v97_v5, 0.0  ;;  %v416_v4 = vadd.f32 %v415_v60, %v414_v52  ;;  %v440_v5 = vadd.f32 %v439_v61, %v438_v53 }
  0xa6   :  { %v1349_v52 = vrot.slane %v4666_v42, 4  ;;  %v1373_v53 = vrot.slane %v4678_v51, 4  ;;  %v1326_v35 = vadd.f32 %v1325_v48, %v4662_v41 }
  0xa7   :  { %v153_v11 = vpop.permute.xlu1 %152  ;;  %v4106_v12 = vpack.c.bf16 %v107_v7, %v105_v10  ;;  %v4108_v13 = vpack.c.bf16 %v106_v6, %v104_v9  ;;  %v463_v6 = vrot.slane %v462_v62, 2  ;;  %v487_v9 = vrot.slane %v486_v0, 2 }
  0xa8   :  { %v163_v19 = vadd.f32 %v153_v11, %v139_v14  ;;  %v164_v22 = vadd.f32 %v153_v11, %v140_v15  ;;  %v441_v14 = vrot.slane %v440_v5, 1  ;;  %v1327_v41 = vrot.slane %v1326_v35, 2 }
  0xa9   :  { %4107 = vmatprep.subr.bf16.mxu0 %v4106_v12  ;;  %v464_v15 = vadd.f32 %v463_v6, %v462_v62 }
  0xaa   :  { %4109 = vmatpush1.bf16.msra.mxu0 %v4108_v13  ;;  %v171_v27 = vmax.f32 %v163_v19, 0.0  ;;  %v172_v28 = vmax.f32 %v164_v22, 0.0  ;;  %v417_v13 = vrot.slane %v416_v4, 1 }
  0xab   :  { %v157_v24 = vpop.permute.xlu1 %156 }
  0xac   :  { %v165_v25 = vadd.f32 %v157_v24, %v141_v17  ;;  %v166_v26 = vadd.f32 %v157_v24, %v142_v18  ;;  %v488_v18 = vadd.f32 %v487_v9, %v486_v0  ;;  %v4681_v24 = vadd.f32 %v417_v13, %v416_v4 }
  0xad   :  { %4098 = vmatmul.mubr.msk.f32.vlgmr.msra.gmra.mrb[0].mxu0 %vm177_vm0, %v175_v23 }
  0xae   :  { %v173_v29 = vmax.f32 %v165_v25, 0.0  ;;  %v174_v30 = vmax.f32 %v166_v26, 0.0  ;;  %254 = vmatprep.mubr.f32.mxu0 %v4532_v8  ;;  %8088 = vst [vmem:[#allocation7_spill] sm:$0xff] %v4681_v24  ;;  %v4683_v25 = vadd.f32 %v441_v14, %v440_v5  ;;  %v465_v26 = vrot.slane %v464_v15, 1 }
  0xb0   :  { %v4114_v21 = vpack.c.bf16 %v174_v30, %v172_v28  ;;  %v4116_v31 = vpack.c.bf16 %v173_v29, %v171_v27  ;;  %8089 = vst [vmem:[#allocation8_spill] sm:$0xff] %v4683_v25  ;;  %v489_v28 = vrot.slane %v488_v18, 1  ;;  %v7785_v34 = vmax.f32 %v4683_v25, 0.0 }
  0xb1   :  { %4099 = vmatmul.mubr.msk.f32.gmra.mrb[2].mxu0 %vm177_vm0, %v176_v20 }
  0xb2   :  { %4115 = vmatprep.subr.bf16.mxu1 %v4114_v21  ;;  %v4689_v21 = vadd.f32 %v465_v26, %v464_v15  ;;  %v4693_v36 = vadd.f32 %v489_v28, %v488_v18  ;;  %v4740_v28 = vld [vmem:[%s7760_s1 + $0x40] sm:$0xff] }
  0xb3   :  { %4117 = vmatpush1.bf16.msra.mxu1 %v4116_v31  ;;  %v7786_v31 = vmax.f32 %v4681_v24, 0.0 }
  0xb4   :  { %8092 = vst [vmem:[#allocation11_spill] sm:$0xff] %v4689_v21  ;;  %8093 = vst [vmem:[#allocation12_spill] sm:$0xff] %v4693_v36  ;;  %v7775_v46 = vmax.f32 %v4689_v21, 0.0 }
  0xb6   :  { %4100 = vmatmul.mubr.msk.f32.vlgmr.msra.gmra.mrb[0].mxu1 %vm177_vm0, %v175_v23 }
  0xb7   :  { %331 = vmatprep.mubr.f32.mxu1 %v4532_v8  ;;  %v372_v8 = vld [vmem:[%s7760_s1 + $0x10] sm:$0xff] }
  0xb8   :  { %v853_v39 = vmul.f32 %v372_v8, %v4633_v32  ;;  %v857_v40 = vmul.f32 %v372_v8, %v4638_v33  ;;  %v861_v47 = vmul.f32 %v372_v8, %v4656_v38  ;;  %v865_v55 = vmul.f32 %v372_v8, %v4671_v43 }
  0xba   :  { %4101 = vmatmul.mubr.msk.f32.gmra.mrb[2].mxu1 %vm177_vm0, %v176_v20  ;;  %v873_v49 = vrot.slane %v853_v39, 4  ;;  %v897_v50 = vrot.slane %v857_v40, 4  ;;  %v921_v59 = vrot.slane %v861_v47, 4  ;;  %v945_v63 = vrot.slane %v865_v55, 4 }
  0xbc   :  { %v874_v57 = vadd.f32 %v873_v49, %v853_v39  ;;  %v898_v58 = vadd.f32 %v897_v50, %v857_v40  ;;  %v922_v3 = vadd.f32 %v921_v59, %v861_v47  ;;  %v946_v7 = vadd.f32 %v945_v63, %v865_v55  ;;  %v4700_v39 = vld [vmem:[%s7760_s1 + $0x30] sm:$0xff] }
  0xbd   :  { %v553_v47 = vmax.f32 %v7786_v31, %v7785_v34  ;;  %v7774_v49 = vmax.f32 %v4693_v36, 0.0  ;;  %v1397_v55 = vrot.slane %v1317_v45, 4  ;;  %v1757_v56 = vmul.f32 %v4700_v39, %v4633_v32 }
  0xbe   :  { %v875_v1 = vrot.slane %v874_v57, 2  ;;  %v899_v2 = vrot.slane %v898_v58, 2  ;;  %v923_v12 = vrot.slane %v922_v3, 2  ;;  %v947_v17 = vrot.slane %v946_v7, 2 }
  0xbf   :  { %v1374_v59 = vadd.f32 %v1373_v53, %v4678_v51  ;;  %v1761_v60 = vmul.f32 %v4700_v39, %v4638_v33  ;;  %v555_v61 = vmax.f32 %v553_v47, %v7775_v46  ;;  %v1398_v62 = vadd.f32 %v1397_v55, %v1317_v45 }
  0xc0   :  { %v876_v10 = vadd.f32 %v875_v1, %v874_v57  ;;  %v900_v11 = vadd.f32 %v899_v2, %v898_v58  ;;  %v924_v23 = vadd.f32 %v923_v12, %v922_v3  ;;  %v948_v27 = vadd.f32 %v947_v17, %v946_v7 }
  0xc1   :  { %v1350_v58 = vadd.f32 %v1349_v52, %v4666_v42  ;;  %v1765_v63 = vmul.f32 %v4700_v39, %v4656_v38  ;;  %v1375_v1 = vrot.slane %v1374_v59, 2  ;;  %v1769_v2 = vmul.f32 %v4700_v39, %v4671_v43 }
  0xc2   :  { %v877_v19 = vrot.slane %v876_v10, 1  ;;  %v901_v22 = vrot.slane %v900_v11, 1  ;;  %v925_v20 = vrot.slane %v924_v23, 1  ;;  %v949_v8 = vrot.slane %v948_v27, 1 }
  0xc3   :  { %v1351_v0 = vrot.slane %v1350_v58, 2  ;;  %v1777_v3 = vrot.slane %v1757_v56, 4  ;;  %v1328_v42 = vadd.f32 %v1327_v41, %v1326_v35  ;;  %v1399_v4 = vrot.slane %v1398_v62, 2 }
  0xc4   :  { %v4685_v29 = vadd.f32 %v877_v19, %v876_v10  ;;  %v4687_v30 = vadd.f32 %v901_v22, %v900_v11  ;;  %v4695_v37 = vadd.f32 %v925_v20, %v924_v23  ;;  %v4713_v50 = vadd.f32 %v949_v8, %v948_v27 }
  0xc5   :  { %v1801_v51 = vrot.slane %v1761_v60, 4  ;;  %v1825_v5 = vrot.slane %v1765_v63, 4  ;;  %v1352_v6 = vadd.f32 %v1351_v0, %v1350_v58  ;;  %v1376_v7 = vadd.f32 %v1375_v1, %v1374_v59 }
  0xc6   :  { %8090 = vst [vmem:[#allocation9_spill] sm:$0xff] %v4685_v29  ;;  %8091 = vst [vmem:[#allocation10_spill] sm:$0xff] %v4687_v30  ;;  %v7773_v40 = vmax.f32 %v4685_v29, 0.0  ;;  %v7772_v44 = vmax.f32 %v4687_v30, 0.0  ;;  %v7771_v54 = vmax.f32 %v4695_v37, 0.0  ;;  %v1778_v9 = vadd.f32 %v1777_v3, %v1757_v56 }
  0xc7   :  { %8094 = vst [vmem:[#allocation13_spill] sm:$0xff] %v4695_v37  ;;  %8095 = vst [vmem:[#allocation14_spill] sm:$0xff] %v4713_v50  ;;  %v1849_v10 = vrot.slane %v1769_v2, 4  ;;  %v1329_v11 = vrot.slane %v1328_v42, 1  ;;  %v1400_v12 = vadd.f32 %v1399_v4, %v1398_v62  ;;  %v1802_v13 = vadd.f32 %v1801_v51, %v1761_v60 }
  0xc8   :  { %v1013_v57 = vmax.f32 %v7773_v40, %v7772_v44  ;;  %v1826_v14 = vadd.f32 %v1825_v5, %v1765_v63  ;;  %v1353_v15 = vrot.slane %v1352_v6, 1  ;;  %v1377_v17 = vrot.slane %v1376_v7, 1 }
  0xc9   :  { %v1779_v18 = vrot.slane %v1778_v9, 2  ;;  %v1850_v19 = vadd.f32 %v1849_v10, %v1769_v2  ;;  %v4735_v22 = vadd.f32 %v1329_v11, %v1328_v42  ;;  %v1401_v23 = vrot.slane %v1400_v12, 1 }
  0xca   :  { %v1803_v26 = vrot.slane %v1802_v13, 2  ;;  %v1827_v27 = vrot.slane %v1826_v14, 2  ;;  %v4742_v20 = vadd.f32 %v1353_v15, %v1352_v6  ;;  %v4744_v8 = vadd.f32 %v1377_v17, %v1376_v7  ;;  %v4773_v6 = vld [vmem:[%s7760_s1 + $0x50] sm:$0xff] }
  0xcb   :  { %8096 = vst [vmem:[#allocation15_spill] sm:$0xff] %v4735_v22  ;;  %v1780_v45 = vadd.f32 %v1779_v18, %v1778_v9  ;;  %v1851_v47 = vrot.slane %v1850_v19, 2  ;;  %v7784_v48 = vmax.f32 %v4713_v50, 0.0  ;;  %v7770_v52 = vmax.f32 %v4735_v22, 0.0 }
  0xcc   :  { %8097 = vst [vmem:[#allocation16_spill] sm:$0xff] %v4742_v20  ;;  %8098 = vst [vmem:[#allocation17_spill] sm:$0xff] %v4744_v8  ;;  %v1804_v53 = vadd.f32 %v1803_v26, %v1802_v13  ;;  %v1828_v35 = vadd.f32 %v1827_v27, %v1826_v14  ;;  %v4748_v55 = vadd.f32 %v1401_v23, %v1400_v12  ;;  %v7769_v56 = vmax.f32 %v4742_v20, 0.0 }
  0xcd   :  { %v1781_v58 = vrot.slane %v1780_v45, 1  ;;  %v1852_v59 = vadd.f32 %v1851_v47, %v1850_v19  ;;  %v7768_v60 = vmax.f32 %v4744_v8, 0.0  ;;  %v2209_v63 = vmul.f32 %v4740_v28, %v4633_v32 }
  0xce   :  { %8099 = vst [vmem:[#allocation18_spill] sm:$0xff] %v4748_v55  ;;  %v1805_v41 = vrot.slane %v1804_v53, 1  ;;  %v1829_v62 = vrot.slane %v1828_v35, 1  ;;  %v1465_v0 = vmax.f32 %v7770_v52, %v7769_v56  ;;  %v2213_v3 = vmul.f32 %v4740_v28, %v4638_v33 }
  0xcf   :  { %v4758_v1 = vadd.f32 %v1781_v58, %v1780_v45  ;;  %v1853_v2 = vrot.slane %v1852_v59, 1  ;;  %v2217_v51 = vmul.f32 %v4740_v28, %v4656_v38  ;;  %v2221_v5 = vmul.f32 %v4740_v28, %v4671_v43 }
  0xd0   :  { %v4762_v42 = vadd.f32 %v1805_v41, %v1804_v53  ;;  %v4764_v4 = vadd.f32 %v1829_v62, %v1828_v35  ;;  %v4777_v7 = vmax.f32 %v555_v61, %v7774_v49  ;;  %v4781_v9 = vmax.f32 %v1013_v57, %v7771_v54 }
  0xd1   :  { %8100 = vst [vmem:[#allocation19_spill] sm:$0xff] %v4758_v1  ;;  %v7783_v10 = vmax.f32 %v4748_v55, 0.0  ;;  %v2229_v11 = vrot.slane %v2209_v63, 4  ;;  %v4786_v12 = vmax.f32 %v1465_v0, %v7768_v60  ;;  %v4788_v13 = vadd.f32 %v1853_v2, %v1852_v59 }
  0xd2   :  { %8101 = vst [vmem:[#allocation20_spill] sm:$0xff] %v4762_v42  ;;  %8102 = vst [vmem:[#allocation21_spill] sm:$0xff] %v4764_v4  ;;  %v2253_v14 = vrot.slane %v2213_v3, 4  ;;  %v2277_v15 = vrot.slane %v2217_v51, 4  ;;  %v7780_v17 = vmax.f32 %v4758_v1, 0.0  ;;  %v7776_v61 = vmax.f32 %v4762_v42, 0.0 }
  0xd3   :  { %8103 = vst [vmem:[#allocation22_spill] sm:$0xff] %v4788_v13  ;;  %v2230_v18 = vadd.f32 %v2229_v11, %v2209_v63  ;;  %v2301_v19 = vrot.slane %v2221_v5, 4  ;;  %v7779_v57 = vmax.f32 %v4764_v4, 0.0  ;;  %v2661_v27 = vmul.f32 %v4773_v6, %v4633_v32 }
  0xd4   :  { %v2254_v23 = vadd.f32 %v2253_v14, %v2213_v3  ;;  %v2278_v26 = vadd.f32 %v2277_v15, %v2217_v51  ;;  %v2665_v53 = vmul.f32 %v4773_v6, %v4638_v33  ;;  %v2669_v35 = vmul.f32 %v4773_v6, %v4656_v38 }
  0xd5   :  { %v2231_v45 = vrot.slane %v2230_v18, 2  ;;  %v2302_v47 = vadd.f32 %v2301_v19, %v2221_v5  ;;  %v7781_v58 = vmax.f32 %v4788_v13, 0.0  ;;  %v2673_v62 = vmul.f32 %v4773_v6, %v4671_v43 }
  0xd6   :  { %v2255_v59 = vrot.slane %v2254_v23, 2  ;;  %v2279_v41 = vrot.slane %v2278_v26, 2  ;;  %v2681_v2 = vrot.slane %v2661_v27, 4  ;;  %v2705_v3 = vrot.slane %v2665_v53, 4 }
  0xd7   :  { %v2232_v63 = vadd.f32 %v2231_v45, %v2230_v18  ;;  %v2303_v0 = vrot.slane %v2302_v47, 2  ;;  %v1917_v51 = vmax.f32 %v7780_v17, %v7776_v61  ;;  %v2729_v14 = vrot.slane %v2669_v35, 4  ;;  %v4811_v61 = vld [vmem:[%s7760_s1 + $0x60] sm:$0xff] }
  0xd8   :  { %v2256_v5 = vadd.f32 %v2255_v59, %v2254_v23  ;;  %v2280_v11 = vadd.f32 %v2279_v41, %v2278_v26  ;;  %v2682_v60 = vadd.f32 %v2681_v2, %v2661_v27  ;;  %v2706_v56 = vadd.f32 %v2705_v3, %v2665_v53 }
  0xd9   :  { %v2233_v15 = vrot.slane %v2232_v63, 1  ;;  %v2304_v19 = vadd.f32 %v2303_v0, %v2302_v47  ;;  %v2730_v44 = vadd.f32 %v2729_v14, %v2669_v35  ;;  %v2753_v40 = vrot.slane %v2673_v62, 4 }
  0xda   :  { %v2257_v52 = vrot.slane %v2256_v5, 1  ;;  %v2281_v54 = vrot.slane %v2280_v11, 1  ;;  %v2683_v49 = vrot.slane %v2682_v60, 2  ;;  %v2707_v46 = vrot.slane %v2706_v56, 2 }
  0xdb   :  { %v4806_v18 = vadd.f32 %v2233_v15, %v2232_v63  ;;  %v2305_v45 = vrot.slane %v2304_v19, 1  ;;  %v2731_v27 = vrot.slane %v2730_v44, 2  ;;  %v2754_v47 = vadd.f32 %v2753_v40, %v2673_v62 }
  0xdc   :  { %v4813_v23 = vadd.f32 %v2257_v52, %v2256_v5  ;;  %v4815_v26 = vadd.f32 %v2281_v54, %v2280_v11  ;;  %v1919_v53 = vmax.f32 %v1917_v51, %v7779_v57  ;;  %v2684_v59 = vadd.f32 %v2683_v49, %v2682_v60 }
  0xdd   :  { %8104 = vst [vmem:[#allocation23_spill] sm:$0xff] %v4806_v18  ;;  %v7778_v35 = vmax.f32 %v4806_v18, 0.0  ;;  %v2708_v41 = vadd.f32 %v2707_v46, %v2706_v56  ;;  %v4820_v63 = vadd.f32 %v2305_v45, %v2304_v19  ;;  %v2732_v2 = vadd.f32 %v2731_v27, %v2730_v44  ;;  %v4853_v27 = vld [vmem:[%s7760_s1 + $0x70] sm:$0xff] }
  0xde   :  { %8105 = vst [vmem:[#allocation24_spill] sm:$0xff] %v4813_v23  ;;  %8106 = vst [vmem:[#allocation25_spill] sm:$0xff] %v4815_v26  ;;  %v7777_v0 = vmax.f32 %v4813_v23, 0.0  ;;  %v2755_v3 = vrot.slane %v2754_v47, 2  ;;  %v7782_v52 = vmax.f32 %v4815_v26, 0.0  ;;  %v2685_v5 = vrot.slane %v2684_v59, 1 }
  0xdf   :  { %8107 = vst [vmem:[#allocation26_spill] sm:$0xff] %v4820_v63  ;;  %v2709_v54 = vrot.slane %v2708_v41, 1  ;;  %v3113_v40 = vmul.f32 %v4811_v61, %v4633_v32  ;;  %v2733_v49 = vrot.slane %v2732_v2, 1  ;;  %v3117_v56 = vmul.f32 %v4811_v61, %v4638_v33 }
  0xe0   :  { %v2369_v62 = vmax.f32 %v7778_v35, %v7777_v0  ;;  %v2756_v46 = vadd.f32 %v2755_v3, %v2754_v47  ;;  %v4832_v60 = vadd.f32 %v2685_v5, %v2684_v59  ;;  %v3121_v51 = vmul.f32 %v4811_v61, %v4656_v38 }
  0xe1   :  { %v4834_v44 = vadd.f32 %v2709_v54, %v2708_v41  ;;  %v3125_v11 = vmul.f32 %v4811_v61, %v4671_v43  ;;  %v4843_v14 = vmax.f32 %v4781_v9, %v7784_v48  ;;  %v4848_v15 = vmax.f32 %v4786_v12, %v7783_v10 }
  0xe2   :  { %8108 = vst [vmem:[#allocation27_spill] sm:$0xff] %v4832_v60  ;;  %v2757_v19 = vrot.slane %v2756_v46, 1  ;;  %v3133_v45 = vrot.slane %v3113_v40, 4  ;;  %v4857_v47 = vmax.f32 %v1919_v53, %v7781_v58  ;;  %v4859_v59 = vadd.f32 %v2733_v49, %v2732_v2 }
  0xe3   :  { %8109 = vst [vmem:[#allocation28_spill] sm:$0xff] %v4834_v44  ;;  %v3157_v9 = vrot.slane %v3117_v56, 4  ;;  %v3181_v41 = vrot.slane %v3121_v51, 4  ;;  %v4864_v12 = vmax.f32 %v2369_v62, %v7782_v52  ;;  %v7790_v5 = vmax.f32 %v4832_v60, 0.0 }
  0xe4   :  { %8110 = vst [vmem:[#allocation29_spill] sm:$0xff] %v4859_v59  ;;  %v3134_v54 = vadd.f32 %v3133_v45, %v3113_v40  ;;  %v7789_v0 = vmax.f32 %v4834_v44, 0.0  ;;  %v3205_v17 = vrot.slane %v3125_v11, 4  ;;  %v4868_v53 = vadd.f32 %v2757_v19, %v2756_v46 }
  0xe5   :  { %v3158_v35 = vadd.f32 %v3157_v9, %v3117_v56  ;;  %v3182_v57 = vadd.f32 %v3181_v41, %v3121_v51  ;;  %v3565_v49 = vmul.f32 %v4853_v27, %v4633_v32  ;;  %v3569_v58 = vmul.f32 %v4853_v27, %v4638_v33 }
  0xe6   :  { %8111 = vst [vmem:[#allocation30_spill] sm:$0xff] %v4868_v53  ;;  %v3135_v2 = vrot.slane %v3134_v54, 2  ;;  %v3206_v48 = vadd.f32 %v3205_v17, %v3125_v11  ;;  %v3573_v56 = vmul.f32 %v4853_v27, %v4656_v38  ;;  %v3577_v46 = vmul.f32 %v4853_v27, %v4671_v43 }
  0xe7   :  { %v3159_v52 = vrot.slane %v3158_v35, 2  ;;  %v3183_v10 = vrot.slane %v3182_v57, 2  ;;  %v3585_v51 = vrot.slane %v3565_v49, 4  ;;  %v2821_v32 = vmax.f32 %v7790_v5, %v7789_v0 }
  0xe8   :  { %v3136_v40 = vadd.f32 %v3135_v2, %v3134_v54  ;;  %v3207_v45 = vrot.slane %v3206_v48, 2  ;;  %v3609_v34 = vrot.slane %v3569_v58, 4  ;;  %v3633_v17 = vrot.slane %v3573_v56, 4 }
  0xe9   :  { %v3160_v19 = vadd.f32 %v3159_v52, %v3158_v35  ;;  %v3184_v33 = vadd.f32 %v3183_v10, %v3182_v57  ;;  %v3586_v41 = vadd.f32 %v3585_v51, %v3565_v49  ;;  %v3657_v38 = vrot.slane %v3577_v46, 4  ;;  %v4892_v57 = vld [vmem:[%s7759_s0 + $0x8] sm:$0xff] }
  0xea   :  { %v3137_v9 = vrot.slane %v3136_v40, 1  ;;  %v3208_v2 = vadd.f32 %v3207_v45, %v3206_v48  ;;  %v3610_v3 = vadd.f32 %v3609_v34, %v3569_v58  ;;  %v3634_v62 = vadd.f32 %v3633_v17, %v3573_v56  ;;  %v4897_v48 = vld [vmem:[%s7760_s1 + $0x8] sm:$0xff] }
  0xeb   :  { %v3161_v11 = vrot.slane %v3160_v19, 1  ;;  %v3185_v54 = vrot.slane %v3184_v33, 1  ;;  %v3587_v43 = vrot.slane %v3586_v41, 2  ;;  %v3658_v10 = vadd.f32 %v3657_v38, %v3577_v46  ;;  %v4917_v17 = vld [vmem:[%s7759_s0 + $0xc8] sm:$0xff] }
  0xec   :  { %v4883_v31 = vadd.f32 %v3137_v9, %v3136_v40  ;;  %v3209_v35 = vrot.slane %v3208_v2, 1  ;;  %v3611_v58 = vrot.slane %v3610_v3, 2  ;;  %v3635_v49 = vrot.slane %v3634_v62, 2  ;;  %v4903_v40 = vld [vmem:[%s7759_s0 + $0x48] sm:$0xff] }
  0xed   :  { %v4885_v44 = vadd.f32 %v3161_v11, %v3160_v19  ;;  %v4887_v60 = vadd.f32 %v3185_v54, %v3184_v33  ;;  %v3588_v34 = vadd.f32 %v3587_v43, %v3586_v41  ;;  %v3659_v19 = vrot.slane %v3658_v10, 2  ;;  %v4912_v33 = vld [vmem:[%s7759_s0 + $0x88] sm:$0xff] }
  0xee   :  { %8112 = vst [vmem:[#allocation31_spill] sm:$0xff] %v4883_v31  ;;  %v7792_v52 = vmax.f32 %v4883_v31, 0.0  ;;  %v4906_v46 = vadd.f32 %v3209_v35, %v3208_v2  ;;  %v3612_v9 = vadd.f32 %v3611_v58, %v3610_v3  ;;  %v3636_v41 = vadd.f32 %v3635_v49, %v3634_v62 }
  0xef   :  { %8113 = vst [vmem:[#allocation32_spill] sm:$0xff] %v4885_v44  ;;  %8114 = vst [vmem:[#allocation33_spill] sm:$0xff] %v4887_v60  ;;  %v7791_v51 = vmax.f32 %v4885_v44, 0.0  ;;  %v3589_v45 = vrot.slane %v3588_v34, 1  ;;  %v394_v11 = vmul.f32 %v4897_v48, %v4892_v57  ;;  %v3660_v38 = vadd.f32 %v3659_v19, %v3658_v10 }
  0xf0   :  { %8115 = vst [vmem:[#allocation34_spill] sm:$0xff] %v4906_v46  ;;  %v398_v3 = vmul.f32 %v4897_v48, %v4903_v40  ;;  %v3613_v43 = vrot.slane %v3612_v9, 1  ;;  %v3637_v35 = vrot.slane %v3636_v41, 1  ;;  %v402_v58 = vmul.f32 %v4897_v48, %v4912_v33 }
  0xf1   :  { %v3273_v2 = vmax.f32 %v7792_v52, %v7791_v51  ;;  %v4928_v62 = vadd.f32 %v3589_v45, %v3588_v34  ;;  %v8117_v49 = vmax.f32 %v4859_v59, 0.0  ;;  %v3661_v5 = vrot.slane %v3660_v38, 1  ;;  %v4946_v45 = vld [vmem:[%s7760_s1 + $0x18] sm:$0xff] }
  0xf2   :  { %v406_v56 = vmul.f32 %v4897_v48, %v4917_v17  ;;  %v419_v51 = vrot.slane %v394_v11, 4  ;;  %v4938_v10 = vadd.f32 %v3613_v43, %v3612_v9  ;;  %v4940_v19 = vadd.f32 %v3637_v35, %v3636_v41 }
  0xf3   :  { %8116 = vst [vmem:[#allocation35_spill] sm:$0xff] %v4928_v62  ;;  %v4934_v0 = vmax.f32 %v2821_v32, %v8117_v49  ;;  %v443_v52 = vrot.slane %v398_v3, 4  ;;  %v4949_v49 = vadd.f32 %v3661_v5, %v3660_v38  ;;  %v467_v44 = vrot.slane %v402_v58, 4 }
  0xf4   :  { %8118 = vst [vmem:[#allocation36_spill] sm:$0xff] %v4938_v10  ;;  %8119 = vst [vmem:[#allocation37_spill] sm:$0xff] %v4940_v19  ;;  %v420_v54 = vadd.f32 %v419_v51, %v394_v11  ;;  %v8121_v31 = vmax.f32 %v4887_v60, 0.0  ;;  %v7800_v41 = vmax.f32 %v4938_v10, 0.0  ;;  %v491_v35 = vrot.slane %v406_v56, 4 }
  0xf5   :  { %8120 = vst [vmem:[#allocation38_spill] sm:$0xff] %v4949_v49  ;;  %v444_v43 = vadd.f32 %v443_v52, %v398_v3  ;;  %v468_v26 = vadd.f32 %v467_v44, %v402_v58  ;;  %v854_v23 = vmul.f32 %v4946_v45, %v4892_v57  ;;  %v8122_v5 = vmax.f32 %v4928_v62, 0.0 }
  0xf6   :  { %v4953_v9 = vmax.f32 %v3273_v2, %v8121_v31  ;;  %v421_v59 = vrot.slane %v420_v54, 2  ;;  %v492_v38 = vadd.f32 %v491_v35, %v406_v56  ;;  %v858_v31 = vmul.f32 %v4946_v45, %v4903_v40 }
  0xf7   :  { %v3725_v51 = vmax.f32 %v8122_v5, %v7800_v41  ;;  %v445_v11 = vrot.slane %v444_v43, 2  ;;  %v469_v3 = vrot.slane %v468_v26, 2  ;;  %v862_v44 = vmul.f32 %v4946_v45, %v4912_v33 }
  0xf8   :  { %v422_v2 = vadd.f32 %v421_v59, %v420_v54  ;;  %v493_v32 = vrot.slane %v492_v38, 2  ;;  %v866_v34 = vmul.f32 %v4946_v45, %v4917_v17  ;;  %v879_v10 = vrot.slane %v854_v23, 4 }
  0xf9   :  { %v446_v58 = vadd.f32 %v445_v11, %v444_v43  ;;  %v470_v5 = vadd.f32 %v469_v3, %v468_v26  ;;  %v903_v41 = vrot.slane %v858_v31, 4  ;;  %v927_v56 = vrot.slane %v862_v44, 4  ;;  %v4977_v11 = vld [vmem:[%s7760_s1 + $0x28] sm:$0xff] }
  0xfa   :  { %v423_v62 = vrot.slane %v422_v2, 1  ;;  %v8123_v35 = vmax.f32 %v4940_v19, 0.0  ;;  %v494_v52 = vadd.f32 %v493_v32, %v492_v38  ;;  %v880_v59 = vadd.f32 %v879_v10, %v854_v23 }
  0xfb   :  { %v447_v18 = vrot.slane %v446_v58, 1  ;;  %v471_v13 = vrot.slane %v470_v5, 1  ;;  %v904_v4 = vadd.f32 %v903_v41, %v858_v31  ;;  %v928_v43 = vadd.f32 %v927_v56, %v862_v44 }
  0xfc   :  { %v3727_v60 = vmax.f32 %v3725_v51, %v8123_v35  ;;  %v4972_v54 = vadd.f32 %v423_v62, %v422_v2  ;;  %v495_v26 = vrot.slane %v494_v52, 1  ;;  %v881_v3 = vrot.slane %v880_v59, 2 }
  0xfd   :  { %v4979_v42 = vadd.f32 %v447_v18, %v446_v58  ;;  %v951_v1 = vrot.slane %v866_v34, 4  ;;  %v4981_v19 = vadd.f32 %v471_v13, %v470_v5  ;;  %v905_v23 = vrot.slane %v904_v4, 2 }
  0xfe   :  { %8124 = vst [vmem:[#allocation39_spill] sm:$0xff] %v4972_v54  ;;  %v7809_v32 = vmax.f32 %v4972_v54, 0.0  ;;  %v929_v62 = vrot.slane %v928_v43, 2  ;;  %v4984_v10 = vadd.f32 %v495_v26, %v494_v52  ;;  %v882_v51 = vadd.f32 %v881_v3, %v880_v59 }
  0xff   :  { %8125 = vst [vmem:[#allocation40_spill] sm:$0xff] %v4979_v42  ;;  %8126 = vst [vmem:[#allocation41_spill] sm:$0xff] %v4981_v19  ;;  %v7808_v41 = vmax.f32 %v4979_v42, 0.0  ;;  %v952_v38 = vadd.f32 %v951_v1, %v866_v34  ;;  %v7810_v31 = vmax.f32 %v4981_v19, 0.0  ;;  %v906_v2 = vadd.f32 %v905_v23, %v904_v4 }
 0x100   :  { %8127 = vst [vmem:[#allocation42_spill] sm:$0xff] %v4984_v10  ;;  %v930_v18 = vadd.f32 %v929_v62, %v928_v43  ;;  %v1306_v44 = vmul.f32 %v4977_v11, %v4892_v57  ;;  %v7816_v13 = vmax.f32 %v4984_v10, 0.0  ;;  %v883_v52 = vrot.slane %v882_v51, 1 }
 0x101   :  { %v562_v58 = vmax.f32 %v7809_v32, %v7808_v41  ;;  %v953_v5 = vrot.slane %v952_v38, 2  ;;  %v907_v56 = vrot.slane %v906_v2, 1  ;;  %v1310_v1 = vmul.f32 %v4977_v11, %v4903_v40  ;;  %v5016_v41 = vld [vmem:[%s7760_s1 + $0x38] sm:$0xff] }
 0x102   :  { %v931_v35 = vrot.slane %v930_v18, 1  ;;  %v1314_v4 = vmul.f32 %v4977_v11, %v4912_v33  ;;  %v8128_v34 = vmax.f32 %v4820_v63, 0.0  ;;  %v1318_v3 = vmul.f32 %v4977_v11, %v4917_v17 }
 0x103   :  { %v564_v43 = vmax.f32 %v562_v58, %v7810_v31  ;;  %v954_v26 = vadd.f32 %v953_v5, %v952_v38  ;;  %v8129_v23 = vmax.f32 %v4868_v53, 0.0  ;;  %v5018_v32 = vadd.f32 %v883_v52, %v882_v51 }
 0x104   :  { %v5002_v59 = vmax.f32 %v4864_v12, %v8128_v34  ;;  %v1331_v12 = vrot.slane %v1306_v44, 4  ;;  %v1355_v34 = vrot.slane %v1310_v1, 4  ;;  %v8131_v58 = vmax.f32 %v4906_v46, 0.0 }
 0x105   :  { %v5011_v62 = vmax.f32 %v4934_v0, %v8129_v23  ;;  %8130 = vst [vmem:[#allocation43_spill] sm:$0xff] %v5018_v32  ;;  %v8132_v5 = vmax.f32 %v4949_v49, 0.0  ;;  %v5029_v0 = vadd.f32 %v907_v56, %v906_v2  ;;  %v1379_v23 = vrot.slane %v1314_v4, 4 }
 0x106   :  { %v5023_v38 = vmax.f32 %v4953_v9, %v8131_v58  ;;  %v5033_v19 = vmax.f32 %v564_v43, %v7816_v13  ;;  %v5035_v51 = vadd.f32 %v931_v35, %v930_v18  ;;  %v1332_v52 = vadd.f32 %v1331_v12, %v1306_v44 }
 0x107   :  { %v5027_v31 = vmax.f32 %v3727_v60, %v8132_v5  ;;  %8133 = vst [vmem:[#allocation44_spill] sm:$0xff] %v5029_v0  ;;  %v1356_v42 = vadd.f32 %v1355_v34, %v1310_v1  ;;  %v955_v54 = vrot.slane %v954_v26, 1  ;;  %v1380_v46 = vadd.f32 %v1379_v23, %v1314_v4 }
 0x108   :  { %8134 = vst [vmem:[#allocation45_spill] sm:$0xff] %v5035_v51  ;;  %v1403_v53 = vrot.slane %v1318_v3, 4  ;;  %v1758_v9 = vmul.f32 %v5016_v41, %v4892_v57  ;;  %v1333_v58 = vrot.slane %v1332_v52, 2  ;;  %v1762_v56 = vmul.f32 %v5016_v41, %v4903_v40 }
 0x109   :  { %v1357_v2 = vrot.slane %v1356_v42, 2  ;;  %v1381_v5 = vrot.slane %v1380_v46, 2  ;;  %v1766_v44 = vmul.f32 %v5016_v41, %v4912_v33  ;;  %v1770_v12 = vmul.f32 %v5016_v41, %v4917_v17 }
 0x10a   :  { %v1404_v18 = vadd.f32 %v1403_v53, %v1318_v3  ;;  %v1334_v1 = vadd.f32 %v1333_v58, %v1332_v52  ;;  %v1783_v13 = vrot.slane %v1758_v9, 4  ;;  %v1807_v60 = vrot.slane %v1762_v56, 4 }
 0x10b   :  { %v1358_v4 = vadd.f32 %v1357_v2, %v1356_v42  ;;  %v1382_v34 = vadd.f32 %v1381_v5, %v1380_v46  ;;  %v5048_v10 = vadd.f32 %v955_v54, %v954_v26  ;;  %v1831_v63 = vrot.slane %v1766_v44, 4  ;;  %v5057_v46 = vld [vmem:[%s7760_s1 + $0x48] sm:$0xff] }
 0x10c   :  { %v1405_v23 = vrot.slane %v1404_v18, 2  ;;  %v1335_v49 = vrot.slane %v1334_v1, 1  ;;  %v1784_v55 = vadd.f32 %v1783_v13, %v1758_v9  ;;  %v1808_v8 = vadd.f32 %v1807_v60, %v1762_v56 }
 0x10d   :  { %8135 = vst [vmem:[#allocation46_spill] sm:$0xff] %v5048_v10  ;;  %v1359_v43 = vrot.slane %v1358_v4, 1  ;;  %v1383_v53 = vrot.slane %v1382_v34, 1  ;;  %v1832_v42 = vadd.f32 %v1831_v63, %v1766_v44  ;;  %v1855_v58 = vrot.slane %v1770_v12, 4 }
 0x10e   :  { %v1406_v3 = vadd.f32 %v1405_v23, %v1404_v18  ;;  %v5050_v20 = vadd.f32 %v1335_v49, %v1334_v1  ;;  %v1785_v2 = vrot.slane %v1784_v55, 2  ;;  %v1809_v5 = vrot.slane %v1808_v8, 2 }
 0x10f   :  { %v5052_v52 = vadd.f32 %v1359_v43, %v1358_v4  ;;  %v5059_v54 = vadd.f32 %v1383_v53, %v1382_v34  ;;  %v1833_v49 = vrot.slane %v1832_v42, 2  ;;  %v1856_v9 = vadd.f32 %v1855_v58, %v1770_v12 }
 0x110   :  { %8136 = vst [vmem:[#allocation47_spill] sm:$0xff] %v5050_v20  ;;  %v1407_v26 = vrot.slane %v1406_v3, 1  ;;  %v8139_v63 = vmax.f32 %v5029_v0, 0.0  ;;  %v8140_v56 = vmax.f32 %v5018_v32, 0.0  ;;  %v1786_v44 = vadd.f32 %v1785_v2, %v1784_v55 }
 0x111   :  { %8137 = vst [vmem:[#allocation48_spill] sm:$0xff] %v5052_v52  ;;  %8138 = vst [vmem:[#allocation49_spill] sm:$0xff] %v5059_v54  ;;  %v7823_v13 = vmax.f32 %v5052_v52, 0.0  ;;  %v1810_v1 = vadd.f32 %v1809_v5, %v1808_v8  ;;  %v1834_v34 = vadd.f32 %v1833_v49, %v1832_v42  ;;  %v1857_v23 = vrot.slane %v1856_v9, 2 }
 0x112   :  { %v1022_v43 = vmax.f32 %v8140_v56, %v8139_v63  ;;  %v5068_v4 = vadd.f32 %v1407_v26, %v1406_v3  ;;  %v2210_v53 = vmul.f32 %v5057_v46, %v4892_v57  ;;  %v1787_v18 = vrot.slane %v1786_v44, 1  ;;  %v5090_v56 = vld [vmem:[%s7760_s1 + $0x58] sm:$0xff] }
 0x113   :  { %v1811_v12 = vrot.slane %v1810_v1, 1  ;;  %v2214_v58 = vmul.f32 %v5057_v46, %v4903_v40  ;;  %v8142_v63 = vmax.f32 %v5050_v20, 0.0  ;;  %v1835_v8 = vrot.slane %v1834_v34, 1 }
 0x114   :  { %8141 = vst [vmem:[#allocation50_spill] sm:$0xff] %v5068_v4  ;;  %v1858_v3 = vadd.f32 %v1857_v23, %v1856_v9  ;;  %v2218_v42 = vmul.f32 %v5057_v46, %v4912_v33  ;;  %v5081_v26 = vadd.f32 %v1787_v18, %v1786_v44  ;;  %v2222_v5 = vmul.f32 %v5057_v46, %v4917_v17 }
 0x115   :  { %v1474_v55 = vmax.f32 %v8142_v63, %v7823_v13  ;;  %v5083_v2 = vadd.f32 %v1811_v12, %v1810_v1  ;;  %v2235_v49 = vrot.slane %v2210_v53, 4  ;;  %v8145_v63 = vmax.f32 %v5035_v51, 0.0 }
 0x116   :  { %8143 = vst [vmem:[#allocation51_spill] sm:$0xff] %v5081_v26  ;;  %v5096_v9 = vadd.f32 %v1835_v8, %v1834_v34  ;;  %v1859_v23 = vrot.slane %v1858_v3, 1  ;;  %v2259_v18 = vrot.slane %v2214_v58, 4  ;;  %v2283_v60 = vrot.slane %v2218_v42, 4 }
 0x117   :  { %8144 = vst [vmem:[#allocation52_spill] sm:$0xff] %v5083_v2  ;;  %v5094_v13 = vmax.f32 %v1022_v43, %v8145_v63  ;;  %v2236_v12 = vadd.f32 %v2235_v49, %v2210_v53  ;;  %v8147_v52 = vmax.f32 %v5059_v54, 0.0  ;;  %v2307_v51 = vrot.slane %v2222_v5, 4 }
 0x118   :  { %8146 = vst [vmem:[#allocation53_spill] sm:$0xff] %v5096_v9  ;;  %v2260_v0 = vadd.f32 %v2259_v18, %v2214_v58  ;;  %v5105_v43 = vadd.f32 %v1859_v23, %v1858_v3  ;;  %v2284_v8 = vadd.f32 %v2283_v60, %v2218_v42  ;;  %v2662_v63 = vmul.f32 %v5090_v56, %v4892_v57 }
 0x119   :  { %v5103_v20 = vmax.f32 %v1474_v55, %v8147_v52  ;;  %v2237_v34 = vrot.slane %v2236_v12, 2  ;;  %v2308_v53 = vadd.f32 %v2307_v51, %v2222_v5  ;;  %v2666_v49 = vmul.f32 %v5090_v56, %v4903_v40 }
 0x11a   :  { %8148 = vst [vmem:[#allocation54_spill] sm:$0xff] %v5105_v43  ;;  %v2261_v1 = vrot.slane %v2260_v0, 2  ;;  %v8149_v35 = vmax.f32 %v5083_v2, 0.0  ;;  %v8150_v52 = vmax.f32 %v5081_v26, 0.0  ;;  %v2285_v3 = vrot.slane %v2284_v8, 2 }
 0x11b   :  { %v2238_v55 = vadd.f32 %v2237_v34, %v2236_v12  ;;  %v2670_v60 = vmul.f32 %v5090_v56, %v4912_v33  ;;  %v2309_v23 = vrot.slane %v2308_v53, 2  ;;  %v2674_v18 = vmul.f32 %v5090_v56, %v4917_v17 }
 0x11c   :  { %v1926_v58 = vmax.f32 %v8150_v52, %v8149_v35  ;;  %v2262_v42 = vadd.f32 %v2261_v1, %v2260_v0  ;;  %v2687_v44 = vrot.slane %v2662_v63, 4  ;;  %v2286_v54 = vadd.f32 %v2285_v3, %v2284_v8  ;;  %v5126_v0 = vld [vmem:[%s7760_s1 + $0x68] sm:$0xff] }
 0x11d   :  { %v2239_v5 = vrot.slane %v2238_v55, 1  ;;  %v2711_v32 = vrot.slane %v2666_v49, 4  ;;  %v2310_v22 = vadd.f32 %v2309_v23, %v2308_v53  ;;  %v2735_v35 = vrot.slane %v2670_v60, 4 }
 0x11e   :  { %v2263_v2 = vrot.slane %v2262_v42, 1  ;;  %v2688_v26 = vadd.f32 %v2687_v44, %v2662_v63  ;;  %v2287_v34 = vrot.slane %v2286_v54, 1  ;;  %v2759_v50 = vrot.slane %v2674_v18, 4 }
 0x11f   :  { %v5121_v12 = vadd.f32 %v2239_v5, %v2238_v55  ;;  %v2712_v52 = vadd.f32 %v2711_v32, %v2666_v49  ;;  %v2311_v51 = vrot.slane %v2310_v22, 1  ;;  %v2736_v8 = vadd.f32 %v2735_v35, %v2670_v60 }
 0x120   :  { %v5128_v1 = vadd.f32 %v2263_v2, %v2262_v42  ;;  %v2689_v37 = vrot.slane %v2688_v26, 2  ;;  %v5130_v3 = vadd.f32 %v2287_v34, %v2286_v54  ;;  %v2760_v53 = vadd.f32 %v2759_v50, %v2674_v18 }
 0x121   :  { %8151 = vst [vmem:[#allocation55_spill] sm:$0xff] %v5121_v12  ;;  %v7837_v44 = vmax.f32 %v5121_v12, 0.0  ;;  %v2713_v63 = vrot.slane %v2712_v52, 2  ;;  %v5133_v55 = vadd.f32 %v2311_v51, %v2310_v22  ;;  %v2737_v23 = vrot.slane %v2736_v8, 2 }
 0x122   :  { %8152 = vst [vmem:[#allocation56_spill] sm:$0xff] %v5128_v1  ;;  %8153 = vst [vmem:[#allocation57_spill] sm:$0xff] %v5130_v3  ;;  %v7836_v32 = vmax.f32 %v5128_v1, 0.0  ;;  %v2690_v49 = vadd.f32 %v2689_v37, %v2688_v26  ;;  %v8155_v5 = vmax.f32 %v5096_v9, 0.0  ;;  %v2761_v42 = vrot.slane %v2760_v53, 2 }
 0x123   :  { %8154 = vst [vmem:[#allocation58_spill] sm:$0xff] %v5133_v55  ;;  %v2714_v2 = vadd.f32 %v2713_v63, %v2712_v52  ;;  %v3114_v60 = vmul.f32 %v5126_v0, %v4892_v57  ;;  %v7848_v54 = vmax.f32 %v5130_v3, 0.0  ;;  %v2738_v18 = vadd.f32 %v2737_v23, %v2736_v8  ;;  %v5157_v8 = vld [vmem:[%s7760_s1 + $0x78] sm:$0xff] }
 0x124   :  { %v1928_v30 = vmax.f32 %v1926_v58, %v8155_v5  ;;  %v2378_v50 = vmax.f32 %v7837_v44, %v7836_v32  ;;  %v2691_v22 = vrot.slane %v2690_v49, 1  ;;  %v2762_v37 = vadd.f32 %v2761_v42, %v2760_v53 }
 0x125   :  { %v2715_v51 = vrot.slane %v2714_v2, 1  ;;  %v3118_v26 = vmul.f32 %v5126_v0, %v4903_v40  ;;  %v3122_v58 = vmul.f32 %v5126_v0, %v4912_v33  ;;  %v2739_v52 = vrot.slane %v2738_v18, 1 }
 0x126   :  { %v5150_v34 = vadd.f32 %v2691_v22, %v2690_v49  ;;  %v3126_v63 = vmul.f32 %v5126_v0, %v4917_v17  ;;  %v2763_v23 = vrot.slane %v2762_v37, 1  ;;  %v3139_v5 = vrot.slane %v3114_v60, 4 }
 0x127   :  { %v5159_v53 = vadd.f32 %v2715_v51, %v2714_v2  ;;  %v3163_v42 = vrot.slane %v3118_v26, 4  ;;  %v2380_v32 = vmax.f32 %v2378_v50, %v7848_v54  ;;  %v5163_v44 = vadd.f32 %v2739_v52, %v2738_v18 }
 0x128   :  { %8156 = vst [vmem:[#allocation59_spill] sm:$0xff] %v5150_v34  ;;  %v7845_v49 = vmax.f32 %v5150_v34, 0.0  ;;  %v3187_v22 = vrot.slane %v3122_v58, 4  ;;  %v5166_v35 = vadd.f32 %v2763_v23, %v2762_v37  ;;  %v3140_v12 = vadd.f32 %v3139_v5, %v3114_v60 }
 0x129   :  { %8157 = vst [vmem:[#allocation60_spill] sm:$0xff] %v5159_v53  ;;  %8158 = vst [vmem:[#allocation61_spill] sm:$0xff] %v5163_v44  ;;  %v7844_v1 = vmax.f32 %v5159_v53, 0.0  ;;  %v3164_v9 = vadd.f32 %v3163_v42, %v3118_v26  ;;  %v7847_v2 = vmax.f32 %v5163_v44, 0.0  ;;  %v3211_v29 = vrot.slane %v3126_v63, 4 }
 0x12a   :  { %8159 = vst [vmem:[#allocation62_spill] sm:$0xff] %v5166_v35  ;;  %v3188_v51 = vadd.f32 %v3187_v22, %v3122_v58  ;;  %v5172_v16 = vmul.f32 %v5157_v8, %v4892_v57  ;;  %v7846_v50 = vmax.f32 %v5166_v35, 0.0  ;;  %v3141_v37 = vrot.slane %v3140_v12, 2 }
 0x12b   :  { %v2830_v18 = vmax.f32 %v7845_v49, %v7844_v1  ;;  %v3165_v52 = vrot.slane %v3164_v9, 2  ;;  %v5179_v60 = vadd.f32 %v3211_v29, %v3126_v63  ;;  %v5183_v26 = vmul.f32 %v5157_v8, %v4903_v40 }
 0x12c   :  { %v3189_v23 = vrot.slane %v3188_v51, 2  ;;  %v5187_v57 = vmul.f32 %v5157_v8, %v4912_v33  ;;  %v8160_v58 = vmax.f32 %v5048_v10, 0.0  ;;  %v5196_v22 = vadd.f32 %v3141_v37, %v3140_v12 }
 0x12d   :  { %v2832_v42 = vmax.f32 %v2830_v18, %v7847_v2  ;;  %v5198_v29 = vadd.f32 %v3165_v52, %v3164_v9  ;;  %v8161_v63 = vmax.f32 %v5068_v4, 0.0  ;;  %v8162_v33 = vmax.f32 %v5105_v43, 0.0 }
 0x12e   :  { %v5192_v5 = vmax.f32 %v5094_v13, %v8160_v58  ;;  %v8163_v49 = vmax.f32 %v5133_v55, 0.0  ;;  %v5215_v18 = vmul.f32 %v5157_v8, %v4917_v17  ;;  %v5217_v12 = vadd.f32 %v3189_v23, %v3188_v51  ;;  %v5232_v51 = vld [vmem:[%s7760_s1] sm:$0xff]  ;;  %v5238_v58 = vld [vmem:[%s7760_s1 + $0x10] sm:$0xff] }
 0x12f   :  { %v5203_v40 = vmax.f32 %v5103_v20, %v8161_v63  ;;  %v5207_v1 = vmax.f32 %v1928_v30, %v8162_v33  ;;  %v5224_v30 = vmax.f32 %v2832_v42, %v7846_v50  ;;  %8167 = vst [vmem:[#allocation66_spill] sm:$0xff] %v5232_v51  ;;  %8168 = vst [vmem:[#allocation67_spill] sm:$0xff] %v5238_v58  ;;  %v5244_v63 = vld [vmem:[%s7760_s1 + $0x20] sm:$0xff] }
 0x130   :  { %v5211_v13 = vmax.f32 %v2380_v32, %v8163_v49  ;;  %8165 = vst [vmem:[#allocation64_spill] sm:$0xff] %v5215_v18  ;;  %8169 = vst [vmem:[#allocation68_spill] sm:$0xff] %v5244_v63 }
 0x131   :  { %8166 = vst [vmem:[#allocation65_spill] sm:$0xff] %v5224_v30 }
 0x132   :  { %8164 = vst [vmem:[#allocation63_spill] sm:$0xff] %v5211_v13 }
 0x180   :  { %v250_v52 = vpop.f32.mrb[0].mxu0 }
 0x181   :  { %v409_v23 = vmul.f32 %v5232_v51, %v250_v52  ;;  %v869_v42 = vmul.f32 %v5238_v58, %v250_v52  ;;  %v1321_v33 = vmul.f32 %v5244_v63, %v250_v52  ;;  %v1773_v50 = vmul.f32 %v4700_v39, %v250_v52  ;;  %v5248_v2 = vpop.f32.mrb[1].mxu0 }
 0x182   :  { %v2225_v54 = vmul.f32 %v4740_v28, %v250_v52  ;;  %v2677_v17 = vmul.f32 %v4773_v6, %v250_v52  ;;  %v3129_v49 = vmul.f32 %v4811_v61, %v250_v52  ;;  %v3581_v32 = vmul.f32 %v4853_v27, %v250_v52 }
 0x183   :  { %v509_v20 = vrot.slane %v409_v23, 4  ;;  %v969_v37 = vrot.slane %v869_v42, 4  ;;  %v1421_v9 = vrot.slane %v1321_v33, 4  ;;  %v1873_v35 = vrot.slane %v1773_v50, 4 }
 0x184   :  { %v2325_v44 = vrot.slane %v2225_v54, 4  ;;  %v2777_v53 = vrot.slane %v2677_v17, 4  ;;  %v3229_v34 = vrot.slane %v3129_v49, 4  ;;  %v3681_v55 = vrot.slane %v3581_v32, 4 }
 0x185   :  { %v510_v3 = vadd.f32 %v509_v20, %v409_v23  ;;  %v970_v39 = vadd.f32 %v969_v37, %v869_v42  ;;  %v1422_v43 = vadd.f32 %v1421_v9, %v1321_v33  ;;  %v1874_v4 = vadd.f32 %v1873_v35, %v1773_v50 }
 0x186   :  { %v2326_v10 = vadd.f32 %v2325_v44, %v2225_v54  ;;  %v2778_v28 = vadd.f32 %v2777_v53, %v2677_v17  ;;  %v3230_v36 = vadd.f32 %v3229_v34, %v3129_v49  ;;  %v3682_v6 = vadd.f32 %v3681_v55, %v3581_v32 }
 0x187   :  { %v511_v21 = vrot.slane %v510_v3, 2  ;;  %v971_v61 = vrot.slane %v970_v39, 2  ;;  %v1423_v25 = vrot.slane %v1422_v43, 2  ;;  %v1875_v27 = vrot.slane %v1874_v4, 2 }
 0x188   :  { %v2327_v52 = vrot.slane %v2326_v10, 2  ;;  %v2779_v24 = vrot.slane %v2778_v28, 2  ;;  %v3231_v63 = vrot.slane %v3230_v36, 2  ;;  %v3683_v58 = vrot.slane %v3682_v6, 2 }
 0x189   :  { %v512_v30 = vadd.f32 %v511_v21, %v510_v3  ;;  %v972_v51 = vadd.f32 %v971_v61, %v970_v39  ;;  %v1424_v18 = vadd.f32 %v1423_v25, %v1422_v43  ;;  %v1876_v13 = vadd.f32 %v1875_v27, %v1874_v4  ;;  %v5254_v20 = vpop.f32.mrb[0].mxu1 }
 0x18a   :  { %v2328_v9 = vadd.f32 %v2327_v52, %v2326_v10  ;;  %v2780_v35 = vadd.f32 %v2779_v24, %v2778_v28  ;;  %v3232_v44 = vadd.f32 %v3231_v63, %v3230_v36  ;;  %v3684_v54 = vadd.f32 %v3683_v58, %v3682_v6 }
 0x18b   :  { %v513_v34 = vrot.slane %v512_v30, 1  ;;  %v973_v55 = vrot.slane %v972_v51, 1  ;;  %v1425_v53 = vrot.slane %v1424_v18, 1  ;;  %v1877_v50 = vrot.slane %v1876_v13, 1 }
 0x18c   :  { %v2329_v37 = vrot.slane %v2328_v9, 1  ;;  %v2781_v32 = vrot.slane %v2780_v35, 1  ;;  %v3233_v49 = vrot.slane %v3232_v44, 1  ;;  %v3685_v17 = vrot.slane %v3684_v54, 1 }
 0x18d   :  { %v5256_v23 = vadd.f32 %v513_v34, %v512_v30  ;;  %v5258_v21 = vadd.f32 %v973_v55, %v972_v51  ;;  %v5260_v25 = vadd.f32 %v1425_v53, %v1424_v18  ;;  %v5262_v4 = vadd.f32 %v1877_v50, %v1876_v13 }
 0x18e   :  { %v5264_v10 = vadd.f32 %v2329_v37, %v2328_v9  ;;  %v5266_v24 = vadd.f32 %v2781_v32, %v2780_v35  ;;  %v5268_v36 = vadd.f32 %v3233_v49, %v3232_v44  ;;  %v5270_v43 = vadd.f32 %v3685_v17, %v3684_v54 }
 0x18f   :  { %8170 = vst [vmem:[#allocation69_spill] sm:$0xff] %v5260_v25  ;;  %8171 = vst [vmem:[#allocation70_spill] sm:$0xff] %v5262_v4  ;;  %v7873_v3 = vmax.f32 %v5256_v23, 0.0  ;;  %v7872_v58 = vmax.f32 %v5258_v21, 0.0  ;;  %v7871_v30 = vmax.f32 %v5260_v25, 0.0  ;;  %v7870_v51 = vmax.f32 %v5262_v4, 0.0 }
 0x190   :  { %8172 = vst [vmem:[#allocation71_spill] sm:$0xff] %v5264_v10  ;;  %8173 = vst [vmem:[#allocation72_spill] sm:$0xff] %v5266_v24  ;;  %v7869_v18 = vmax.f32 %v5264_v10, 0.0  ;;  %v3191_v13 = vrot.slane %v5217_v12, 1  ;;  %v8176_v42 = vrot.slane %v5179_v60, 2  ;;  %v8177_v33 = vrot.slane %v5172_v16, 4 }
 0x191   :  { %8174 = vst [vmem:[#allocation73_spill] sm:$0xff] %v5268_v36  ;;  %8175 = vst [vmem:[#allocation74_spill] sm:$0xff] %v5270_v43  ;;  %v7882_v28 = vmax.f32 %v5266_v24, 0.0  ;;  %v8178_v27 = vrot.slane %v5183_v26, 4  ;;  %v5307_v9 = vmax.f32 %v4848_v15, %v7871_v30  ;;  %v410_v35 = vmul.f32 %v4897_v48, %v5248_v2 }
 0x192   :  { %v3214_v63 = vadd.f32 %v8176_v42, %v5179_v60  ;;  %v5284_v39 = vadd.f32 %v8177_v33, %v5172_v16  ;;  %v5297_v60 = vmax.f32 %v4777_v7, %v7873_v3  ;;  %v5302_v16 = vmax.f32 %v4843_v14, %v7872_v58 }
 0x193   :  { %v5292_v52 = vadd.f32 %v8178_v27, %v5183_v26  ;;  %v5312_v26 = vmax.f32 %v4857_v47, %v7870_v51  ;;  %v870_v7 = vmul.f32 %v4946_v45, %v5248_v2  ;;  %v1322_v14 = vmul.f32 %v4977_v11, %v5248_v2 }
 0x194   :  { %v1774_v44 = vmul.f32 %v5016_v41, %v5248_v2  ;;  %v5325_v15 = vmax.f32 %v5002_v59, %v7869_v18  ;;  %v2226_v47 = vmul.f32 %v5057_v46, %v5248_v2  ;;  %v2678_v48 = vmul.f32 %v5090_v56, %v5248_v2 }
 0x195   :  { %v3130_v45 = vmul.f32 %v5126_v0, %v5248_v2  ;;  %v515_v54 = vrot.slane %v410_v35, 4  ;;  %v975_v34 = vrot.slane %v870_v7, 4  ;;  %v1427_v11 = vrot.slane %v1322_v14, 4 }
 0x196   :  { %v1879_v55 = vrot.slane %v1774_v44, 4  ;;  %v2331_v53 = vrot.slane %v2226_v47, 4  ;;  %v2783_v41 = vrot.slane %v2678_v48, 4  ;;  %v8179_v50 = vrot.slane %v5196_v22, 1 }
 0x197   :  { %v8181_v46 = vrot.slane %v5198_v29, 1  ;;  %v516_v56 = vadd.f32 %v515_v54, %v410_v35  ;;  %v976_v32 = vadd.f32 %v975_v34, %v870_v7  ;;  %v1428_v49 = vadd.f32 %v1427_v11, %v1322_v14 }
 0x198   :  { %v5336_v59 = vadd.f32 %v8179_v50, %v5196_v22  ;;  %v1880_v0 = vadd.f32 %v1879_v55, %v1774_v44  ;;  %v2332_v17 = vadd.f32 %v2331_v53, %v2226_v47  ;;  %v2784_v42 = vadd.f32 %v2783_v41, %v2678_v48 }
 0x199   :  { %v5341_v37 = vadd.f32 %v8181_v46, %v5198_v29  ;;  %v3215_v33 = vrot.slane %v3214_v63, 1  ;;  %v3235_v27 = vrot.slane %v3130_v45, 4  ;;  %v517_v18 = vrot.slane %v516_v56, 2 }
 0x19a   :  { %8180 = vst [vmem:[#allocation75_spill] sm:$0xff] %v5336_v59  ;;  %v977_v51 = vrot.slane %v976_v32, 2  ;;  %v1429_v30 = vrot.slane %v1428_v49, 2  ;;  %v1881_v58 = vrot.slane %v1880_v0, 2  ;;  %v2333_v3 = vrot.slane %v2332_v17, 2 }
 0x19b   :  { %8182 = vst [vmem:[#allocation76_spill] sm:$0xff] %v5341_v37  ;;  %v2785_v22 = vrot.slane %v2784_v42, 2  ;;  %v5344_v50 = vadd.f32 %v3191_v13, %v5217_v12  ;;  %v3236_v61 = vadd.f32 %v3235_v27, %v3130_v45  ;;  %v518_v29 = vadd.f32 %v517_v18, %v516_v56 }
 0x19c   :  { %v978_v46 = vadd.f32 %v977_v51, %v976_v32  ;;  %v1430_v35 = vadd.f32 %v1429_v30, %v1428_v49  ;;  %v1882_v7 = vadd.f32 %v1881_v58, %v1880_v0  ;;  %v2334_v14 = vadd.f32 %v2333_v3, %v2332_v17  ;;  %v5370_v0 = vpop.f32.mrb[1].mxu1 }
 0x19d   :  { %8183 = vst [vmem:[#allocation77_spill] sm:$0xff] %v5344_v50  ;;  %v2786_v44 = vadd.f32 %v2785_v22, %v2784_v42  ;;  %v5346_v47 = vadd.f32 %v3215_v33, %v3214_v63  ;;  %v3237_v48 = vrot.slane %v3236_v61, 2  ;;  %v519_v54 = vrot.slane %v518_v29, 1 }
 0x19e   :  { %v979_v34 = vrot.slane %v978_v46, 1  ;;  %v1431_v11 = vrot.slane %v1430_v35, 1  ;;  %v1883_v55 = vrot.slane %v1882_v7, 1  ;;  %v2335_v53 = vrot.slane %v2334_v14, 1 }
 0x19f   :  { %8184 = vst [vmem:[#allocation78_spill] sm:$0xff] %v5346_v47  ;;  %v2787_v41 = vrot.slane %v2786_v44, 1  ;;  %v3238_v6 = vadd.f32 %v3237_v48, %v3236_v61  ;;  %v7875_v12 = vmax.f32 %v5336_v59, 0.0  ;;  %v5349_v13 = vadd.f32 %v519_v54, %v518_v29 }
 0x1a0   :  { %v5351_v18 = vadd.f32 %v979_v34, %v978_v46  ;;  %v5353_v30 = vadd.f32 %v1431_v11, %v1430_v35  ;;  %v5355_v3 = vadd.f32 %v1883_v55, %v1882_v7  ;;  %v5357_v58 = vadd.f32 %v2335_v53, %v2334_v14  ;;  %v5428_v11 = vld [vmem:[%s7759_s0 + $0xa0] sm:$0xff] }
 0x1a1   :  { %8185 = vst [vmem:[#allocation79_spill] sm:$0xff] %v5349_v13  ;;  %v5359_v51 = vadd.f32 %v2787_v41, %v2786_v44  ;;  %v3239_v63 = vrot.slane %v3238_v6, 1  ;;  %v7874_v45 = vmax.f32 %v5341_v37, 0.0  ;;  %v5365_v61 = vmax.f32 %v5011_v62, %v7882_v28  ;;  %v8197_v41 = vld [vmem:[#allocation66_spill] sm:$0xff] }
 0x1a2   :  { %8186 = vst [vmem:[#allocation80_spill] sm:$0xff] %v5351_v18  ;;  %8187 = vst [vmem:[#allocation81_spill] sm:$0xff] %v5353_v30  ;;  %v7880_v56 = vmax.f32 %v5349_v13, 0.0  ;;  %v7879_v32 = vmax.f32 %v5351_v18, 0.0  ;;  %v7878_v49 = vmax.f32 %v5353_v30, 0.0  ;;  %v8191_v17 = vmax.f32 %v5268_v36, 0.0 }
 0x1a3   :  { %8188 = vst [vmem:[#allocation82_spill] sm:$0xff] %v5355_v3  ;;  %8189 = vst [vmem:[#allocation83_spill] sm:$0xff] %v5357_v58  ;;  %v8192_v33 = vmax.f32 %v5270_v43, 0.0  ;;  %v7877_v62 = vmax.f32 %v5355_v3, 0.0  ;;  %v7876_v22 = vmax.f32 %v5357_v58, 0.0  ;;  %v5385_v46 = vadd.f32 %v3239_v63, %v3238_v6 }
 0x1a4   :  { %8190 = vst [vmem:[#allocation84_spill] sm:$0xff] %v5359_v51  ;;  %v5375_v42 = vmax.f32 %v5023_v38, %v8191_v17  ;;  %v7881_v35 = vmax.f32 %v5344_v50, 0.0  ;;  %v5392_v38 = vld [vmem:[%s7759_s0 + $0x20] sm:$0xff]  ;;  %v5402_v14 = vmax.f32 %v5192_v5, %v7879_v32  ;;  %v5407_v6 = vmax.f32 %v5203_v40, %v7878_v49 }
 0x1a5   :  { %v5380_v27 = vmax.f32 %v5027_v31, %v8192_v33  ;;  %8193 = vst [vmem:[#allocation85_spill] sm:$0xff] %v5385_v46  ;;  %v5397_v31 = vmax.f32 %v5033_v19, %v7880_v56  ;;  %v3282_v44 = vmax.f32 %v7875_v12, %v7874_v45  ;;  %v3582_v48 = vmul.f32 %v5157_v8, %v5248_v2  ;;  %v5423_v40 = vld [vmem:[%s7759_s0 + $0x60] sm:$0xff]  ;;  %v8195_v2 = vld [vmem:[#allocation63_spill] sm:$0xff] }
 0x1a6   :  { %v3593_v19 = vrot.slane %v5284_v39, 2  ;;  %v3617_v54 = vrot.slane %v5292_v52, 2  ;;  %v8194_v5 = vrot.slane %v5187_v57, 4  ;;  %v5433_v8 = vmax.f32 %v5207_v1, %v7877_v62  ;;  %v5448_v1 = vld [vmem:[%s7759_s0 + $0xe0] sm:$0xff] }
 0x1a7   :  { %v5438_v55 = vmax.f32 %v8195_v2, %v7876_v22  ;;  %v395_v63 = vmul.f32 %v8197_v41, %v5392_v38  ;;  %v3687_v45 = vrot.slane %v3582_v48, 4  ;;  %v3284_v2 = vmax.f32 %v3282_v44, %v7881_v35 }
 0x1a8   :  { %v3640_v34 = vadd.f32 %v8194_v5, %v5187_v57  ;;  %v8196_v57 = vld [vmem:[#allocation64_spill] sm:$0xff]  ;;  %v3594_v17 = vadd.f32 %v3593_v19, %v5284_v39  ;;  %v3618_v33 = vadd.f32 %v3617_v54, %v5292_v52  ;;  %v399_v22 = vmul.f32 %v8197_v41, %v5423_v40 }
 0x1a9   :  { %v3663_v53 = vrot.slane %v8196_v57, 4  ;;  %v403_v39 = vmul.f32 %v8197_v41, %v5428_v11  ;;  %v3688_v62 = vadd.f32 %v3687_v45, %v3582_v48  ;;  %v407_v32 = vmul.f32 %v8197_v41, %v5448_v1 }
 0x1aa   :  { %v3641_v5 = vrot.slane %v3640_v34, 2  ;;  %v3595_v19 = vrot.slane %v3594_v17, 1  ;;  %v3619_v52 = vrot.slane %v3618_v33, 1  ;;  %v411_v56 = vmul.f32 %v8197_v41, %v5254_v20 }
 0x1ab   :  { %v3664_v12 = vadd.f32 %v3663_v53, %v8196_v57  ;;  %v425_v44 = vrot.slane %v395_v63, 4  ;;  %v3689_v28 = vrot.slane %v3688_v62, 2  ;;  %v449_v50 = vrot.slane %v399_v22, 4 }
 0x1ac   :  { %v3642_v54 = vadd.f32 %v3641_v5, %v3640_v34  ;;  %v5461_v35 = vadd.f32 %v3595_v19, %v3594_v17  ;;  %v5463_v57 = vadd.f32 %v3619_v52, %v3618_v33  ;;  %v473_v37 = vrot.slane %v403_v39, 4 }
 0x1ad   :  { %v3665_v49 = vrot.slane %v3664_v12, 2  ;;  %v426_v29 = vadd.f32 %v425_v44, %v395_v63  ;;  %v3690_v45 = vadd.f32 %v3689_v28, %v3688_v62  ;;  %v450_v58 = vadd.f32 %v449_v50, %v399_v22  ;;  %v8202_v28 = vld [vmem:[#allocation65_spill] sm:$0xff] }
 0x1ae   :  { %8198 = vst [vmem:[#allocation63_spill] sm:$0xff] %v5461_v35  ;;  %8199 = vst [vmem:[#allocation64_spill] sm:$0xff] %v5463_v57  ;;  %v3643_v53 = vrot.slane %v3642_v54, 1  ;;  %v7888_v48 = vmax.f32 %v5461_v35, 0.0  ;;  %v7887_v5 = vmax.f32 %v5463_v57, 0.0  ;;  %v474_v17 = vadd.f32 %v473_v37, %v403_v39 }
 0x1af   :  { %v3666_v7 = vadd.f32 %v3665_v49, %v3664_v12  ;;  %v427_v41 = vrot.slane %v426_v29, 2  ;;  %v3691_v19 = vrot.slane %v3690_v45, 1  ;;  %v497_v49 = vrot.slane %v407_v32, 4 }
 0x1b0   :  { %v5465_v34 = vadd.f32 %v3643_v53, %v3642_v54  ;;  %v3734_v12 = vmax.f32 %v7888_v48, %v7887_v5  ;;  %v8201_v63 = vmax.f32 %v5359_v51, 0.0  ;;  %v451_v54 = vrot.slane %v450_v58, 2 }
 0x1b1   :  { %v3667_v59 = vrot.slane %v3666_v7, 1  ;;  %v428_v52 = vadd.f32 %v427_v41, %v426_v29  ;;  %v475_v44 = vrot.slane %v474_v17, 2  ;;  %v8203_v37 = vmax.f32 %v5346_v47, 0.0 }
 0x1b2   :  { %8200 = vst [vmem:[#allocation66_spill] sm:$0xff] %v5465_v34  ;;  %v5477_v62 = vmax.f32 %v8202_v28, %v8201_v63  ;;  %v498_v39 = vadd.f32 %v497_v49, %v407_v32  ;;  %v521_v53 = vrot.slane %v411_v56, 4  ;;  %v452_v48 = vadd.f32 %v451_v54, %v450_v58 }
 0x1b3   :  { %v5482_v22 = vmax.f32 %v3284_v2, %v8203_v37  ;;  %v5484_v33 = vadd.f32 %v3667_v59, %v3666_v7  ;;  %v429_v5 = vrot.slane %v428_v52, 1  ;;  %v476_v57 = vadd.f32 %v475_v44, %v474_v17  ;;  %v8207_v2 = vld [vmem:[#allocation67_spill] sm:$0xff] }
 0x1b4   :  { %v5486_v35 = vadd.f32 %v3691_v19, %v3690_v45  ;;  %v8206_v63 = vmax.f32 %v5465_v34, 0.0  ;;  %v499_v41 = vrot.slane %v498_v39, 2  ;;  %v522_v28 = vadd.f32 %v521_v53, %v411_v56 }
 0x1b5   :  { %8204 = vst [vmem:[#allocation65_spill] sm:$0xff] %v5484_v33  ;;  %v5490_v51 = vadd.f32 %v429_v5, %v428_v52  ;;  %v453_v50 = vrot.slane %v452_v48, 1  ;;  %v477_v47 = vrot.slane %v476_v57, 1  ;;  %v855_v32 = vmul.f32 %v8207_v2, %v5392_v38 }
 0x1b6   :  { %8205 = vst [vmem:[#allocation86_spill] sm:$0xff] %v5486_v35  ;;  %v3736_v29 = vmax.f32 %v3734_v12, %v8206_v63  ;;  %v500_v49 = vadd.f32 %v499_v41, %v498_v39  ;;  %v523_v59 = vrot.slane %v522_v28, 2  ;;  %v859_v58 = vmul.f32 %v8207_v2, %v5423_v40 }
 0x1b7   :  { %v863_v7 = vmul.f32 %v8207_v2, %v5428_v11  ;;  %v454_v17 = vadd.f32 %v453_v50, %v452_v48  ;;  %v478_v19 = vadd.f32 %v477_v47, %v476_v57  ;;  %v535_v56 = vmax.f32 %v5490_v51, 0.0 }
 0x1b8   :  { %v501_v5 = vrot.slane %v500_v49, 1  ;;  %v524_v12 = vadd.f32 %v523_v59, %v522_v28  ;;  %v867_v52 = vmul.f32 %v8207_v2, %v5448_v1  ;;  %v871_v54 = vmul.f32 %v8207_v2, %v5254_v20 }
 0x1b9   :  { %v539_v44 = vmax.f32 %v454_v17, 0.0  ;;  %v543_v37 = vmax.f32 %v478_v19, 0.0  ;;  %v885_v39 = vrot.slane %v855_v32, 4  ;;  %v909_v53 = vrot.slane %v859_v58, 4 }
 0x1ba   :  { %v502_v63 = vadd.f32 %v501_v5, %v500_v49  ;;  %v525_v41 = vrot.slane %v524_v12, 1  ;;  %v933_v34 = vrot.slane %v863_v7, 4  ;;  %v957_v45 = vrot.slane %v867_v52, 4 }
 0x1bb   :  { %v554_v48 = vmax.f32 %v535_v56, %v539_v44  ;;  %v886_v47 = vadd.f32 %v885_v39, %v855_v32  ;;  %v910_v57 = vadd.f32 %v909_v53, %v859_v58  ;;  %v981_v51 = vrot.slane %v871_v54, 4 }
 0x1bc   :  { %v526_v50 = vadd.f32 %v525_v41, %v524_v12  ;;  %v547_v28 = vmax.f32 %v502_v63, 0.0  ;;  %v934_v59 = vadd.f32 %v933_v34, %v863_v7  ;;  %v958_v3 = vadd.f32 %v957_v45, %v867_v52  ;;  %v8208_v12 = vld [vmem:[#allocation68_spill] sm:$0xff] }
 0x1bd   :  { %v556_v30 = vmax.f32 %v554_v48, %v543_v37  ;;  %v887_v18 = vrot.slane %v886_v47, 2  ;;  %v911_v13 = vrot.slane %v910_v57, 2  ;;  %v982_v2 = vadd.f32 %v981_v51, %v871_v54 }
 0x1be   :  { %v7902_v17 = vmax.f32 %v5486_v35, 0.0  ;;  %v551_v19 = vmax.f32 %v526_v50, 0.0  ;;  %v935_v43 = vrot.slane %v934_v59, 2  ;;  %v959_v49 = vrot.slane %v958_v3, 2 }
 0x1bf   :  { %v558_v5 = vmax.f32 %v556_v30, %v547_v28  ;;  %v888_v36 = vadd.f32 %v887_v18, %v886_v47  ;;  %v912_v24 = vadd.f32 %v911_v13, %v910_v57  ;;  %v983_v10 = vrot.slane %v982_v2, 2 }
 0x1c0   :  { %v936_v32 = vadd.f32 %v935_v43, %v934_v59  ;;  %v960_v58 = vadd.f32 %v959_v49, %v958_v3  ;;  %v1307_v39 = vmul.f32 %v8208_v12, %v5392_v38  ;;  %v1311_v34 = vmul.f32 %v8208_v12, %v5423_v40 }
 0x1c1   :  { %v560_v7 = vmax.f32 %v558_v5, %v551_v19  ;;  %v889_v45 = vrot.slane %v888_v36, 1  ;;  %v913_v52 = vrot.slane %v912_v24, 1  ;;  %v984_v54 = vadd.f32 %v983_v10, %v982_v2 }
 0x1c2   :  { %v8209_v53 = vmax.f32 %v5484_v33, 0.0  ;;  %v937_v41 = vrot.slane %v936_v32, 1  ;;  %v961_v30 = vrot.slane %v960_v58, 1  ;;  %v1315_v13 = vmul.f32 %v8208_v12, %v5428_v11 }
 0x1c3   :  { %v5514_v43 = vmax.f32 %v5297_v60, %v560_v7  ;;  %v5516_v18 = vadd.f32 %v889_v45, %v888_v36  ;;  %v5518_v3 = vadd.f32 %v913_v52, %v912_v24  ;;  %v985_v48 = vrot.slane %v984_v54, 1 }
 0x1c4   :  { %v3738_v63 = vmax.f32 %v3736_v29, %v8209_v53  ;;  %v5520_v47 = vadd.f32 %v937_v41, %v936_v32  ;;  %v5522_v57 = vadd.f32 %v961_v30, %v960_v58  ;;  %v1319_v10 = vmul.f32 %v8208_v12, %v5448_v1 }
 0x1c5   :  { %v1337_v29 = vrot.slane %v1307_v39, 4  ;;  %v573_v51 = vsub.f32 %v535_v56, %v5514_v43  ;;  %v577_v50 = vsub.f32 %v539_v44, %v5514_v43  ;;  %v581_v60 = vsub.f32 %v543_v37, %v5514_v43 }
 0x1c6   :  { %v1361_v59 = vrot.slane %v1311_v34, 4  ;;  %v589_v36 = vsub.f32 %v551_v19, %v5514_v43  ;;  %v986_v24 = vadd.f32 %v985_v48, %v984_v54  ;;  %v995_v2 = vmax.f32 %v5516_v18, 0.0 }
 0x1c7   :  { %v999_v49 = vmax.f32 %v5518_v3, 0.0  ;;  %v595_v5 = vmul.f32 1.442695, %v573_v51  ;;  %v603_v32 = vmul.f32 1.442695, %v577_v50  ;;  %v1323_v58 = vmul.f32 %v8208_v12, %v5254_v20 }
 0x1c8   :  { %v1338_v7 = vadd.f32 %v1337_v29, %v1307_v39  ;;  %v585_v56 = vsub.f32 %v547_v28, %v5514_v43  ;;  %v611_v45 = vmul.f32 1.442695, %v581_v60  ;;  %v627_v44 = vmul.f32 1.442695, %v589_v36 }
 0x1c9   :  { %v1003_v37 = vmax.f32 %v5520_v47, 0.0  ;;  %4136 = vpow2.f32 %v595_v5  ;;  %v1007_v19 = vmax.f32 %v5522_v57, 0.0  ;;  %v1014_v52 = vmax.f32 %v995_v2, %v999_v49 }
 0x1ca   :  { %v1339_v54 = vrot.slane %v1338_v7, 2  ;;  %v1011_v53 = vmax.f32 %v986_v24, 0.0  ;;  %v1362_v41 = vadd.f32 %v1361_v59, %v1311_v34  ;;  %v1385_v30 = vrot.slane %v1315_v13, 4 }
 0x1cb   :  { %v1409_v18 = vrot.slane %v1319_v10, 4  ;;  %4138 = vpow2.f32 %v603_v32  ;;  %v1016_v3 = vmax.f32 %v1014_v52, %v1003_v37  ;;  %v1433_v12 = vrot.slane %v1323_v58, 4 }
 0x1cc   :  { %v1340_v48 = vadd.f32 %v1339_v54, %v1338_v7  ;;  %v8210_v39 = vmax.f32 %v5385_v46, 0.0  ;;  %v1363_v29 = vrot.slane %v1362_v41, 2  ;;  %v1386_v47 = vadd.f32 %v1385_v30, %v1315_v13 }
 0x1cd   :  { %v1410_v51 = vadd.f32 %v1409_v18, %v1319_v10  ;;  %v619_v50 = vmul.f32 1.442695, %v585_v56  ;;  %v1018_v57 = vmax.f32 %v1016_v3, %v1007_v19  ;;  %v1434_v36 = vadd.f32 %v1433_v12, %v1323_v58 }
 0x1ce   :  { %v5540_v28 = vmax.f32 %v5482_v22, %v8210_v39  ;;  %v1341_v60 = vrot.slane %v1340_v48, 1  ;;  %4140 = vpow2.f32 %v611_v45  ;;  %v1364_v34 = vadd.f32 %v1363_v29, %v1362_v41  ;;  %v4491_v45 = vld [vmem:[%s7760_s1 + $0x30] sm:$0xff] }
 0x1cf   :  { %v1387_v59 = vrot.slane %v1386_v47, 2  ;;  %v1411_v24 = vrot.slane %v1410_v51, 2  ;;  %v5544_v5 = vmax.f32 %v3738_v63, %v7902_v17  ;;  %4142 = vpow2.f32 %v627_v44 }
 0x1d0   :  { %v1020_v32 = vmax.f32 %v1018_v57, %v1011_v53  ;;  %v1435_v7 = vrot.slane %v1434_v36, 2  ;;  %v5546_v22 = vadd.f32 %v1341_v60, %v1340_v48  ;;  %v1365_v52 = vrot.slane %v1364_v34, 1 }
 0x1d1   :  { %v1388_v13 = vadd.f32 %v1387_v59, %v1386_v47  ;;  %v1412_v10 = vadd.f32 %v1411_v24, %v1410_v51  ;;  %4144 = vpow2.f32 %v619_v50  ;;  %v1759_v63 = vmul.f32 %v4491_v45, %v5392_v38 }
 0x1d2   :  { %v5549_v56 = vmax.f32 %v5302_v16, %v1020_v32  ;;  %v1436_v58 = vadd.f32 %v1435_v7, %v1434_v36  ;;  %v5555_v54 = vadd.f32 %v1365_v52, %v1364_v34  ;;  %v1763_v30 = vmul.f32 %v4491_v45, %v5423_v40 }
 0x1d3   :  { %v1389_v44 = vrot.slane %v1388_v13, 1  ;;  %v1413_v41 = vrot.slane %v1412_v10, 1  ;;  %v5558_v18 = vpop.eup %4136  ;;  %v1767_v12 = vmul.f32 %v4491_v45, %v5428_v11  ;;  %v1447_v51 = vmax.f32 %v5546_v22, 0.0 }
 0x1d4   :  { %8211 = vst [vmem:[#allocation67_spill] sm:$0xff] %v5558_v18  ;;  %v1033_v3 = vsub.f32 %v995_v2, %v5549_v56  ;;  %v1037_v16 = vsub.f32 %v999_v49, %v5549_v56  ;;  %v1041_v48 = vsub.f32 %v1003_v37, %v5549_v56  ;;  %v1049_v39 = vsub.f32 %v1011_v53, %v5549_v56 }
 0x1d5   :  { %v5565_v29 = vadd.f32 %v1389_v44, %v1388_v13  ;;  %v5567_v47 = vadd.f32 %v1413_v41, %v1412_v10  ;;  %v5570_v50 = vpop.eup %4138  ;;  %v1045_v57 = vsub.f32 %v1007_v19, %v5549_v56  ;;  %v1437_v36 = vrot.slane %v1436_v58, 1 }
 0x1d6   :  { %8212 = vst [vmem:[#allocation68_spill] sm:$0xff] %v5570_v50  ;;  %v1055_v60 = vmul.f32 1.442695, %v1033_v3  ;;  %v1063_v2 = vmul.f32 1.442695, %v1037_v16  ;;  %v1451_v37 = vmax.f32 %v5555_v54, 0.0  ;;  %v1771_v34 = vmul.f32 %v4491_v45, %v5448_v1 }
 0x1d7   :  { %v1775_v53 = vmul.f32 %v4491_v45, %v5254_v20  ;;  %v1071_v59 = vmul.f32 1.442695, %v1041_v48  ;;  %v1438_v24 = vadd.f32 %v1437_v36, %v1436_v58  ;;  %v1455_v32 = vmax.f32 %v5565_v29, 0.0 }
 0x1d8   :  { %4146 = vpow2.f32 %v1055_v60  ;;  %v5578_v7 = vpop.eup %4140  ;;  %v1459_v22 = vmax.f32 %v5567_v47, 0.0  ;;  %v1466_v52 = vmax.f32 %v1447_v51, %v1451_v37  ;;  %v1079_v10 = vmul.f32 1.442695, %v1045_v57 }
 0x1d9   :  { %8213 = vst [vmem:[#allocation87_spill] sm:$0xff] %v5578_v7  ;;  %4148 = vpow2.f32 %v1063_v2  ;;  %v5582_v13 = vpop.eup %4142  ;;  %v1087_v54 = vmul.f32 1.442695, %v1049_v39  ;;  %v1789_v44 = vrot.slane %v1759_v63, 4  ;;  %v1813_v41 = vrot.slane %v1763_v30, 4 }
 0x1da   :  { %8214 = vst [vmem:[#allocation88_spill] sm:$0xff] %v5582_v13  ;;  %v1463_v45 = vmax.f32 %v1438_v24, 0.0  ;;  %v1468_v3 = vmax.f32 %v1466_v52, %v1455_v32  ;;  %v1837_v16 = vrot.slane %v1767_v12, 4  ;;  %v1861_v58 = vrot.slane %v1771_v34, 4 }
 0x1db   :  { %v5584_v48 = vpop.eup %4144  ;;  %4150 = vpow2.f32 %v1071_v59  ;;  %v1790_v29 = vadd.f32 %v1789_v44, %v1759_v63  ;;  %v1814_v60 = vadd.f32 %v1813_v41, %v1763_v30  ;;  %v1885_v36 = vrot.slane %v1775_v53, 4 }
 0x1dc   :  { %8215 = vst [vmem:[#allocation89_spill] sm:$0xff] %v5584_v48  ;;  %v1470_v47 = vmax.f32 %v1468_v3, %v1459_v22  ;;  %v1838_v19 = vadd.f32 %v1837_v16, %v1767_v12  ;;  %v1862_v49 = vadd.f32 %v1861_v58, %v1771_v34  ;;  %4152 = vpow2.f32 %v1079_v10  ;;  %v4492_v12 = vld [vmem:[%s7760_s1 + $0x40] sm:$0xff] }
 0x1dd   :  { %v1791_v39 = vrot.slane %v1790_v29, 2  ;;  %v1815_v17 = vrot.slane %v1814_v60, 2  ;;  %v1886_v35 = vadd.f32 %v1885_v36, %v1775_v53  ;;  %4154 = vpow2.f32 %v1087_v54 }
 0x1de   :  { %v1472_v24 = vmax.f32 %v1470_v47, %v1463_v45  ;;  %v1839_v52 = vrot.slane %v1838_v19, 2  ;;  %v1863_v33 = vrot.slane %v1862_v49, 2  ;;  %v2211_v34 = vmul.f32 %v4492_v12, %v5392_v38 }
 0x1df   :  { %v1792_v46 = vadd.f32 %v1791_v39, %v1790_v29  ;;  %v1816_v59 = vadd.f32 %v1815_v17, %v1814_v60  ;;  %v1887_v63 = vrot.slane %v1886_v35, 2  ;;  %v2215_v44 = vmul.f32 %v4492_v12, %v5423_v40 }
 0x1e0   :  { %v5589_v30 = vmax.f32 %v5307_v9, %v1472_v24  ;;  %v2219_v53 = vmul.f32 %v4492_v12, %v5428_v11  ;;  %v1840_v3 = vadd.f32 %v1839_v52, %v1838_v19  ;;  %v2223_v17 = vmul.f32 %v4492_v12, %v5448_v1 }
 0x1e1   :  { %v1793_v41 = vrot.slane %v1792_v46, 1  ;;  %v1817_v54 = vrot.slane %v1816_v59, 1  ;;  %v1864_v60 = vadd.f32 %v1863_v33, %v1862_v49  ;;  %v1888_v39 = vadd.f32 %v1887_v63, %v1886_v35 }
 0x1e2   :  { %8216 = vst [vmem:[#allocation90_spill] sm:$0xff] %v5589_v30  ;;  %v5597_v10 = vpop.eup %4146  ;;  %v1485_v9 = vsub.f32 %v1447_v51, %v5589_v30  ;;  %v1489_v58 = vsub.f32 %v1451_v37, %v5589_v30  ;;  %v1493_v29 = vsub.f32 %v1455_v32, %v5589_v30  ;;  %v1501_v36 = vsub.f32 %v1463_v45, %v5589_v30 }
 0x1e3   :  { %8217 = vst [vmem:[#allocation91_spill] sm:$0xff] %v5597_v10  ;;  %v5600_v16 = vpop.eup %4148  ;;  %v5606_v47 = vadd.f32 %v1793_v41, %v1792_v46  ;;  %v2227_v24 = vmul.f32 %v4492_v12, %v5254_v20  ;;  %v5609_v52 = vadd.f32 %v1817_v54, %v1816_v59  ;;  %v2241_v2 = vrot.slane %v2211_v34, 4 }
 0x1e4   :  { %8218 = vst [vmem:[#allocation92_spill] sm:$0xff] %v5600_v16  ;;  %v1507_v57 = vmul.f32 1.442695, %v1485_v9  ;;  %v1515_v19 = vmul.f32 1.442695, %v1489_v58  ;;  %v1841_v33 = vrot.slane %v1840_v3, 1  ;;  %v1497_v49 = vsub.f32 %v1459_v22, %v5589_v30 }
 0x1e5   :  { %v5611_v13 = vpop.eup %4150  ;;  %v1523_v32 = vmul.f32 1.442695, %v1493_v29  ;;  %v1539_v46 = vmul.f32 1.442695, %v1501_v36  ;;  %v1865_v35 = vrot.slane %v1864_v60, 1  ;;  %v1889_v63 = vrot.slane %v1888_v39, 1 }
 0x1e6   :  { %8219 = vst [vmem:[#allocation93_spill] sm:$0xff] %v5611_v13  ;;  %4156 = vpow2.f32 %v1507_v57  ;;  %v5616_v45 = vadd.f32 %v1841_v33, %v1840_v3  ;;  %v1899_v59 = vmax.f32 %v5606_v47, 0.0  ;;  %v5619_v12 = vpop.eup %4152  ;;  %v1903_v9 = vmax.f32 %v5609_v52, 0.0 }
 0x1e7   :  { %4158 = vpow2.f32 %v1515_v19  ;;  %8220 = vst [vmem:[#allocation94_spill] sm:$0xff] %v5619_v12  ;;  %v5622_v54 = vadd.f32 %v1865_v35, %v1864_v60  ;;  %v2242_v58 = vadd.f32 %v2241_v2, %v2211_v34  ;;  %v5625_v29 = vpop.eup %4154  ;;  %v1890_v22 = vadd.f32 %v1889_v63, %v1888_v39 }
 0x1e8   :  { %8221 = vst [vmem:[#allocation95_spill] sm:$0xff] %v5625_v29  ;;  %4160 = vpow2.f32 %v1523_v32  ;;  %v1907_v57 = vmax.f32 %v5616_v45, 0.0  ;;  %v2265_v3 = vrot.slane %v2215_v44, 4  ;;  %v1918_v47 = vmax.f32 %v1899_v59, %v1903_v9 }
 0x1e9   :  { %4162 = vpow2.f32 %v1539_v46  ;;  %v1911_v36 = vmax.f32 %v5622_v54, 0.0  ;;  %v2243_v19 = vrot.slane %v2242_v58, 2  ;;  %v1531_v33 = vmul.f32 1.442695, %v1497_v49 }
 0x1ea   :  { %v2266_v37 = vadd.f32 %v2265_v3, %v2215_v44  ;;  %v2289_v41 = vrot.slane %v2219_v53, 4  ;;  %v2313_v60 = vrot.slane %v2223_v17, 4  ;;  %v1915_v35 = vmax.f32 %v1890_v22, 0.0 }
 0x1eb   :  { %v1920_v51 = vmax.f32 %v1918_v47, %v1907_v57  ;;  %v2244_v52 = vadd.f32 %v2243_v19, %v2242_v58  ;;  %v2337_v2 = vrot.slane %v2227_v24, 4  ;;  %4164 = vpow2.f32 %v1531_v33  ;;  %v4493_v58 = vld [vmem:[%s7760_s1 + $0x50] sm:$0xff] }
 0x1ec   :  { %v2267_v32 = vrot.slane %v2266_v37, 2  ;;  %v2290_v39 = vadd.f32 %v2289_v41, %v2219_v53  ;;  %v2314_v63 = vadd.f32 %v2313_v60, %v2223_v17  ;;  %v2663_v53 = vmul.f32 %v4493_v58, %v5392_v38 }
 0x1ed   :  { %v1922_v46 = vmax.f32 %v1920_v51, %v1911_v36  ;;  %v2245_v4 = vrot.slane %v2244_v52, 1  ;;  %v2338_v54 = vadd.f32 %v2337_v2, %v2227_v24  ;;  %v2667_v17 = vmul.f32 %v4493_v58, %v5423_v40 }
 0x1ee   :  { %v2268_v25 = vadd.f32 %v2267_v32, %v2266_v37  ;;  %v2291_v49 = vrot.slane %v2290_v39, 2  ;;  %v2315_v44 = vrot.slane %v2314_v63, 2  ;;  %v2671_v60 = vmul.f32 %v4493_v58, %v5428_v11 }
 0x1ef   :  { %v1924_v22 = vmax.f32 %v1922_v46, %v1915_v35  ;;  %v2339_v47 = vrot.slane %v2338_v54, 2  ;;  %v5640_v51 = vadd.f32 %v2245_v4, %v2244_v52  ;;  %v2675_v2 = vmul.f32 %v4493_v58, %v5448_v1 }
 0x1f0   :  { %v5631_v3 = vpop.eup %4156  ;;  %v2269_v24 = vrot.slane %v2268_v25, 1  ;;  %v2292_v37 = vadd.f32 %v2291_v49, %v2290_v39  ;;  %v2316_v19 = vadd.f32 %v2315_v44, %v2314_v63  ;;  %v2679_v32 = vmul.f32 %v4493_v58, %v5254_v20 }
 0x1f1   :  { %8222 = vst [vmem:[#allocation96_spill] sm:$0xff] %v5631_v3  ;;  %v5638_v41 = vpop.eup %4158  ;;  %v5643_v33 = vmax.f32 %v5312_v26, %v1924_v22  ;;  %v2340_v4 = vadd.f32 %v2339_v47, %v2338_v54  ;;  %v2741_v26 = vrot.slane %v2671_v60, 4  ;;  %v2765_v54 = vrot.slane %v2675_v2, 4 }
 0x1f2   :  { %8223 = vst [vmem:[#allocation97_spill] sm:$0xff] %v5638_v41  ;;  %v5648_v46 = vpop.eup %4160  ;;  %v5650_v34 = vadd.f32 %v2269_v24, %v2268_v25  ;;  %v2293_v45 = vrot.slane %v2292_v37, 1  ;;  %v2317_v29 = vrot.slane %v2316_v19, 1  ;;  %v2351_v25 = vmax.f32 %v5640_v51, 0.0 }
 0x1f3   :  { %8224 = vst [vmem:[#allocation98_spill] sm:$0xff] %v5643_v33  ;;  %8225 = vst [vmem:[#allocation99_spill] sm:$0xff] %v5648_v46  ;;  %v5652_v52 = vpop.eup %4162  ;;  %v1937_v63 = vsub.f32 %v1899_v59, %v5643_v33  ;;  %v1941_v49 = vsub.f32 %v1903_v9, %v5643_v33  ;;  %v1953_v44 = vsub.f32 %v1915_v35, %v5643_v33  ;;  %v2341_v41 = vrot.slane %v2340_v4, 1 }
 0x1f4   :  { %8226 = vst [vmem:[#allocation100_spill] sm:$0xff] %v5652_v52  ;;  %v5659_v22 = vadd.f32 %v2293_v45, %v2292_v37  ;;  %v5661_v58 = vadd.f32 %v2317_v29, %v2316_v19  ;;  %v1945_v47 = vsub.f32 %v1907_v57, %v5643_v33  ;;  %v1949_v59 = vsub.f32 %v1911_v36, %v5643_v33 }
 0x1f5   :  { %v1959_v24 = vmul.f32 1.442695, %v1937_v63  ;;  %v1967_v39 = vmul.f32 1.442695, %v1941_v49  ;;  %v2355_v9 = vmax.f32 %v5650_v34, 0.0  ;;  %v2693_v45 = vrot.slane %v2663_v53, 4  ;;  %v5671_v51 = vpop.eup %4164 }
 0x1f6   :  { %v2359_v35 = vmax.f32 %v5659_v22, 0.0  ;;  %v2363_v29 = vmax.f32 %v5661_v58, 0.0  ;;  %8227 = vst [vmem:[#allocation101_spill] sm:$0xff] %v5671_v51  ;;  %v2342_v37 = vadd.f32 %v2341_v41, %v2340_v4  ;;  %v2717_v19 = vrot.slane %v2667_v17, 4  ;;  %v4494_v41 = vld [vmem:[%s7760_s1 + $0x60] sm:$0xff] }
 0x1f7   :  { %4166 = vpow2.f32 %v1959_v24  ;;  %v2370_v57 = vmax.f32 %v2351_v25, %v2355_v9  ;;  %v1975_v63 = vmul.f32 1.442695, %v1945_v47  ;;  %v2694_v49 = vadd.f32 %v2693_v45, %v2663_v53 }
 0x1f8   :  { %4168 = vpow2.f32 %v1967_v39  ;;  %v1983_v36 = vmul.f32 1.442695, %v1949_v59  ;;  %v2367_v52 = vmax.f32 %v2342_v37, 0.0  ;;  %v2718_v34 = vadd.f32 %v2717_v19, %v2667_v17 }
 0x1f9   :  { %v2372_v33 = vmax.f32 %v2370_v57, %v2359_v35  ;;  %v1991_v24 = vmul.f32 1.442695, %v1953_v44  ;;  %v2695_v46 = vrot.slane %v2694_v49, 2  ;;  %v2742_v22 = vadd.f32 %v2741_v26, %v2671_v60 }
 0x1fa   :  { %v2766_v3 = vadd.f32 %v2765_v54, %v2675_v2  ;;  %v2719_v30 = vrot.slane %v2718_v34, 2  ;;  %v2789_v12 = vrot.slane %v2679_v32, 4  ;;  %v3115_v4 = vmul.f32 %v4494_v41, %v5392_v38 }
 0x1fb   :  { %v2374_v58 = vmax.f32 %v2372_v33, %v2363_v29  ;;  %4170 = vpow2.f32 %v1975_v63  ;;  %v2696_v53 = vadd.f32 %v2695_v46, %v2694_v49  ;;  %v2743_v39 = vrot.slane %v2742_v22, 2 }
 0x1fc   :  { %v2767_v47 = vrot.slane %v2766_v3, 2  ;;  %4172 = vpow2.f32 %v1983_v36  ;;  %v2720_v17 = vadd.f32 %v2719_v30, %v2718_v34  ;;  %v2790_v44 = vadd.f32 %v2789_v12, %v2679_v32 }
 0x1fd   :  { %v2376_v59 = vmax.f32 %v2374_v58, %v2367_v52  ;;  %4174 = vpow2.f32 %v1991_v24  ;;  %v2697_v60 = vrot.slane %v2696_v53, 1  ;;  %v2744_v2 = vadd.f32 %v2743_v39, %v2742_v22 }
 0x1fe   :  { %v2768_v33 = vadd.f32 %v2767_v47, %v2766_v3  ;;  %v2721_v54 = vrot.slane %v2720_v17, 1  ;;  %v3119_v45 = vmul.f32 %v4494_v41, %v5423_v40  ;;  %v3123_v37 = vmul.f32 %v4494_v41, %v5428_v11 }
 0x1ff   :  { %v5678_v26 = vmax.f32 %v5325_v15, %v2376_v59  ;;  %v2745_v46 = vrot.slane %v2744_v2, 1  ;;  %v2791_v63 = vrot.slane %v2790_v44, 2  ;;  %v3127_v30 = vmul.f32 %v4494_v41, %v5448_v1 }
 0x200   :  { %v2769_v19 = vrot.slane %v2768_v33, 1  ;;  %v5689_v15 = vadd.f32 %v2697_v60, %v2696_v53  ;;  %v3131_v49 = vmul.f32 %v4494_v41, %v5254_v20  ;;  %v5694_v24 = vadd.f32 %v2721_v54, %v2720_v17 }
 0x201   :  { %8228 = vst [vmem:[#allocation102_spill] sm:$0xff] %v5678_v26  ;;  %v5682_v57 = vpop.eup %4166  ;;  %v2389_v32 = vsub.f32 %v2351_v25, %v5678_v26  ;;  %v2393_v3 = vsub.f32 %v2355_v9, %v5678_v26  ;;  %v2397_v36 = vsub.f32 %v2359_v35, %v5678_v26  ;;  %v2405_v34 = vsub.f32 %v2367_v52, %v5678_v26 }
 0x202   :  { %8229 = vst [vmem:[#allocation103_spill] sm:$0xff] %v5682_v57  ;;  %v5685_v12 = vpop.eup %4168  ;;  %v3145_v22 = vrot.slane %v3115_v4, 4  ;;  %v2746_v47 = vadd.f32 %v2745_v46, %v2744_v2  ;;  %v3169_v59 = vrot.slane %v3119_v45, 4  ;;  %v2401_v9 = vsub.f32 %v2363_v29, %v5678_v26 }
 0x203   :  { %8230 = vst [vmem:[#allocation104_spill] sm:$0xff] %v5685_v12  ;;  %v2411_v39 = vmul.f32 1.442695, %v2389_v32  ;;  %v2770_v53 = vadd.f32 %v2769_v19, %v2768_v33  ;;  %v2792_v60 = vadd.f32 %v2791_v63, %v2790_v44  ;;  %v2419_v51 = vmul.f32 1.442695, %v2393_v3 }
 0x204   :  { %v2443_v41 = vmul.f32 1.442695, %v2405_v34  ;;  %v2803_v35 = vmax.f32 %v5689_v15, 0.0  ;;  %v2807_v52 = vmax.f32 %v5694_v24, 0.0  ;;  %v2427_v54 = vmul.f32 1.442695, %v2397_v36 }
 0x205   :  { %v5701_v17 = vpop.eup %4170  ;;  %4176 = vpow2.f32 %v2411_v39  ;;  %v2793_v58 = vrot.slane %v2792_v60, 1  ;;  %v2811_v32 = vmax.f32 %v2746_v47, 0.0  ;;  %v2815_v46 = vmax.f32 %v2770_v53, 0.0 }
 0x206   :  { %8231 = vst [vmem:[#allocation105_spill] sm:$0xff] %v5701_v17  ;;  %v5703_v2 = vpop.eup %4172  ;;  %v2822_v25 = vmax.f32 %v2803_v35, %v2807_v52  ;;  %v3146_v12 = vadd.f32 %v3145_v22, %v3115_v4  ;;  %v3170_v29 = vadd.f32 %v3169_v59, %v3119_v45  ;;  %v2435_v44 = vmul.f32 1.442695, %v2401_v9 }
 0x207   :  { %8232 = vst [vmem:[#allocation106_spill] sm:$0xff] %v5703_v2  ;;  %v5705_v33 = vpop.eup %4174  ;;  %v2794_v19 = vadd.f32 %v2793_v58, %v2792_v60  ;;  %v3193_v63 = vrot.slane %v3123_v37, 4  ;;  %v3217_v3 = vrot.slane %v3127_v30, 4  ;;  %4178 = vpow2.f32 %v2443_v41 }
 0x208   :  { %8233 = vst [vmem:[#allocation107_spill] sm:$0xff] %v5705_v33  ;;  %v2824_v15 = vmax.f32 %v2822_v25, %v2811_v32  ;;  %v3147_v34 = vrot.slane %v3146_v12, 2  ;;  %v3171_v24 = vrot.slane %v3170_v29, 2  ;;  %v3241_v47 = vrot.slane %v3131_v49, 4 }
 0x209   :  { %v2819_v39 = vmax.f32 %v2794_v19, 0.0  ;;  %v3194_v36 = vadd.f32 %v3193_v63, %v3123_v37  ;;  %v3218_v26 = vadd.f32 %v3217_v3, %v3127_v30  ;;  %4180 = vpow2.f32 %v2419_v51  ;;  %v4495_v30 = vld [vmem:[%s7760_s1 + $0x70] sm:$0xff] }
 0x20a   :  { %v2826_v53 = vmax.f32 %v2824_v15, %v2815_v46  ;;  %v3148_v17 = vadd.f32 %v3147_v34, %v3146_v12  ;;  %v3172_v4 = vadd.f32 %v3171_v24, %v3170_v29  ;;  %v3242_v59 = vadd.f32 %v3241_v47, %v3131_v49 }
 0x20b   :  { %v3195_v45 = vrot.slane %v3194_v36, 2  ;;  %v3219_v22 = vrot.slane %v3218_v26, 2  ;;  %4182 = vpow2.f32 %v2427_v54  ;;  %v3567_v51 = vmul.f32 %v4495_v30, %v5392_v38  ;;  %v5729_v38 = vld [vmem:[%s7759_s0 + $0x28] sm:$0xff] }
 0x20c   :  { %v2828_v58 = vmax.f32 %v2826_v53, %v2819_v39  ;;  %v3149_v9 = vrot.slane %v3148_v17, 1  ;;  %v3173_v60 = vrot.slane %v3172_v4, 1  ;;  %4184 = vpow2.f32 %v2435_v44 }
 0x20d   :  { %v3196_v25 = vadd.f32 %v3195_v45, %v3194_v36  ;;  %v3220_v41 = vadd.f32 %v3219_v22, %v3218_v26  ;;  %v3243_v19 = vrot.slane %v3242_v59, 2  ;;  %v3571_v12 = vmul.f32 %v4495_v30, %v5423_v40 }
 0x20e   :  { %v5709_v37 = vmax.f32 %v5365_v61, %v2828_v58  ;;  %v3575_v49 = vmul.f32 %v4495_v30, %v5428_v11  ;;  %v5719_v29 = vadd.f32 %v3149_v9, %v3148_v17  ;;  %v5724_v34 = vadd.f32 %v3173_v60, %v3172_v4 }
 0x20f   :  { %v5717_v54 = vpop.eup %4176  ;;  %v3197_v44 = vrot.slane %v3196_v25, 1  ;;  %v3221_v26 = vrot.slane %v3220_v41, 1  ;;  %v3244_v63 = vadd.f32 %v3243_v19, %v3242_v59  ;;  %v3583_v47 = vmul.f32 %v4495_v30, %v5254_v20 }
 0x210   :  { %8234 = vst [vmem:[#allocation108_spill] sm:$0xff] %v5709_v37  ;;  %8235 = vst [vmem:[#allocation109_spill] sm:$0xff] %v5717_v54  ;;  %v2841_v61 = vsub.f32 %v2803_v35, %v5709_v37  ;;  %v2845_v3 = vsub.f32 %v2807_v52, %v5709_v37  ;;  %v2849_v15 = vsub.f32 %v2811_v32, %v5709_v37  ;;  %v3255_v59 = vmax.f32 %v5719_v29, 0.0 }
 0x211   :  { %v2853_v40 = vsub.f32 %v2815_v46, %v5709_v37  ;;  %v2857_v11 = vsub.f32 %v2819_v39, %v5709_v37  ;;  %v5733_v17 = vadd.f32 %v3197_v44, %v3196_v25  ;;  %v3245_v24 = vrot.slane %v3244_v63, 1  ;;  %v5735_v36 = vpop.eup %4178  ;;  %v5745_v46 = vld [vmem:[%s7760_s1 + $0x8] sm:$0xff] }
 0x212   :  { %8236 = vst [vmem:[#allocation110_spill] sm:$0xff] %v5735_v36  ;;  %v5738_v52 = vadd.f32 %v3221_v26, %v3220_v41  ;;  %v3579_v32 = vmul.f32 %v4495_v30, %v5448_v1  ;;  %v2863_v53 = vmul.f32 1.442695, %v2841_v61  ;;  %v2871_v4 = vmul.f32 1.442695, %v2845_v3 }
 0x213   :  { %v2879_v45 = vmul.f32 1.442695, %v2849_v15  ;;  %v5749_v39 = vmul.f32 %v5745_v46, %v5729_v38  ;;  %v3246_v22 = vadd.f32 %v3245_v24, %v3244_v63  ;;  %v3259_v58 = vmax.f32 %v5724_v34, 0.0  ;;  %v5754_v20 = vpop.eup %4180 }
 0x214   :  { %v3263_v1 = vmax.f32 %v5733_v17, 0.0  ;;  %8237 = vst [vmem:[#allocation111_spill] sm:$0xff] %v5754_v20  ;;  %v2887_v60 = vmul.f32 1.442695, %v2853_v40  ;;  %v2895_v25 = vmul.f32 1.442695, %v2857_v11  ;;  %4186 = vpow2.f32 %v2863_v53 }
 0x215   :  { %v3597_v41 = vrot.slane %v3567_v51, 4  ;;  %v5757_v19 = vpop.eup %4182  ;;  %v3267_v30 = vmax.f32 %v5738_v52, 0.0  ;;  %v3274_v44 = vmax.f32 %v3255_v59, %v3259_v58  ;;  %v3621_v26 = vrot.slane %v3571_v12, 4  ;;  %v5765_v40 = vld [vmem:[%s7759_s0 + $0x68] sm:$0xff] }
 0x216   :  { %8238 = vst [vmem:[#allocation112_spill] sm:$0xff] %v5757_v19  ;;  %v3645_v63 = vrot.slane %v3575_v49, 4  ;;  %v5760_v61 = vpop.eup %4184  ;;  %v3669_v3 = vrot.slane %v3579_v32, 4  ;;  %v3693_v15 = vrot.slane %v3583_v47, 4  ;;  %v3271_v34 = vmax.f32 %v3246_v22, 0.0 }
 0x217   :  { %8239 = vst [vmem:[#allocation113_spill] sm:$0xff] %v5760_v61  ;;  %v3598_v29 = vadd.f32 %v3597_v41, %v3567_v51  ;;  %v3276_v17 = vmax.f32 %v3274_v44, %v3263_v1  ;;  %v3622_v24 = vadd.f32 %v3621_v26, %v3571_v12  ;;  %4188 = vpow2.f32 %v2871_v4 }
 0x218   :  { %v3646_v9 = vadd.f32 %v3645_v63, %v3575_v49  ;;  %v3670_v52 = vadd.f32 %v3669_v3, %v3579_v32  ;;  %v3694_v35 = vadd.f32 %v3693_v15, %v3583_v47  ;;  %4190 = vpow2.f32 %v2879_v45 }
 0x219   :  { %v3599_v11 = vrot.slane %v3598_v29, 2  ;;  %v3278_v2 = vmax.f32 %v3276_v17, %v3267_v30  ;;  %v3623_v36 = vrot.slane %v3622_v24, 2  ;;  %v400_v12 = vmul.f32 %v5745_v46, %v5765_v40 }
 0x21a   :  { %v3647_v53 = vrot.slane %v3646_v9, 2  ;;  %v3671_v41 = vrot.slane %v3670_v52, 2  ;;  %v3695_v33 = vrot.slane %v3694_v35, 2  ;;  %4192 = vpow2.f32 %v2887_v60 }
 0x21b   :  { %v3600_v51 = vadd.f32 %v3599_v11, %v3598_v29  ;;  %v3280_v49 = vmax.f32 %v3278_v2, %v3271_v34  ;;  %v3624_v22 = vadd.f32 %v3623_v36, %v3622_v24  ;;  %4194 = vpow2.f32 %v2895_v25  ;;  %v5778_v2 = vld [vmem:[%s7759_s0 + $0xa8] sm:$0xff] }
 0x21c   :  { %v3648_v44 = vadd.f32 %v3647_v53, %v3646_v9  ;;  %v3672_v4 = vadd.f32 %v3671_v41, %v3670_v52  ;;  %v3696_v63 = vadd.f32 %v3695_v33, %v3694_v35  ;;  %v431_v29 = vrot.slane %v5749_v39, 4  ;;  %v5783_v33 = vld [vmem:[%s7759_s0 + $0xe8] sm:$0xff] }
 0x21d   :  { %v3601_v26 = vrot.slane %v3600_v51, 1  ;;  %v5770_v32 = vmax.f32 %v5375_v42, %v3280_v49  ;;  %v3625_v47 = vrot.slane %v3624_v22, 1  ;;  %v455_v42 = vrot.slane %v400_v12, 4 }
 0x21e   :  { %v3649_v45 = vrot.slane %v3648_v44, 1  ;;  %v3673_v15 = vrot.slane %v3672_v4, 1  ;;  %v3697_v17 = vrot.slane %v3696_v63, 1  ;;  %v5789_v25 = vpop.eup %4186 }
 0x21f   :  { %8240 = vst [vmem:[#allocation114_spill] sm:$0xff] %v5770_v32  ;;  %v5773_v3 = vadd.f32 %v3601_v26, %v3600_v51  ;;  %v3293_v36 = vsub.f32 %v3255_v59, %v5770_v32  ;;  %v3297_v35 = vsub.f32 %v3259_v58, %v5770_v32  ;;  %v3301_v9 = vsub.f32 %v3263_v1, %v5770_v32 }
 0x220   :  { %v3305_v60 = vsub.f32 %v3267_v30, %v5770_v32  ;;  %8241 = vst [vmem:[#allocation115_spill] sm:$0xff] %v5789_v25  ;;  %v3309_v24 = vsub.f32 %v3271_v34, %v5770_v32  ;;  %v5792_v11 = vadd.f32 %v3625_v47, %v3624_v22  ;;  %v5794_v52 = vadd.f32 %v3649_v45, %v3648_v44 }
 0x221   :  { %v5796_v53 = vadd.f32 %v3673_v15, %v3672_v4  ;;  %v3315_v51 = vmul.f32 1.442695, %v3293_v36  ;;  %v404_v59 = vmul.f32 %v5745_v46, %v5778_v2  ;;  %v408_v58 = vmul.f32 %v5745_v46, %v5783_v33  ;;  %v5804_v30 = vpop.eup %4188 }
 0x222   :  { %v412_v1 = vmul.f32 %v5745_v46, %v5370_v0  ;;  %8242 = vst [vmem:[#allocation116_spill] sm:$0xff] %v5804_v30  ;;  %v3323_v41 = vmul.f32 1.442695, %v3297_v35  ;;  %v3698_v34 = vadd.f32 %v3697_v17, %v3696_v63  ;;  %v3707_v49 = vmax.f32 %v5773_v3, 0.0  ;;  %v5808_v44 = vpop.eup %4190 }
 0x223   :  { %v3711_v22 = vmax.f32 %v5792_v11, 0.0  ;;  %8243 = vst [vmem:[#allocation117_spill] sm:$0xff] %v5808_v44  ;;  %v3331_v4 = vmul.f32 1.442695, %v3301_v9  ;;  %v3339_v47 = vmul.f32 1.442695, %v3305_v60  ;;  %v432_v46 = vadd.f32 %v431_v29, %v5749_v39 }
 0x224   :  { %v3715_v45 = vmax.f32 %v5794_v52, 0.0  ;;  %v3719_v15 = vmax.f32 %v5796_v53, 0.0  ;;  %v456_v32 = vadd.f32 %v455_v42, %v400_v12  ;;  %v5814_v35 = vpop.eup %4192  ;;  %v3347_v63 = vmul.f32 1.442695, %v3309_v24 }
 0x225   :  { %v3726_v36 = vmax.f32 %v3707_v49, %v3711_v22  ;;  %8244 = vst [vmem:[#allocation118_spill] sm:$0xff] %v5814_v35  ;;  %v479_v3 = vrot.slane %v404_v59, 4  ;;  %v503_v17 = vrot.slane %v408_v58, 4  ;;  %v527_v11 = vrot.slane %v412_v1, 4  ;;  %v5816_v30 = vpop.eup %4194  ;;  %v4497_v35 = vld [vmem:[%s7760_s1 + $0x18] sm:$0xff] }
 0x226   :  { %8245 = vst [vmem:[#allocation119_spill] sm:$0xff] %v5816_v30  ;;  %v3723_v44 = vmax.f32 %v3698_v34, 0.0  ;;  %v433_v9 = vrot.slane %v432_v46, 2  ;;  %v457_v60 = vrot.slane %v456_v32, 2  ;;  %4196 = vpow2.f32 %v3315_v51 }
 0x227   :  { %v3728_v26 = vmax.f32 %v3726_v36, %v3715_v45  ;;  %v480_v52 = vadd.f32 %v479_v3, %v404_v59  ;;  %v504_v25 = vadd.f32 %v503_v17, %v408_v58  ;;  %v528_v53 = vadd.f32 %v527_v11, %v412_v1 }
 0x228   :  { %4198 = vpow2.f32 %v3323_v41  ;;  %v434_v39 = vadd.f32 %v433_v9, %v432_v46  ;;  %v458_v12 = vadd.f32 %v457_v60, %v456_v32  ;;  %v856_v34 = vmul.f32 %v4497_v35, %v5729_v38 }
 0x229   :  { %v3730_v37 = vmax.f32 %v3728_v26, %v3719_v15  ;;  %v481_v29 = vrot.slane %v480_v52, 2  ;;  %v505_v42 = vrot.slane %v504_v25, 2  ;;  %v529_v24 = vrot.slane %v528_v53, 2 }
 0x22a   :  { %4200 = vpow2.f32 %v3331_v4  ;;  %v435_v30 = vrot.slane %v434_v39, 1  ;;  %v459_v51 = vrot.slane %v458_v12, 1  ;;  %v860_v46 = vmul.f32 %v4497_v35, %v5765_v40 }
 0x22b   :  { %v3732_v36 = vmax.f32 %v3730_v37, %v3723_v44  ;;  %4202 = vpow2.f32 %v3339_v47  ;;  %v482_v59 = vadd.f32 %v481_v29, %v480_v52  ;;  %v506_v58 = vadd.f32 %v505_v42, %v504_v25  ;;  %v5830_v37 = vpop.f32.mrb[2].mxu0 }
 0x22c   :  { %v530_v1 = vadd.f32 %v529_v24, %v528_v53  ;;  %v5825_v32 = vadd.f32 %v435_v30, %v434_v39  ;;  %v5827_v26 = vadd.f32 %v459_v51, %v458_v12  ;;  %v891_v4 = vrot.slane %v856_v34, 4 }
 0x22d   :  { %v5823_v41 = vmax.f32 %v5380_v27, %v3732_v36  ;;  %v483_v3 = vrot.slane %v482_v59, 1  ;;  %v507_v17 = vrot.slane %v506_v58, 1  ;;  %v864_v53 = vmul.f32 %v4497_v35, %v5778_v2 }
 0x22e   :  { %v531_v11 = vrot.slane %v530_v1, 1  ;;  %v868_v12 = vmul.f32 %v4497_v35, %v5783_v33  ;;  %v892_v29 = vadd.f32 %v891_v4, %v856_v34  ;;  %4204 = vpow2.f32 %v3347_v63 }
 0x22f   :  { %8246 = vst [vmem:[#allocation120_spill] sm:$0xff] %v5823_v41  ;;  %v3745_v47 = vsub.f32 %v3707_v49, %v5823_v41  ;;  %v3749_v25 = vsub.f32 %v3711_v22, %v5823_v41  ;;  %v3753_v9 = vsub.f32 %v3715_v45, %v5823_v41  ;;  %v3757_v27 = vsub.f32 %v3719_v15, %v5823_v41 }
 0x230   :  { %v3761_v30 = vsub.f32 %v3723_v44, %v5823_v41  ;;  %v5837_v60 = vadd.f32 %v483_v3, %v482_v59  ;;  %v5839_v52 = vadd.f32 %v507_v17, %v506_v58  ;;  %v5842_v39 = vadd.f32 %v531_v11, %v530_v1  ;;  %v5846_v22 = vpop.eup %4196 }
 0x231   :  { %v872_v49 = vmul.f32 %v4497_v35, %v5370_v0  ;;  %8247 = vst [vmem:[#allocation121_spill] sm:$0xff] %v5846_v22  ;;  %v3767_v45 = vmul.f32 1.442695, %v3745_v47  ;;  %v3775_v42 = vmul.f32 1.442695, %v3749_v25  ;;  %v536_v15 = vmax.f32 %v5825_v32, 0.0 }
 0x232   :  { %v540_v44 = vmax.f32 %v5827_v26, 0.0  ;;  %v5850_v24 = vpop.eup %4198  ;;  %v3783_v36 = vmul.f32 1.442695, %v3753_v9  ;;  %v3791_v51 = vmul.f32 1.442695, %v3757_v27  ;;  %v544_v59 = vmax.f32 %v5837_v60, 0.0 }
 0x233   :  { %8248 = vst [vmem:[#allocation122_spill] sm:$0xff] %v5850_v24  ;;  %v548_v58 = vmax.f32 %v5839_v52, 0.0  ;;  %v893_v35 = vrot.slane %v892_v29, 2  ;;  %v915_v34 = vrot.slane %v860_v46, 4  ;;  %v5856_v17 = vmul.f32 1.442695, %v3761_v30 }
 0x234   :  { %v563_v1 = vmax.f32 %v536_v15, %v540_v44  ;;  %v5854_v3 = vpop.eup %4200  ;;  %v939_v11 = vrot.slane %v864_v53, 4  ;;  %v963_v32 = vrot.slane %v868_v12, 4  ;;  %v987_v4 = vrot.slane %v872_v49, 4 }
 0x235   :  { %8249 = vst [vmem:[#allocation123_spill] sm:$0xff] %v5854_v3  ;;  %v5858_v26 = vpop.eup %4202  ;;  %v552_v63 = vmax.f32 %v5842_v39, 0.0  ;;  %v894_v25 = vadd.f32 %v893_v35, %v892_v29  ;;  %v916_v9 = vadd.f32 %v915_v34, %v860_v46  ;;  %4206 = vpow2.f32 %v3767_v45  ;;  %v4498_v46 = vld [vmem:[%s7760_s1 + $0x28] sm:$0xff] }
 0x236   :  { %8250 = vst [vmem:[#allocation124_spill] sm:$0xff] %v5858_v26  ;;  %v565_v47 = vmax.f32 %v563_v1, %v544_v59  ;;  %v940_v27 = vadd.f32 %v939_v11, %v864_v53  ;;  %v964_v60 = vadd.f32 %v963_v32, %v868_v12  ;;  %v988_v52 = vadd.f32 %v987_v4, %v872_v49 }
 0x237   :  { %4208 = vpow2.f32 %v3775_v42  ;;  %v895_v24 = vrot.slane %v894_v25, 1  ;;  %v917_v3 = vrot.slane %v916_v9, 2  ;;  %v1308_v53 = vmul.f32 %v4498_v46, %v5729_v38 }
 0x238   :  { %v567_v41 = vmax.f32 %v565_v47, %v548_v58  ;;  %4210 = vpow2.f32 %v3783_v36  ;;  %v941_v30 = vrot.slane %v940_v27, 2  ;;  %v965_v22 = vrot.slane %v964_v60, 2  ;;  %v5873_v36 = vpop.eup %4204 }
 0x239   :  { %v989_v61 = vrot.slane %v988_v52, 2  ;;  %v5861_v20 = vadd.f32 %v895_v24, %v894_v25  ;;  %v918_v26 = vadd.f32 %v917_v3, %v916_v9  ;;  %v1312_v29 = vmul.f32 %v4498_v46, %v5765_v40  ;;  %8252 = vst [vmem:[#allocation126_spill] sm:$0xff] %v5873_v36 }
 0x23a   :  { %v569_v19 = vmax.f32 %v567_v41, %v552_v63  ;;  %v942_v39 = vadd.f32 %v941_v30, %v940_v27  ;;  %v966_v12 = vadd.f32 %v965_v22, %v964_v60  ;;  %v1316_v41 = vmul.f32 %v4498_v46, %v5778_v2 }
 0x23b   :  { %v990_v49 = vadd.f32 %v989_v61, %v988_v52  ;;  %v919_v42 = vrot.slane %v918_v26, 1  ;;  %v1320_v24 = vmul.f32 %v4498_v46, %v5783_v33  ;;  %v7956_v3 = vmax.f32 %v5861_v20, 0.0 }
 0x23c   :  { %v5869_v45 = vmax.f32 %v5397_v31, %v569_v19  ;;  %v943_v1 = vrot.slane %v942_v39, 1  ;;  %v967_v35 = vrot.slane %v966_v12, 1  ;;  %v1343_v31 = vrot.slane %v1308_v53, 4 }
 0x23d   :  { %v991_v34 = vrot.slane %v990_v49, 1  ;;  %v5880_v32 = vadd.f32 %v919_v42, %v918_v26  ;;  %v1324_v60 = vmul.f32 %v4498_v46, %v5370_v0  ;;  %4212 = vpow2.f32 %v3791_v51 }
 0x23e   :  { %8251 = vst [vmem:[#allocation125_spill] sm:$0xff] %v5869_v45  ;;  %v574_v22 = vsub.f32 %v536_v15, %v5869_v45  ;;  %v578_v61 = vsub.f32 %v540_v44, %v5869_v45  ;;  %v582_v11 = vsub.f32 %v544_v59, %v5869_v45  ;;  %v590_v19 = vsub.f32 %v552_v63, %v5869_v45 }
 0x23f   :  { %v5882_v4 = vadd.f32 %v943_v1, %v942_v39  ;;  %v5884_v47 = vadd.f32 %v967_v35, %v966_v12  ;;  %v5887_v52 = vpop.eup %4206  ;;  %v992_v15 = vadd.f32 %v991_v34, %v990_v49  ;;  %v1000_v44 = vmax.f32 %v5880_v32, 0.0 }
 0x240   :  { %v597_v25 = vmul.f32 1.442695, %v574_v22  ;;  %v605_v9 = vmul.f32 1.442695, %v578_v61  ;;  %v613_v27 = vmul.f32 1.442695, %v582_v11  ;;  %v586_v26 = vsub.f32 %v548_v58, %v5869_v45 }
 0x241   :  { %8253 = vst [vmem:[#allocation127_spill] sm:$0xff] %v5887_v52  ;;  %v1004_v59 = vmax.f32 %v5882_v4, 0.0  ;;  %v5891_v63 = vpop.eup %4208  ;;  %v1008_v30 = vmax.f32 %v5884_v47, 0.0  ;;  %v1344_v39 = vadd.f32 %v1343_v31, %v1308_v53  ;;  %v1023_v46 = vmax.f32 %v7956_v3, %v1000_v44  ;;  %v4499_v53 = vld [vmem:[%s7760_s1 + $0x38] sm:$0xff] }
 0x242   :  { %8254 = vst [vmem:[#allocation128_spill] sm:$0xff] %v5891_v63  ;;  %4214 = vpow2.f32 %v597_v25  ;;  %v5895_v12 = vpop.eup %4210  ;;  %v1367_v51 = vrot.slane %v1312_v29, 4  ;;  %v1391_v49 = vrot.slane %v1316_v41, 4  ;;  %v1415_v1 = vrot.slane %v1320_v24, 4 }
 0x243   :  { %8255 = vst [vmem:[#allocation129_spill] sm:$0xff] %v5895_v12  ;;  %4216 = vpow2.f32 %v605_v9  ;;  %v1345_v42 = vrot.slane %v1344_v39, 2  ;;  %v1439_v35 = vrot.slane %v1324_v60, 4  ;;  %v1012_v34 = vmax.f32 %v992_v15, 0.0 }
 0x244   :  { %4218 = vpow2.f32 %v613_v27  ;;  %v1025_v22 = vmax.f32 %v1023_v46, %v1004_v59  ;;  %v1368_v61 = vadd.f32 %v1367_v51, %v1312_v29  ;;  %v1392_v58 = vadd.f32 %v1391_v49, %v1316_v41 }
 0x245   :  { %v1346_v11 = vadd.f32 %v1345_v42, %v1344_v39  ;;  %v1416_v32 = vadd.f32 %v1415_v1, %v1320_v24  ;;  %v1440_v4 = vadd.f32 %v1439_v35, %v1324_v60  ;;  %v1760_v31 = vmul.f32 %v4499_v53, %v5729_v38 }
 0x246   :  { %4220 = vpow2.f32 %v5856_v17  ;;  %v1027_v47 = vmax.f32 %v1025_v22, %v1008_v30  ;;  %v1369_v25 = vrot.slane %v1368_v61, 2  ;;  %v1393_v9 = vrot.slane %v1392_v58, 2 }
 0x247   :  { %v5904_v27 = vmul.f32 1.442695, %v586_v26  ;;  %v1347_v15 = vrot.slane %v1346_v11, 1  ;;  %v1417_v46 = vrot.slane %v1416_v32, 2  ;;  %v1441_v29 = vrot.slane %v1440_v4, 2  ;;  %v5909_v35 = vpop.eup %4212 }
 0x248   :  { %v1029_v41 = vmax.f32 %v1027_v47, %v1012_v34  ;;  %v1370_v39 = vadd.f32 %v1369_v25, %v1368_v61  ;;  %v1394_v24 = vadd.f32 %v1393_v9, %v1392_v58  ;;  %v1764_v60 = vmul.f32 %v4499_v53, %v5765_v40  ;;  %8258 = vst [vmem:[#allocation132_spill] sm:$0xff] %v5909_v35 }
 0x249   :  { %8256 = vst [vmem:[#allocation130_spill] sm:$0xff] %v5904_v27  ;;  %v5907_v51 = vmul.f32 1.442695, %v590_v19  ;;  %v1418_v49 = vadd.f32 %v1417_v46, %v1416_v32  ;;  %v1442_v42 = vadd.f32 %v1441_v29, %v1440_v4  ;;  %v1795_v1 = vrot.slane %v1760_v31, 4 }
 0x24a   :  { %v5912_v17 = vmax.f32 %v5402_v14, %v1029_v41  ;;  %v5914_v26 = vadd.f32 %v1347_v15, %v1346_v11  ;;  %v1371_v22 = vrot.slane %v1370_v39, 1  ;;  %v1395_v3 = vrot.slane %v1394_v24, 1 }
 0x24b   :  { %8257 = vst [vmem:[#allocation131_spill] sm:$0xff] %v5907_v51  ;;  %v1419_v61 = vrot.slane %v1418_v49, 1  ;;  %v1768_v58 = vmul.f32 %v4499_v53, %v5778_v2  ;;  %v1772_v19 = vmul.f32 %v4499_v53, %v5783_v33  ;;  %v1776_v32 = vmul.f32 %v4499_v53, %v5370_v0 }
 0x24c   :  { %v5916_v27 = vpop.eup %4214  ;;  %v8260_v47 = vmax.f32 %v5861_v20, 0.0  ;;  %v1038_v11 = vsub.f32 %v1000_v44, %v5912_v17  ;;  %v1443_v25 = vrot.slane %v1442_v42, 1  ;;  %v1819_v9 = vrot.slane %v1764_v60, 4 }
 0x24d   :  { %v5921_v4 = vpop.eup %4216  ;;  %v1042_v46 = vsub.f32 %v1004_v59, %v5912_v17  ;;  %v1050_v29 = vsub.f32 %v1012_v34, %v5912_v17  ;;  %v5931_v41 = vadd.f32 %v1371_v22, %v1370_v39  ;;  %v1796_v51 = vadd.f32 %v1795_v1, %v1760_v31 }
 0x24e   :  { %8259 = vst [vmem:[#allocation133_spill] sm:$0xff] %v5921_v4  ;;  %v1034_v14 = vsub.f32 %v8260_v47, %v5912_v17  ;;  %v5927_v15 = vpop.eup %4218  ;;  %v1065_v45 = vmul.f32 1.442695, %v1038_v11  ;;  %v1396_v36 = vadd.f32 %v1395_v3, %v1394_v24  ;;  %v1448_v35 = vmax.f32 %v5914_v26, 0.0 }
 0x24f   :  { %8261 = vst [vmem:[#allocation134_spill] sm:$0xff] %v5927_v15  ;;  %v1046_v47 = vsub.f32 %v1008_v30, %v5912_v17  ;;  %v5937_v12 = vadd.f32 %v1419_v61, %v1418_v49  ;;  %v1444_v34 = vadd.f32 %v1443_v25, %v1442_v42  ;;  %v1452_v31 = vmax.f32 %v5931_v41, 0.0 }
 0x250   :  { %v1057_v53 = vmul.f32 1.442695, %v1034_v14  ;;  %v5939_v63 = vpop.eup %4220  ;;  %v1456_v39 = vmax.f32 %v1396_v36, 0.0  ;;  %v1073_v3 = vmul.f32 1.442695, %v1042_v46  ;;  %v1797_v24 = vrot.slane %v1796_v51, 2 }
 0x251   :  { %8262 = vst [vmem:[#allocation135_spill] sm:$0xff] %v5939_v63  ;;  %v1820_v1 = vadd.f32 %v1819_v9, %v1764_v60  ;;  %v1460_v26 = vmax.f32 %v5937_v12, 0.0  ;;  %v1475_v22 = vmax.f32 %v1448_v35, %v1452_v31  ;;  %v1843_v14 = vrot.slane %v1768_v58, 4  ;;  %v4500_v36 = vld [vmem:[%s7760_s1 + $0x48] sm:$0xff] }
 0x252   :  { %4222 = vpow2.f32 %v1057_v53  ;;  %v1798_v30 = vadd.f32 %v1797_v24, %v1796_v51  ;;  %v1867_v61 = vrot.slane %v1772_v19, 4  ;;  %v1891_v11 = vrot.slane %v1776_v32, 4 }
 0x253   :  { %4224 = vpow2.f32 %v1065_v45  ;;  %v1821_v49 = vrot.slane %v1820_v1, 2  ;;  %v1464_v44 = vmax.f32 %v1444_v34, 0.0  ;;  %v1477_v20 = vmax.f32 %v1475_v22, %v1456_v39 }
 0x254   :  { %v1844_v59 = vadd.f32 %v1843_v14, %v1768_v58  ;;  %v2212_v42 = vmul.f32 %v4500_v36, %v5729_v38  ;;  %v1799_v25 = vrot.slane %v1798_v30, 1  ;;  %v1868_v45 = vadd.f32 %v1867_v61, %v1772_v19 }
 0x255   :  { %v1822_v60 = vadd.f32 %v1821_v49, %v1820_v1  ;;  %v1892_v9 = vadd.f32 %v1891_v11, %v1776_v32  ;;  %4226 = vpow2.f32 %v1073_v3  ;;  %v5948_v12 = vmul.f32 1.442695, %v1046_v47 }
 0x256   :  { %v1479_v51 = vmax.f32 %v1477_v20, %v1460_v26  ;;  %v1845_v46 = vrot.slane %v1844_v59, 2  ;;  %v5950_v41 = vadd.f32 %v1799_v25, %v1798_v30  ;;  %v1869_v34 = vrot.slane %v1868_v45, 2 }
 0x257   :  { %8263 = vst [vmem:[#allocation136_spill] sm:$0xff] %v5948_v12  ;;  %v1823_v53 = vrot.slane %v1822_v60, 1  ;;  %v1893_v58 = vrot.slane %v1892_v9, 2  ;;  %v5952_v24 = vmul.f32 1.442695, %v1050_v29  ;;  %v2247_v15 = vrot.slane %v2212_v42, 4 }
 0x258   :  { %v1481_v22 = vmax.f32 %v1479_v51, %v1464_v44  ;;  %v1846_v14 = vadd.f32 %v1845_v46, %v1844_v59  ;;  %v1870_v1 = vadd.f32 %v1869_v34, %v1868_v45  ;;  %v2216_v32 = vmul.f32 %v4500_v36, %v5765_v40 }
 0x259   :  { %8264 = vst [vmem:[#allocation137_spill] sm:$0xff] %v5952_v24  ;;  %v5954_v4 = vadd.f32 %v1823_v53, %v1822_v60  ;;  %v1894_v19 = vadd.f32 %v1893_v58, %v1892_v9  ;;  %v2220_v3 = vmul.f32 %v4500_v36, %v5778_v2  ;;  %v2224_v30 = vmul.f32 %v4500_v36, %v5783_v33 }
 0x25a   :  { %v5958_v47 = vmax.f32 %v5407_v6, %v1481_v22  ;;  %v1847_v20 = vrot.slane %v1846_v14, 1  ;;  %v1871_v29 = vrot.slane %v1870_v1, 1  ;;  %v1900_v59 = vmax.f32 %v5950_v41, 0.0 }
 0x25b   :  { %v1895_v61 = vrot.slane %v1894_v19, 1  ;;  %v2248_v11 = vadd.f32 %v2247_v15, %v2212_v42  ;;  %v1904_v9 = vmax.f32 %v5954_v4, 0.0  ;;  %v2228_v53 = vmul.f32 %v4500_v36, %v5370_v0 }
 0x25c   :  { %8265 = vst [vmem:[#allocation138_spill] sm:$0xff] %v5958_v47  ;;  %v5962_v49 = vpop.eup %4222  ;;  %v1486_v60 = vsub.f32 %v1448_v35, %v5958_v47  ;;  %v1490_v45 = vsub.f32 %v1452_v31, %v5958_v47  ;;  %v1494_v6 = vsub.f32 %v1456_v39, %v5958_v47  ;;  %v1502_v51 = vsub.f32 %v1464_v44, %v5958_v47 }
 0x25d   :  { %8266 = vst [vmem:[#allocation139_spill] sm:$0xff] %v5962_v49  ;;  %v5965_v25 = vpop.eup %4224  ;;  %v1848_v46 = vadd.f32 %v1847_v20, %v1846_v14  ;;  %v2271_v34 = vrot.slane %v2216_v32, 4  ;;  %v5973_v15 = vadd.f32 %v1871_v29, %v1870_v1  ;;  %v1498_v35 = vsub.f32 %v1460_v26, %v5958_v47 }
 0x25e   :  { %8267 = vst [vmem:[#allocation140_spill] sm:$0xff] %v5965_v25  ;;  %v1509_v58 = vmul.f32 1.442695, %v1486_v60  ;;  %v1517_v22 = vmul.f32 1.442695, %v1490_v45  ;;  %v1896_v31 = vadd.f32 %v1895_v61, %v1894_v19  ;;  %v1927_v44 = vmax.f32 %v1900_v59, %v1904_v9 }
 0x25f   :  { %v1525_v41 = vmul.f32 1.442695, %v1494_v6  ;;  %v1908_v24 = vmax.f32 %v1848_v46, 0.0  ;;  %v5977_v39 = vpop.eup %4226  ;;  %v1912_v4 = vmax.f32 %v5973_v15, 0.0  ;;  %v2249_v14 = vrot.slane %v2248_v11, 2 }
 0x260   :  { %8268 = vst [vmem:[#allocation141_spill] sm:$0xff] %v5977_v39  ;;  %4228 = vpow2.f32 %v1509_v58  ;;  %v1916_v36 = vmax.f32 %v1896_v31, 0.0  ;;  %v2272_v20 = vadd.f32 %v2271_v34, %v2216_v32  ;;  %v2295_v60 = vrot.slane %v2220_v3, 4 }
 0x261   :  { %4230 = vpow2.f32 %v1517_v22  ;;  %v1929_v1 = vmax.f32 %v1927_v44, %v1908_v24  ;;  %v2250_v29 = vadd.f32 %v2249_v14, %v2248_v11  ;;  %v2319_v45 = vrot.slane %v2224_v30, 4  ;;  %v4501_v44 = vld [vmem:[%s7760_s1 + $0x58] sm:$0xff] }
 0x262   :  { %4232 = vpow2.f32 %v1525_v41  ;;  %v2273_v26 = vrot.slane %v2272_v20, 2  ;;  %v2296_v19 = vadd.f32 %v2295_v60, %v2220_v3  ;;  %v2343_v61 = vrot.slane %v2228_v53, 4 }
 0x263   :  { %v1931_v58 = vmax.f32 %v1929_v1, %v1912_v4  ;;  %v2251_v42 = vrot.slane %v2250_v29, 1  ;;  %v2320_v15 = vadd.f32 %v2319_v45, %v2224_v30  ;;  %v5982_v47 = vmul.f32 1.442695, %v1498_v35 }
 0x264   :  { %v2274_v22 = vadd.f32 %v2273_v26, %v2272_v20  ;;  %v2297_v31 = vrot.slane %v2296_v19, 2  ;;  %v2344_v32 = vadd.f32 %v2343_v61, %v2228_v53  ;;  %v2664_v3 = vmul.f32 %v4501_v44, %v5729_v38 }
 0x265   :  { %8269 = vst [vmem:[#allocation142_spill] sm:$0xff] %v5982_v47  ;;  %v1933_v34 = vmax.f32 %v1931_v58, %v1916_v36  ;;  %v5984_v41 = vadd.f32 %v2251_v42, %v2250_v29  ;;  %v2321_v11 = vrot.slane %v2320_v15, 2  ;;  %v5990_v14 = vmul.f32 1.442695, %v1502_v51 }
 0x266   :  { %v2275_v60 = vrot.slane %v2274_v22, 1  ;;  %v2298_v1 = vadd.f32 %v2297_v31, %v2296_v19  ;;  %v2345_v30 = vrot.slane %v2344_v32, 2  ;;  %v2668_v53 = vmul.f32 %v4501_v44, %v5765_v40 }
 0x267   :  { %8270 = vst [vmem:[#allocation143_spill] sm:$0xff] %v5990_v14  ;;  %v5993_v35 = vmax.f32 %v5433_v8, %v1933_v34  ;;  %v2322_v20 = vadd.f32 %v2321_v11, %v2320_v15  ;;  %v2672_v42 = vmul.f32 %v4501_v44, %v5778_v2  ;;  %v2676_v61 = vmul.f32 %v4501_v44, %v5783_v33 }
 0x268   :  { %v2299_v29 = vrot.slane %v2298_v1, 1  ;;  %v2346_v45 = vadd.f32 %v2345_v30, %v2344_v32  ;;  %v6003_v31 = vadd.f32 %v2275_v60, %v2274_v22  ;;  %v2699_v8 = vrot.slane %v2664_v3, 4 }
 0x269   :  { %8271 = vst [vmem:[#allocation144_spill] sm:$0xff] %v5993_v35  ;;  %v1938_v51 = vsub.f32 %v1900_v59, %v5993_v35  ;;  %v1942_v19 = vsub.f32 %v1904_v9, %v5993_v35  ;;  %v1946_v34 = vsub.f32 %v1908_v24, %v5993_v35  ;;  %v1954_v11 = vsub.f32 %v1916_v36, %v5993_v35 }
 0x26a   :  { %v5999_v58 = vpop.eup %4228  ;;  %v6009_v32 = vadd.f32 %v2299_v29, %v2298_v1  ;;  %v2323_v30 = vrot.slane %v2322_v20, 1  ;;  %v2347_v14 = vrot.slane %v2346_v45, 1  ;;  %v2723_v59 = vrot.slane %v2668_v53, 4 }
 0x26b   :  { %8272 = vst [vmem:[#allocation145_spill] sm:$0xff] %v5999_v58  ;;  %v6005_v15 = vpop.eup %4230  ;;  %v1961_v6 = vmul.f32 1.442695, %v1938_v51  ;;  %v1969_v26 = vmul.f32 1.442695, %v1942_v19  ;;  %v1950_v22 = vsub.f32 %v1912_v4, %v5993_v35  ;;  %v2680_v47 = vmul.f32 %v4501_v44, %v5370_v0 }
 0x26c   :  { %8273 = vst [vmem:[#allocation146_spill] sm:$0xff] %v6005_v15  ;;  %v6011_v46 = vpop.eup %4232  ;;  %v2324_v60 = vadd.f32 %v2323_v30, %v2322_v20  ;;  %v2348_v1 = vadd.f32 %v2347_v14, %v2346_v45  ;;  %v2356_v29 = vmax.f32 %v6003_v31, 0.0  ;;  %v1977_v39 = vmul.f32 1.442695, %v1946_v34 }
 0x26d   :  { %8274 = vst [vmem:[#allocation147_spill] sm:$0xff] %v6011_v46  ;;  %4234 = vpow2.f32 %v1961_v6  ;;  %v2360_v51 = vmax.f32 %v6009_v32, 0.0  ;;  %v2700_v19 = vadd.f32 %v2699_v8, %v2664_v3  ;;  %v8275_v9 = vmax.f32 %v5984_v41, 0.0  ;;  %v4502_v6 = vld [vmem:[%s7760_s1 + $0x68] sm:$0xff]  ;;  %v6030_v46 = vpop.f32.mrb[2].mxu1 }
 0x26e   :  { %4236 = vpow2.f32 %v1969_v26  ;;  %v2364_v25 = vmax.f32 %v2324_v60, 0.0  ;;  %v2724_v20 = vadd.f32 %v2723_v59, %v2668_v53  ;;  %v2747_v44 = vrot.slane %v2672_v42, 4 }
 0x26f   :  { %v2379_v4 = vmax.f32 %v8275_v9, %v2356_v29  ;;  %v2701_v30 = vrot.slane %v2700_v19, 2  ;;  %v2771_v35 = vrot.slane %v2676_v61, 4  ;;  %v2795_v24 = vrot.slane %v2680_v47, 4 }
 0x270   :  { %v2368_v15 = vmax.f32 %v2348_v1, 0.0  ;;  %v2725_v14 = vrot.slane %v2724_v20, 2  ;;  %v3116_v45 = vmul.f32 %v4502_v6, %v5729_v38  ;;  %v2748_v26 = vadd.f32 %v2747_v44, %v2672_v42 }
 0x271   :  { %v2381_v36 = vmax.f32 %v2379_v4, %v2360_v51  ;;  %v2702_v3 = vadd.f32 %v2701_v30, %v2700_v19  ;;  %v2772_v31 = vadd.f32 %v2771_v35, %v2676_v61  ;;  %v2796_v8 = vadd.f32 %v2795_v24, %v2680_v47 }
 0x272   :  { %v6026_v34 = vmul.f32 1.442695, %v1950_v22  ;;  %v6028_v53 = vmul.f32 1.442695, %v1954_v11  ;;  %v2726_v59 = vadd.f32 %v2725_v14, %v2724_v20  ;;  %v2749_v60 = vrot.slane %v2748_v26, 2 }
 0x273   :  { %v2383_v32 = vmax.f32 %v2381_v36, %v2364_v25  ;;  %v2703_v9 = vrot.slane %v2702_v3, 1  ;;  %v2773_v1 = vrot.slane %v2772_v31, 2  ;;  %v2797_v4 = vrot.slane %v2796_v8, 2 }
 0x274   :  { %8276 = vst [vmem:[#allocation148_spill] sm:$0xff] %v6028_v53  ;;  %v2727_v49 = vrot.slane %v2726_v59, 1  ;;  %v3120_v12 = vmul.f32 %v4502_v6, %v5765_v40  ;;  %v3151_v19 = vrot.slane %v3116_v45, 4  ;;  %4238 = vpow2.f32 %v1977_v39 }
 0x275   :  { %v2385_v58 = vmax.f32 %v2383_v32, %v2368_v15  ;;  %v2750_v35 = vadd.f32 %v2749_v60, %v2748_v26  ;;  %v2774_v47 = vadd.f32 %v2773_v1, %v2772_v31  ;;  %v2798_v42 = vadd.f32 %v2797_v4, %v2796_v8 }
 0x276   :  { %v6036_v11 = vadd.f32 %v2703_v9, %v2702_v3  ;;  %v6038_v22 = vadd.f32 %v2727_v49, %v2726_v59  ;;  %v3124_v24 = vmul.f32 %v4502_v6, %v5778_v2  ;;  %v3152_v14 = vadd.f32 %v3151_v19, %v3116_v45  ;;  %v6050_v3 = vpop.f32.mrb[3].mxu0 }
 0x277   :  { %v6034_v61 = vmax.f32 %v5438_v55, %v2385_v58  ;;  %v6041_v36 = vpop.eup %4234  ;;  %v2751_v20 = vrot.slane %v2750_v35, 1  ;;  %v2775_v30 = vrot.slane %v2774_v47, 1  ;;  %v2799_v44 = vrot.slane %v2798_v42, 1 }
 0x278   :  { %v6043_v32 = vpop.eup %4236  ;;  %v8278_v39 = vmax.f32 %v5984_v41, 0.0  ;;  %v3175_v49 = vrot.slane %v3120_v12, 4  ;;  %v3128_v1 = vmul.f32 %v4502_v6, %v5783_v33  ;;  %v3132_v41 = vmul.f32 %v4502_v6, %v5370_v0 }
 0x279   :  { %8277 = vst [vmem:[#allocation149_spill] sm:$0xff] %v6034_v61  ;;  %v2394_v55 = vsub.f32 %v2356_v29, %v6034_v61  ;;  %v2398_v58 = vsub.f32 %v2360_v51, %v6034_v61  ;;  %v2402_v31 = vsub.f32 %v2364_v25, %v6034_v61  ;;  %v2406_v8 = vsub.f32 %v2368_v15, %v6034_v61 }
 0x27a   :  { %v2390_v26 = vsub.f32 %v8278_v39, %v6034_v61  ;;  %v2752_v59 = vadd.f32 %v2751_v20, %v2750_v35  ;;  %v2776_v9 = vadd.f32 %v2775_v30, %v2774_v47  ;;  %v2800_v29 = vadd.f32 %v2799_v44, %v2798_v42 }
 0x27b   :  { %v2421_v4 = vmul.f32 1.442695, %v2394_v55  ;;  %v2804_v51 = vmax.f32 %v6036_v11, 0.0  ;;  %v2808_v19 = vmax.f32 %v6038_v22, 0.0  ;;  %v2429_v25 = vmul.f32 1.442695, %v2398_v58 }
 0x27c   :  { %v2413_v60 = vmul.f32 1.442695, %v2390_v26  ;;  %v6060_v53 = vmul.f32 1.442695, %v2402_v31  ;;  %v2812_v15 = vmax.f32 %v2752_v59, 0.0  ;;  %v2816_v35 = vmax.f32 %v2776_v9, 0.0 }
 0x27d   :  { %v2831_v47 = vmax.f32 %v2804_v51, %v2808_v19  ;;  %v3153_v20 = vrot.slane %v3152_v14, 2  ;;  %v3176_v30 = vadd.f32 %v3175_v49, %v3120_v12  ;;  %v3199_v26 = vrot.slane %v3124_v24, 4  ;;  %v4503_v31 = vld [vmem:[%s7760_s1 + $0x78] sm:$0xff] }
 0x27e   :  { %8279 = vst [vmem:[#allocation150_spill] sm:$0xff] %v6060_v53  ;;  %4240 = vpow2.f32 %v2413_v60  ;;  %v3223_v45 = vrot.slane %v3128_v1, 4  ;;  %v3247_v6 = vrot.slane %v3132_v41, 4  ;;  %v6062_v55 = vpop.eup %4238  ;;  %v2820_v42 = vmax.f32 %v2800_v29, 0.0 }
 0x27f   :  { %8280 = vst [vmem:[#allocation151_spill] sm:$0xff] %v6062_v55  ;;  %v2833_v11 = vmax.f32 %v2831_v47, %v2812_v15  ;;  %v3154_v44 = vadd.f32 %v3153_v20, %v3152_v14  ;;  %v3177_v22 = vrot.slane %v3176_v30, 2  ;;  %v3200_v61 = vadd.f32 %v3199_v26, %v3124_v24 }
 0x280   :  { %v3224_v39 = vadd.f32 %v3223_v45, %v3128_v1  ;;  %v3248_v58 = vadd.f32 %v3247_v6, %v3132_v41  ;;  %v3568_v59 = vmul.f32 %v4503_v31, %v5729_v38  ;;  %v6068_v12 = vmul.f32 1.442695, %v2406_v8 }
 0x281   :  { %v2835_v49 = vmax.f32 %v2833_v11, %v2816_v35  ;;  %v3155_v9 = vrot.slane %v3154_v44, 1  ;;  %v3178_v60 = vadd.f32 %v3177_v22, %v3176_v30  ;;  %v3201_v53 = vrot.slane %v3200_v61, 2 }
 0x282   :  { %8281 = vst [vmem:[#allocation152_spill] sm:$0xff] %v6068_v12  ;;  %v3225_v55 = vrot.slane %v3224_v39, 2  ;;  %v3249_v29 = vrot.slane %v3248_v58, 2  ;;  %v3572_v14 = vmul.f32 %v4503_v31, %v5765_v40  ;;  %4242 = vpow2.f32 %v2421_v4 }
 0x283   :  { %v2837_v24 = vmax.f32 %v2835_v49, %v2820_v42  ;;  %v6071_v45 = vadd.f32 %v3155_v9, %v3154_v44  ;;  %v3179_v1 = vrot.slane %v3178_v60, 1  ;;  %v3202_v41 = vadd.f32 %v3201_v53, %v3200_v61 }
 0x284   :  { %v3226_v47 = vadd.f32 %v3225_v55, %v3224_v39  ;;  %v3250_v20 = vadd.f32 %v3249_v29, %v3248_v58  ;;  %v3603_v26 = vrot.slane %v3568_v59, 4  ;;  %v3576_v6 = vmul.f32 %v4503_v31, %v5778_v2 }
 0x285   :  { %v6074_v38 = vmax.f32 %v5477_v62, %v2837_v24  ;;  %v6076_v8 = vadd.f32 %v3179_v1, %v3178_v60  ;;  %v7986_v30 = vmax.f32 %v6071_v45, 0.0  ;;  %v3203_v11 = vrot.slane %v3202_v41, 1 }
 0x286   :  { %v3227_v40 = vrot.slane %v3226_v47, 1  ;;  %v3251_v4 = vrot.slane %v3250_v20, 1  ;;  %v3627_v22 = vrot.slane %v3572_v14, 4  ;;  %v3604_v39 = vadd.f32 %v3603_v26, %v3568_v59 }
 0x287   :  { %v2842_v44 = vsub.f32 %v2804_v51, %v6074_v38  ;;  %v2846_v53 = vsub.f32 %v2808_v19, %v6074_v38  ;;  %v2850_v61 = vsub.f32 %v2812_v15, %v6074_v38  ;;  %v2854_v62 = vsub.f32 %v2816_v35, %v6074_v38 }
 0x288   :  { %v6083_v55 = vpop.eup %4240  ;;  %v2858_v58 = vsub.f32 %v2820_v42, %v6074_v38  ;;  %v3204_v49 = vadd.f32 %v3203_v11, %v3202_v41  ;;  %v3228_v9 = vadd.f32 %v3227_v40, %v3226_v47  ;;  %4244 = vpow2.f32 %v2429_v25 }
 0x289   :  { %8282 = vst [vmem:[#allocation153_spill] sm:$0xff] %v6083_v55  ;;  %v2865_v2 = vmul.f32 1.442695, %v2842_v44  ;;  %v3580_v60 = vmul.f32 %v4503_v31, %v5783_v33  ;;  %v3584_v29 = vmul.f32 %v4503_v31, %v5370_v0  ;;  %v2873_v51 = vmul.f32 1.442695, %v2846_v53 }
 0x28a   :  { %v3252_v24 = vadd.f32 %v3251_v4, %v3250_v20  ;;  %v3260_v19 = vmax.f32 %v6076_v8, 0.0  ;;  %v3264_v15 = vmax.f32 %v3204_v49, 0.0  ;;  %v2881_v1 = vmul.f32 1.442695, %v2850_v61 }
 0x28b   :  { %v6091_v26 = vmul.f32 1.442695, %v2854_v62  ;;  %v3605_v35 = vrot.slane %v3604_v39, 2  ;;  %v3268_v42 = vmax.f32 %v3228_v9, 0.0  ;;  %v3628_v41 = vadd.f32 %v3627_v22, %v3572_v14  ;;  %v8284_v62 = vld [vmem:[#allocation7_spill] sm:$0xff] }
 0x28c   :  { %v3283_v25 = vmax.f32 %v7986_v30, %v3260_v19  ;;  %v3651_v47 = vrot.slane %v3576_v6, 4  ;;  %v6095_v33 = vpop.eup %4242  ;;  %4246 = vpow2.f32 %v2865_v2  ;;  %v3675_v31 = vrot.slane %v3580_v60, 4 }
 0x28d   :  { %8283 = vst [vmem:[#allocation154_spill] sm:$0xff] %v6095_v33  ;;  %v3606_v0 = vadd.f32 %v3605_v35, %v3604_v39  ;;  %v3699_v20 = vrot.slane %v3584_v29, 4  ;;  %v3272_v8 = vmax.f32 %v3252_v24, 0.0  ;;  %v3629_v40 = vrot.slane %v3628_v41, 2 }
 0x28e   :  { %v3285_v11 = vmax.f32 %v3283_v25, %v3264_v15  ;;  %v3652_v4 = vadd.f32 %v3651_v47, %v3576_v6  ;;  %v3676_v53 = vadd.f32 %v3675_v31, %v3580_v60  ;;  %v8285_v49 = vmax.f32 %v8284_v62, 0.0 }
 0x28f   :  { %v3607_v44 = vrot.slane %v3606_v0, 1  ;;  %v3700_v61 = vadd.f32 %v3699_v20, %v3584_v29  ;;  %v6100_v59 = vmul.f32 1.442695, %v2858_v58  ;;  %v3630_v22 = vadd.f32 %v3629_v40, %v3628_v41  ;;  %v8289_v20 = vld [vmem:[#allocation8_spill] sm:$0xff] }
 0x290   :  { %v571_v9 = vsub.f32 %v8285_v49, %v5514_v43  ;;  %v3287_v14 = vmax.f32 %v3285_v11, %v3268_v42  ;;  %v3653_v30 = vrot.slane %v3652_v4, 2  ;;  %4248 = vpow2.f32 %v2873_v51 }
 0x291   :  { %8286 = vst [vmem:[#allocation7_spill] sm:$0xff] %v6100_v59  ;;  %v6102_v39 = vadd.f32 %v3607_v44, %v3606_v0  ;;  %v3677_v2 = vrot.slane %v3676_v53, 2  ;;  %v3701_v24 = vrot.slane %v3700_v61, 2  ;;  %v3631_v25 = vrot.slane %v3630_v22, 1  ;;  %v8291_v44 = vld [vmem:[#allocation11_spill] sm:$0xff] }
 0x292   :  { %v3289_v35 = vmax.f32 %v3287_v14, %v3272_v8  ;;  %v3654_v6 = vadd.f32 %v3653_v30, %v3652_v4  ;;  %v8287_v60 = vmax.f32 %v5256_v23, 0.0  ;;  %v6107_v47 = vpop.eup %4244  ;;  %v8290_v41 = vmax.f32 %v8289_v20, 0.0  ;;  %v8293_v23 = vld [vmem:[#allocation12_spill] sm:$0xff] }
 0x293   :  { %8288 = vst [vmem:[#allocation155_spill] sm:$0xff] %v6107_v47  ;;  %v3678_v31 = vadd.f32 %v3677_v2, %v3676_v53  ;;  %v3702_v58 = vadd.f32 %v3701_v24, %v3700_v61  ;;  %v591_v51 = vmul.f32 1.442695, %v571_v9  ;;  %v8292_v30 = vmax.f32 %v8291_v44, 0.0 }
 0x294   :  { %v587_v29 = vsub.f32 %v8287_v60, %v5514_v43  ;;  %v575_v11 = vsub.f32 %v8290_v41, %v5514_v43  ;;  %v6113_v0 = vmax.f32 %v5540_v28, %v3289_v35  ;;  %v3655_v40 = vrot.slane %v3654_v6, 1 }
 0x295   :  { %v579_v4 = vsub.f32 %v8292_v30, %v5514_v43  ;;  %v8294_v62 = vmax.f32 %v8293_v23, 0.0  ;;  %v6121_v14 = vadd.f32 %v3631_v25, %v3630_v22  ;;  %v3679_v53 = vrot.slane %v3678_v31, 1 }
 0x296   :  { %v3703_v61 = vrot.slane %v3702_v58, 1  ;;  %4250 = vpow2.f32 %v591_v51  ;;  %v8295_v9 = vmax.f32 %v6071_v45, 0.0  ;;  %v3298_v28 = vsub.f32 %v3260_v19, %v6113_v0  ;;  %v6129_v60 = vpop.eup %4246 }
 0x297   :  { %v583_v49 = vsub.f32 %v8294_v62, %v5514_v43  ;;  %v3302_v24 = vsub.f32 %v3264_v15, %v6113_v0  ;;  %v7987_v35 = vmax.f32 %v6102_v39, 0.0  ;;  %8296 = vst [vmem:[#allocation8_spill] sm:$0xff] %v6129_v60  ;;  %v3306_v20 = vsub.f32 %v3268_v42, %v6113_v0 }
 0x298   :  { %v3294_v2 = vsub.f32 %v8295_v9, %v6113_v0  ;;  %v3310_v43 = vsub.f32 %v3272_v8, %v6113_v0  ;;  %v6133_v22 = vadd.f32 %v3655_v40, %v3654_v6  ;;  %v6135_v25 = vadd.f32 %v3679_v53, %v3678_v31  ;;  %v8300_v53 = vld [vmem:[#allocation6_spill] sm:$0xff] }
 0x299   :  { %v3325_v51 = vmul.f32 1.442695, %v3298_v28  ;;  %v3333_v45 = vmul.f32 1.442695, %v3302_v24  ;;  %v6137_v44 = vadd.f32 %v3703_v61, %v3702_v58  ;;  %4252 = vpow2.f32 %v2881_v1  ;;  %v8301_v61 = vld [vmem:[#allocation9_spill] sm:$0xff]  ;;  %v6160_v28 = vld [vmem:[%s7759_s0 + $0x30] sm:$0xff] }
 0x29a   :  { %v3317_v41 = vmul.f32 1.442695, %v3294_v2  ;;  %v3712_v19 = vmax.f32 %v6121_v14, 0.0  ;;  %v3716_v15 = vmax.f32 %v6133_v22, 0.0  ;;  %v599_v30 = vmul.f32 1.442695, %v575_v11  ;;  %v6144_v6 = vpop.eup %4248 }
 0x29b   :  { %v6142_v42 = vmul.f32 1.442695, %v3306_v20  ;;  %v607_v8 = vmul.f32 1.442695, %v579_v4  ;;  %8298 = vst [vmem:[#allocation12_spill] sm:$0xff] %v6144_v6  ;;  %v3720_v31 = vmax.f32 %v6135_v25, 0.0  ;;  %v722_v4 = vrot.slane %v5558_v18, %v8300_v53 }
 0x29c   :  { %4254 = vpow2.f32 %v3317_v41  ;;  %v3735_v58 = vmax.f32 %v7987_v35, %v3712_v19  ;;  %v615_v1 = vmul.f32 1.442695, %v583_v49  ;;  %v6149_v40 = vmul.f32 1.442695, %v3310_v43  ;;  %v6173_v22 = vld [vmem:[%s7759_s0 + $0x10] sm:$0xff]  ;;  %v8332_v18 = vld [vmem:[#allocation69_spill] sm:$0xff] }
 0x29d   :  { %8297 = vst [vmem:[#allocation11_spill] sm:$0xff] %v6142_v42  ;;  %4256 = vpow2.f32 %v3325_v51  ;;  %v3724_v11 = vmax.f32 %v6137_v44, 0.0  ;;  %v623_v62 = vmul.f32 1.442695, %v587_v29  ;;  %v8302_v9 = vmax.f32 %v8301_v61, 0.0  ;;  %v6178_v25 = vld [vmem:[%s7759_s0 + $0x70] sm:$0xff] }
 0x29e   :  { %4258 = vpow2.f32 %v3333_v45  ;;  %8299 = vst [vmem:[#allocation156_spill] sm:$0xff] %v6149_v40  ;;  %v3737_v14 = vmax.f32 %v3735_v58, %v3716_v15  ;;  %v738_v49 = vrot.slane %v5570_v50, %v8300_v53  ;;  %v754_v29 = vrot.slane %v5578_v7, %v8300_v53  ;;  %v6183_v41 = vld [vmem:[%s7759_s0 + $0xb0] sm:$0xff] }
 0x29f   :  { %4260 = vpow2.f32 %v599_v30  ;;  %v1031_v2 = vsub.f32 %v8302_v9, %v5549_v56  ;;  %v770_v24 = vrot.slane %v5584_v48, %v8300_v53  ;;  %v8304_v51 = vld [vmem:[#allocation10_spill] sm:$0xff]  ;;  %v8306_v30 = vld [vmem:[#allocation13_spill] sm:$0xff]  ;;  %v8310_v35 = vmax.f32 %v5258_v21, 0.0 }
 0x2a0   :  { %4262 = vpow2.f32 %v607_v8  ;;  %v6168_v20 = vpop.eup %4250  ;;  %v3739_v43 = vmax.f32 %v3737_v14, %v3720_v31  ;;  %v8305_v45 = vmax.f32 %v8304_v51, 0.0  ;;  %v8307_v8 = vmax.f32 %v8306_v30, 0.0  ;;  %v8308_v61 = vld [vmem:[#allocation14_spill] sm:$0xff] }
 0x2a1   :  { %8303 = vst [vmem:[#allocation6_spill] sm:$0xff] %v6168_v20  ;;  %4264 = vpow2.f32 %v615_v1  ;;  %v714_v14 = vrot.slane %v6168_v20, %v8300_v53  ;;  %v8309_v9 = vmax.f32 %v8308_v61, 0.0  ;;  %v1047_v1 = vsub.f32 %v8310_v35, %v5549_v56  ;;  %v6213_v21 = vld [vmem:[%s7759_s0 + $0xf0] sm:$0xff] }
 0x2a2   :  { %v1035_v44 = vsub.f32 %v8305_v45, %v5549_v56  ;;  %v1039_v58 = vsub.f32 %v8307_v8, %v5549_v56  ;;  %4266 = vpow2.f32 %v623_v62  ;;  %v3741_v48 = vmax.f32 %v3739_v43, %v3724_v11 }
 0x2a3   :  { %v1043_v23 = vsub.f32 %v8309_v9, %v5549_v56  ;;  %v793_v51 = vmul.f32 %v722_v4, %v6160_v28  ;;  %v1051_v45 = vmul.f32 1.442695, %v1031_v2  ;;  %v791_v30 = vmul.f32 %v714_v14, %v6173_v22  ;;  %v6205_v59 = vpop.eup %4252 }
 0x2a4   :  { %v1059_v7 = vmul.f32 1.442695, %v1035_v44  ;;  %v797_v62 = vmul.f32 %v738_v49, %v6178_v25  ;;  %v6203_v8 = vmul.f32 %v754_v29, %v6183_v41  ;;  %v1067_v40 = vmul.f32 1.442695, %v1039_v58  ;;  %8311 = vst [vmem:[#allocation9_spill] sm:$0xff] %v6205_v59 }
 0x2a5   :  { %v6208_v61 = vmax.f32 %v5544_v5, %v3741_v48  ;;  %4268 = vpow2.f32 %v1051_v45  ;;  %v1075_v56 = vmul.f32 1.442695, %v1043_v23  ;;  %v1083_v35 = vmul.f32 1.442695, %v1047_v1 }
 0x2a6   :  { %v6215_v4 = vpop.eup %4254  ;;  %4270 = vpow2.f32 %v1059_v7  ;;  %v1174_v2 = vrot.slane %v5597_v10, %v8300_v53  ;;  %v1190_v49 = vrot.slane %v5600_v16, %v8300_v53  ;;  %v1206_v5 = vrot.slane %v5611_v13, %v8300_v53 }
 0x2a7   :  { %8312 = vst [vmem:[#allocation10_spill] sm:$0xff] %v6208_v61  ;;  %8313 = vst [vmem:[#allocation13_spill] sm:$0xff] %v6215_v4  ;;  %v6223_v48 = vpop.eup %4256  ;;  %v8315_v29 = vmax.f32 %v6102_v39, 0.0  ;;  %v3750_v23 = vsub.f32 %v3712_v19, %v6208_v61  ;;  %v3754_v44 = vsub.f32 %v3716_v15, %v6208_v61  ;;  %v3758_v7 = vsub.f32 %v3720_v31, %v6208_v61  ;;  %v6242_v19 = vld [vmem:[%s7759_s0 + $0x50] sm:$0xff] }
 0x2a8   :  { %8314 = vst [vmem:[#allocation14_spill] sm:$0xff] %v6223_v48  ;;  %v6231_v58 = vpop.eup %4258  ;;  %v3762_v14 = vsub.f32 %v3724_v11, %v6208_v61  ;;  %v6235_v9 = vmul.f32 %v770_v24, %v6213_v21  ;;  %v811_v1 = vadd.f32 %v793_v51, %v791_v30  ;;  %4272 = vpow2.f32 %v1067_v40  ;;  %v8318_v15 = vld [vmem:[#allocation94_spill] sm:$0xff] }
 0x2a9   :  { %v3746_v43 = vsub.f32 %v8315_v29, %v6208_v61  ;;  %8316 = vst [vmem:[#allocation157_spill] sm:$0xff] %v6231_v58  ;;  %v6237_v45 = vpop.eup %4260  ;;  %v3777_v39 = vmul.f32 1.442695, %v3750_v23  ;;  %4274 = vpow2.f32 %v1075_v56  ;;  %v1222_v31 = vrot.slane %v8318_v15, %v8300_v53  ;;  %v8322_v23 = vld [vmem:[#allocation90_spill] sm:$0xff]  ;;  %v8323_v15 = vld [vmem:[#allocation15_spill] sm:$0xff] }
 0x2aa   :  { %8317 = vst [vmem:[#allocation158_spill] sm:$0xff] %v6237_v45  ;;  %v6246_v29 = vpop.eup %4262  ;;  %v3785_v11 = vmul.f32 1.442695, %v3754_v44  ;;  %v730_v24 = vrot.slane %v6237_v45, %v8300_v53  ;;  %4276 = vpow2.f32 %v1083_v35  ;;  %v1245_v40 = vmul.f32 %v1174_v2, %v6160_v28 }
 0x2ab   :  { %v3769_v13 = vmul.f32 1.442695, %v3746_v43  ;;  %8319 = vst [vmem:[#allocation159_spill] sm:$0xff] %v6246_v29  ;;  %v6251_v51 = vpop.eup %4264  ;;  %v6253_v30 = vmul.f32 1.442695, %v3758_v7  ;;  %v6256_v43 = vmul.f32 %v1190_v49, %v6178_v25  ;;  %v6259_v56 = vmul.f32 %v1206_v5, %v6183_v41  ;;  %v8326_v7 = vld [vmem:[#allocation16_spill] sm:$0xff] }
 0x2ac   :  { %8320 = vst [vmem:[#allocation160_spill] sm:$0xff] %v6251_v51  ;;  %v8324_v16 = vmax.f32 %v8323_v15, 0.0  ;;  %v6264_v10 = vpop.eup %4266  ;;  %v746_v35 = vrot.slane %v6246_v29, %v8300_v53  ;;  %v795_v2 = vmul.f32 %v730_v24, %v6242_v19  ;;  %v8327_v12 = vmax.f32 %v8326_v7, 0.0  ;;  %v6275_v5 = vld [vmem:[%s7759_s0 + $0x90] sm:$0xff]  ;;  %v8328_v15 = vld [vmem:[#allocation17_spill] sm:$0xff] }
 0x2ad   :  { %8321 = vst [vmem:[#allocation161_spill] sm:$0xff] %v6253_v30  ;;  %8325 = vst [vmem:[#allocation90_spill] sm:$0xff] %v6264_v10  ;;  %4278 = vpow2.f32 %v3769_v13  ;;  %v778_v13 = vrot.slane %v6264_v10, %v8300_v53  ;;  %v8329_v29 = vmax.f32 %v8328_v15, 0.0  ;;  %v8333_v20 = vmax.f32 %v8332_v18, 0.0 }
 0x2ae   :  { %v1483_v44 = vsub.f32 %v8324_v16, %v8322_v23  ;;  %v1487_v49 = vsub.f32 %v8327_v12, %v8322_v23  ;;  %4280 = vpow2.f32 %v3777_v39  ;;  %v762_v16 = vrot.slane %v6251_v51, %v8300_v53  ;;  %v8330_v12 = vld [vmem:[#allocation18_spill] sm:$0xff] }
 0x2af   :  { %v1491_v24 = vsub.f32 %v8329_v29, %v8322_v23  ;;  %4282 = vpow2.f32 %v3785_v11  ;;  %v812_v50 = vadd.f32 %v811_v1, %v795_v2  ;;  %v8331_v39 = vmax.f32 %v8330_v12, 0.0  ;;  %v6290_v30 = vpop.eup %4268  ;;  %v6298_v1 = vld [vmem:[%s7759_s0 + $0xd0] sm:$0xff] }
 0x2b0   :  { %v1499_v45 = vsub.f32 %v8333_v20, %v8322_v23  ;;  %8334 = vst [vmem:[#allocation15_spill] sm:$0xff] %v6290_v30  ;;  %v807_v51 = vmul.f32 %v778_v13, %v5830_v37  ;;  %v1503_v61 = vmul.f32 1.442695, %v1483_v44  ;;  %v1511_v10 = vmul.f32 1.442695, %v1487_v49  ;;  %v6293_v48 = vpop.eup %4270 }
 0x2b1   :  { %v1495_v7 = vsub.f32 %v8331_v39, %v8322_v23  ;;  %v1519_v58 = vmul.f32 1.442695, %v1491_v24  ;;  %8335 = vst [vmem:[#allocation16_spill] sm:$0xff] %v6293_v48  ;;  %v799_v29 = vmul.f32 %v746_v35, %v6275_v5  ;;  %v813_v11 = vadd.f32 %v812_v50, %v797_v62 }
 0x2b2   :  { %v1166_v18 = vrot.slane %v6290_v30, %v8300_v53  ;;  %v6303_v23 = vmul.f32 1.442695, %v3762_v14  ;;  %v1182_v44 = vrot.slane %v6293_v48, %v8300_v53  ;;  %4284 = vpow2.f32 %v1503_v61  ;;  %v6307_v49 = vpop.eup %4272  ;;  %v8339_v61 = vld [vmem:[#allocation96_spill] sm:$0xff]  ;;  %v8354_v30 = vld [vmem:[#allocation22_spill] sm:$0xff] }
 0x2b3   :  { %v1527_v20 = vmul.f32 1.442695, %v1495_v7  ;;  %v1535_v2 = vmul.f32 1.442695, %v1499_v45  ;;  %8337 = vst [vmem:[#allocation18_spill] sm:$0xff] %v6307_v49  ;;  %v814_v13 = vadd.f32 %v813_v11, %v799_v29  ;;  %v6311_v24 = vmul.f32 %v1222_v31, %v6213_v21  ;;  %v6313_v50 = vpop.eup %4274 }
 0x2b4   :  { %8336 = vst [vmem:[#allocation17_spill] sm:$0xff] %v6303_v23  ;;  %v1243_v15 = vmul.f32 %v1166_v18, %v6173_v22  ;;  %4286 = vpow2.f32 %v1511_v10  ;;  %8338 = vst [vmem:[#allocation69_spill] sm:$0xff] %v6313_v50  ;;  %v803_v62 = vmul.f32 %v762_v16, %v6298_v1  ;;  %v1198_v14 = vrot.slane %v6307_v49, %v8300_v53  ;;  %v6320_v35 = vpop.eup %4276  ;;  %v8356_v23 = vld [vmem:[#allocation70_spill] sm:$0xff] }
 0x2b5   :  { %4288 = vpow2.f32 %v1519_v58  ;;  %v1626_v45 = vrot.slane %v8339_v61, %v8300_v53  ;;  %8340 = vst [vmem:[#allocation162_spill] sm:$0xff] %v6320_v35  ;;  %v815_v12 = vadd.f32 %v814_v13, %v6203_v8  ;;  %v1247_v39 = vmul.f32 %v1182_v44, %v6242_v19  ;;  %v8341_v58 = vld [vmem:[#allocation97_spill] sm:$0xff]  ;;  %v8343_v8 = vld [vmem:[#allocation99_spill] sm:$0xff] }
 0x2b6   :  { %v1263_v31 = vadd.f32 %v1245_v40, %v1243_v15  ;;  %4290 = vpow2.f32 %v1527_v20  ;;  %v1214_v10 = vrot.slane %v6313_v50, %v8300_v53  ;;  %v1230_v16 = vrot.slane %v6320_v35, %v8300_v53  ;;  %v8344_v40 = vld [vmem:[#allocation101_spill] sm:$0xff]  ;;  %v8346_v35 = vld [vmem:[#allocation98_spill] sm:$0xff] }
 0x2b7   :  { %4292 = vpow2.f32 %v1535_v2  ;;  %v1642_v7 = vrot.slane %v8341_v58, %v8300_v53  ;;  %v6330_v29 = vpop.eup %4278  ;;  %v816_v11 = vadd.f32 %v815_v12, %v803_v62  ;;  %v1658_v13 = vrot.slane %v8343_v8, %v8300_v53  ;;  %v8347_v58 = vld [vmem:[#allocation19_spill] sm:$0xff] }
 0x2b8   :  { %8342 = vst [vmem:[#allocation163_spill] sm:$0xff] %v6330_v29  ;;  %v1264_v18 = vadd.f32 %v1263_v31, %v1247_v39  ;;  %v1674_v20 = vrot.slane %v8344_v40, %v8300_v53  ;;  %v6336_v44 = vpop.eup %4280  ;;  %v1251_v15 = vmul.f32 %v1198_v14, %v6275_v5  ;;  %v1259_v61 = vmul.f32 %v1230_v16, %v5830_v37  ;;  %v8350_v31 = vld [vmem:[#allocation20_spill] sm:$0xff]  ;;  %v8352_v14 = vld [vmem:[#allocation21_spill] sm:$0xff] }
 0x2b9   :  { %8345 = vst [vmem:[#allocation164_spill] sm:$0xff] %v6336_v44  ;;  %v1697_v2 = vmul.f32 %v1626_v45, %v6160_v28  ;;  %v8348_v50 = vmax.f32 %v8347_v58, 0.0  ;;  %v6344_v62 = vpop.eup %4282  ;;  %v817_v12 = vadd.f32 %v816_v11, %v6235_v9  ;;  %v8351_v8 = vmax.f32 %v8350_v31, 0.0 }
 0x2ba   :  { %8349 = vst [vmem:[#allocation98_spill] sm:$0xff] %v6344_v62  ;;  %v1265_v39 = vadd.f32 %v1264_v18, %v6256_v43  ;;  %v8353_v48 = vmax.f32 %v8352_v14, 0.0  ;;  %v1255_v45 = vmul.f32 %v1214_v10, %v6298_v1  ;;  %v8355_v58 = vmax.f32 %v8354_v30, 0.0 }
 0x2bb   :  { %v1935_v49 = vsub.f32 %v8348_v50, %v8346_v35  ;;  %v1939_v40 = vsub.f32 %v8351_v8, %v8346_v35  ;;  %v8357_v62 = vmax.f32 %v8356_v23, 0.0  ;;  %v6361_v43 = vadd.f32 %v817_v12, %v807_v51 }
 0x2bc   :  { %v1943_v16 = vsub.f32 %v8353_v48, %v8346_v35  ;;  %v1947_v50 = vsub.f32 %v8355_v58, %v8346_v35  ;;  %v1266_v18 = vadd.f32 %v1265_v39, %v1251_v15  ;;  %v6363_v44 = vpop.eup %4284  ;;  %v1701_v48 = vmul.f32 %v1642_v7, %v6178_v25 }
 0x2bd   :  { %v1951_v9 = vsub.f32 %v8357_v62, %v8346_v35  ;;  %v1955_v11 = vmul.f32 1.442695, %v1935_v49  ;;  %v1963_v31 = vmul.f32 1.442695, %v1939_v40  ;;  %8358 = vst [vmem:[#allocation19_spill] sm:$0xff] %v6363_v44  ;;  %v1618_v23 = vrot.slane %v6363_v44, %v8300_v53  ;;  %v8361_v40 = vld [vmem:[#allocation104_spill] sm:$0xff] }
 0x2be   :  { %v1971_v8 = vmul.f32 1.442695, %v1943_v16  ;;  %v1979_v10 = vmul.f32 1.442695, %v1947_v50  ;;  %v6366_v29 = vpop.eup %4286  ;;  %v1267_v30 = vadd.f32 %v1266_v18, %v6259_v56  ;;  %v1705_v51 = vmul.f32 %v1658_v13, %v6183_v41  ;;  %v8364_v50 = vld [vmem:[#allocation105_spill] sm:$0xff] }
 0x2bf   :  { %4294 = vpow2.f32 %v1955_v11  ;;  %v1987_v14 = vmul.f32 1.442695, %v1951_v9  ;;  %8359 = vst [vmem:[#allocation20_spill] sm:$0xff] %v6366_v29  ;;  %v6372_v49 = vpop.eup %4288  ;;  %v1634_v35 = vrot.slane %v6366_v29, %v8300_v53  ;;  %v2078_v7 = vrot.slane %v5682_v57, %v8300_v53 }
 0x2c0   :  { %4296 = vpow2.f32 %v1963_v31  ;;  %8360 = vst [vmem:[#allocation21_spill] sm:$0xff] %v6372_v49  ;;  %v2094_v15 = vrot.slane %v8361_v40, %v8300_v53  ;;  %v6380_v62 = vpop.eup %4290  ;;  %v1268_v56 = vadd.f32 %v1267_v30, %v1255_v45  ;;  %v1695_v12 = vmul.f32 %v1618_v23, %v6173_v22  ;;  %v8365_v31 = vld [vmem:[#allocation106_spill] sm:$0xff] }
 0x2c1   :  { %4298 = vpow2.f32 %v1971_v8  ;;  %8362 = vst [vmem:[#allocation22_spill] sm:$0xff] %v6380_v62  ;;  %v1709_v13 = vmul.f32 %v1674_v20, %v6213_v21  ;;  %v6384_v39 = vpop.eup %4292  ;;  %v1650_v16 = vrot.slane %v6372_v49, %v8300_v53  ;;  %v1666_v58 = vrot.slane %v6380_v62, %v8300_v53  ;;  %v8366_v23 = vld [vmem:[#allocation102_spill] sm:$0xff] }
 0x2c2   :  { %4300 = vpow2.f32 %v1979_v10  ;;  %8363 = vst [vmem:[#allocation70_spill] sm:$0xff] %v6384_v39  ;;  %v2110_v9 = vrot.slane %v8364_v50, %v8300_v53  ;;  %v1269_v11 = vadd.f32 %v1268_v56, %v6311_v24  ;;  %v1682_v45 = vrot.slane %v6384_v39, %v8300_v53  ;;  %v8369_v39 = vld [vmem:[#allocation24_spill] sm:$0xff] }
 0x2c3   :  { %4302 = vpow2.f32 %v1987_v14  ;;  %v1699_v20 = vmul.f32 %v1634_v35, %v6242_v19  ;;  %v1715_v18 = vadd.f32 %v1697_v2, %v1695_v12  ;;  %v2126_v8 = vrot.slane %v8365_v31, %v8300_v53  ;;  %v8367_v14 = vld [vmem:[#allocation23_spill] sm:$0xff]  ;;  %v8371_v12 = vld [vmem:[#allocation25_spill] sm:$0xff] }
 0x2c4   :  { %v2149_v10 = vmul.f32 %v2078_v7, %v6160_v28  ;;  %v2153_v30 = vmul.f32 %v2094_v15, %v6178_v25  ;;  %v8368_v40 = vmax.f32 %v8367_v14, 0.0  ;;  %v6403_v50 = vadd.f32 %v1269_v11, %v1259_v61  ;;  %v8373_v7 = vld [vmem:[#allocation26_spill] sm:$0xff]  ;;  %v8375_v14 = vld [vmem:[#allocation71_spill] sm:$0xff] }
 0x2c5   :  { %v1711_v24 = vmul.f32 %v1682_v45, %v5830_v37  ;;  %v1716_v56 = vadd.f32 %v1715_v18, %v1699_v20  ;;  %v8370_v35 = vmax.f32 %v8369_v39, 0.0  ;;  %v8372_v31 = vmax.f32 %v8371_v12, 0.0 }
 0x2c6   :  { %v2387_v57 = vsub.f32 %v8368_v40, %v8366_v23  ;;  %v8374_v15 = vmax.f32 %v8373_v7, 0.0  ;;  %v8376_v40 = vmax.f32 %v8375_v14, 0.0  ;;  %v1703_v45 = vmul.f32 %v1650_v16, %v6275_v5 }
 0x2c7   :  { %v2391_v2 = vsub.f32 %v8370_v35, %v8366_v23  ;;  %v2395_v62 = vsub.f32 %v8372_v31, %v8366_v23  ;;  %v1707_v20 = vmul.f32 %v1666_v58, %v6298_v1  ;;  %v1717_v18 = vadd.f32 %v1716_v56, %v1701_v48 }
 0x2c8   :  { %v2399_v49 = vsub.f32 %v8374_v15, %v8366_v23  ;;  %v2403_v61 = vsub.f32 %v8376_v40, %v8366_v23  ;;  %v2407_v11 = vmul.f32 1.442695, %v2387_v57  ;;  %v2157_v57 = vmul.f32 %v2110_v9, %v6183_v41 }
 0x2c9   :  { %v2415_v39 = vmul.f32 1.442695, %v2391_v2  ;;  %v6420_v35 = vpop.eup %4294  ;;  %v2423_v12 = vmul.f32 1.442695, %v2395_v62  ;;  %v1718_v7 = vadd.f32 %v1717_v18, %v1703_v45  ;;  %v2530_v62 = vrot.slane %v5717_v54, %v8300_v53  ;;  %v8384_v45 = vld [vmem:[#allocation113_spill] sm:$0xff] }
 0x2ca   :  { %8377 = vst [vmem:[#allocation102_spill] sm:$0xff] %v6420_v35  ;;  %4304 = vpow2.f32 %v2407_v11  ;;  %v2431_v31 = vmul.f32 1.442695, %v2399_v49  ;;  %v2439_v29 = vmul.f32 1.442695, %v2403_v61  ;;  %v6422_v44 = vpop.eup %4296  ;;  %v2070_v15 = vrot.slane %v6420_v35, %v8300_v53  ;;  %v8380_v49 = vld [vmem:[#allocation111_spill] sm:$0xff] }
 0x2cb   :  { %8378 = vst [vmem:[#allocation23_spill] sm:$0xff] %v6422_v44  ;;  %4306 = vpow2.f32 %v2415_v39  ;;  %v6427_v16 = vpop.eup %4298  ;;  %v2086_v48 = vrot.slane %v6422_v44, %v8300_v53  ;;  %v2546_v58 = vrot.slane %v8380_v49, %v8300_v53  ;;  %v1719_v56 = vadd.f32 %v1718_v7, %v1705_v51  ;;  %v8383_v61 = vld [vmem:[#allocation112_spill] sm:$0xff]  ;;  %v8386_v49 = vld [vmem:[#allocation27_spill] sm:$0xff] }
 0x2cc   :  { %8379 = vst [vmem:[#allocation24_spill] sm:$0xff] %v6427_v16  ;;  %4308 = vpow2.f32 %v2423_v12  ;;  %v6435_v23 = vpop.eup %4300  ;;  %v2147_v2 = vmul.f32 %v2070_v15, %v6173_v22  ;;  %v2161_v9 = vmul.f32 %v2126_v8, %v6213_v21  ;;  %v2102_v40 = vrot.slane %v6427_v16, %v8300_v53  ;;  %v8385_v15 = vld [vmem:[#allocation108_spill] sm:$0xff] }
 0x2cd   :  { %8381 = vst [vmem:[#allocation25_spill] sm:$0xff] %v6435_v23  ;;  %4310 = vpow2.f32 %v2431_v31  ;;  %v6439_v14 = vpop.eup %4302  ;;  %v2562_v11 = vrot.slane %v8383_v61, %v8300_v53  ;;  %v2578_v18 = vrot.slane %v8384_v45, %v8300_v53  ;;  %v1720_v39 = vadd.f32 %v1719_v56, %v1707_v20  ;;  %v8388_v45 = vld [vmem:[#allocation28_spill] sm:$0xff] }
 0x2ce   :  { %8382 = vst [vmem:[#allocation26_spill] sm:$0xff] %v6439_v14  ;;  %4312 = vpow2.f32 %v2439_v29  ;;  %v2134_v51 = vrot.slane %v6439_v14, %v8300_v53  ;;  %v2151_v12 = vmul.f32 %v2086_v48, %v6242_v19  ;;  %v2167_v8 = vadd.f32 %v2149_v10, %v2147_v2  ;;  %v8390_v10 = vld [vmem:[#allocation29_spill] sm:$0xff]  ;;  %v8394_v35 = vld [vmem:[#allocation72_spill] sm:$0xff] }
 0x2cf   :  { %v2118_v31 = vrot.slane %v6435_v23, %v8300_v53  ;;  %v2601_v7 = vmul.f32 %v2530_v62, %v6160_v28  ;;  %v2605_v29 = vmul.f32 %v2546_v58, %v6178_v25  ;;  %v8387_v61 = vmax.f32 %v8386_v49, 0.0  ;;  %v8392_v62 = vld [vmem:[#allocation30_spill] sm:$0xff] }
 0x2d0   :  { %v1721_v16 = vadd.f32 %v1720_v39, %v1709_v13  ;;  %v2163_v20 = vmul.f32 %v2134_v51, %v5830_v37  ;;  %v2168_v56 = vadd.f32 %v2167_v8, %v2151_v12  ;;  %v8389_v14 = vmax.f32 %v8388_v45, 0.0 }
 0x2d1   :  { %v2839_v54 = vsub.f32 %v8387_v61, %v8385_v15  ;;  %v8391_v2 = vmax.f32 %v8390_v10, 0.0  ;;  %v8393_v44 = vmax.f32 %v8392_v62, 0.0  ;;  %v8395_v49 = vmax.f32 %v8394_v35, 0.0 }
 0x2d2   :  { %v2843_v48 = vsub.f32 %v8389_v14, %v8385_v15  ;;  %v6470_v39 = vadd.f32 %v1721_v16, %v1711_v24  ;;  %v2155_v51 = vmul.f32 %v2102_v40, %v6275_v5  ;;  %v2169_v12 = vadd.f32 %v2168_v56, %v2153_v30  ;;  %v8399_v16 = vld [vmem:[#allocation115_spill] sm:$0xff] }
 0x2d3   :  { %v2847_v23 = vsub.f32 %v8391_v2, %v8385_v15  ;;  %v2851_v58 = vsub.f32 %v8393_v44, %v8385_v15  ;;  %v2855_v61 = vsub.f32 %v8395_v49, %v8385_v15  ;;  %v2859_v13 = vmul.f32 1.442695, %v2839_v54  ;;  %v8402_v49 = vld [vmem:[#allocation116_spill] sm:$0xff] }
 0x2d4   :  { %v2867_v45 = vmul.f32 1.442695, %v2843_v48  ;;  %v6473_v14 = vpop.eup %4304  ;;  %v2159_v44 = vmul.f32 %v2118_v31, %v6298_v1  ;;  %v2170_v62 = vadd.f32 %v2169_v12, %v2155_v51  ;;  %v2609_v35 = vmul.f32 %v2562_v11, %v6183_v41 }
 0x2d5   :  { %8396 = vst [vmem:[#allocation71_spill] sm:$0xff] %v6473_v14  ;;  %4314 = vpow2.f32 %v2859_v13  ;;  %v2875_v8 = vmul.f32 1.442695, %v2847_v23  ;;  %v2883_v10 = vmul.f32 1.442695, %v2851_v58  ;;  %v6475_v42 = vpop.eup %4306  ;;  %v2522_v54 = vrot.slane %v6473_v14, %v8300_v53 }
 0x2d6   :  { %v2891_v2 = vmul.f32 1.442695, %v2855_v61  ;;  %8397 = vst [vmem:[#allocation108_spill] sm:$0xff] %v6475_v42  ;;  %4316 = vpow2.f32 %v2867_v45  ;;  %v6480_v24 = vpop.eup %4308  ;;  %v2538_v30 = vrot.slane %v6475_v42, %v8300_v53  ;;  %v2982_v23 = vrot.slane %v8399_v16, %v8300_v53  ;;  %v8406_v16 = vld [vmem:[#allocation31_spill] sm:$0xff] }
 0x2d7   :  { %8398 = vst [vmem:[#allocation27_spill] sm:$0xff] %v6480_v24  ;;  %4318 = vpow2.f32 %v2875_v8  ;;  %v6487_v40 = vpop.eup %4310  ;;  %v2171_v15 = vadd.f32 %v2170_v62, %v2157_v57  ;;  %v2554_v31 = vrot.slane %v6480_v24, %v8300_v53  ;;  %v2599_v56 = vmul.f32 %v2522_v54, %v6173_v22  ;;  %v8403_v8 = vld [vmem:[#allocation117_spill] sm:$0xff]  ;;  %v8404_v62 = vld [vmem:[#allocation118_spill] sm:$0xff] }
 0x2d8   :  { %8400 = vst [vmem:[#allocation28_spill] sm:$0xff] %v6487_v40  ;;  %4320 = vpow2.f32 %v2883_v10  ;;  %v6492_v48 = vpop.eup %4312  ;;  %v2570_v58 = vrot.slane %v6487_v40, %v8300_v53  ;;  %v2613_v11 = vmul.f32 %v2578_v18, %v6213_v21  ;;  %v2998_v61 = vrot.slane %v8402_v49, %v8300_v53 }
 0x2d9   :  { %8401 = vst [vmem:[#allocation29_spill] sm:$0xff] %v6492_v48  ;;  %4322 = vpow2.f32 %v2891_v2  ;;  %v2172_v13 = vadd.f32 %v2171_v15, %v2159_v44  ;;  %v2586_v57 = vrot.slane %v6492_v48, %v8300_v53  ;;  %v2603_v51 = vmul.f32 %v2538_v30, %v6242_v19  ;;  %v8405_v15 = vld [vmem:[#allocation114_spill] sm:$0xff]  ;;  %v6512_v30 = vpop.f32.mrb[3].mxu1 }
 0x2da   :  { %v2619_v12 = vadd.f32 %v2601_v7, %v2599_v56  ;;  %v2607_v45 = vmul.f32 %v2554_v31, %v6275_v5  ;;  %v3014_v10 = vrot.slane %v8403_v8, %v8300_v53  ;;  %v3030_v54 = vrot.slane %v8404_v62, %v8300_v53  ;;  %8408 = vst [vmem:[#allocation30_spill] sm:$0xff] %v6512_v30  ;;  %v8409_v7 = vld [vmem:[#allocation32_spill] sm:$0xff]  ;;  %v8411_v8 = vld [vmem:[#allocation33_spill] sm:$0xff] }
 0x2db   :  { %v3053_v18 = vmul.f32 %v2982_v23, %v6160_v28  ;;  %v2173_v2 = vadd.f32 %v2172_v13, %v2161_v9  ;;  %v2615_v49 = vmul.f32 %v2586_v57, %v5830_v37  ;;  %v8407_v48 = vmax.f32 %v8406_v16, 0.0  ;;  %v8413_v23 = vld [vmem:[#allocation34_spill] sm:$0xff]  ;;  %v8415_v57 = vld [vmem:[#allocation73_spill] sm:$0xff] }
 0x2dc   :  { %v2620_v44 = vadd.f32 %v2619_v12, %v2603_v51  ;;  %v8410_v31 = vmax.f32 %v8409_v7, 0.0  ;;  %v8412_v24 = vmax.f32 %v8411_v8, 0.0  ;;  %v8414_v9 = vmax.f32 %v8413_v23, 0.0 }
 0x2dd   :  { %v3291_v40 = vsub.f32 %v8407_v48, %v8405_v15  ;;  %v8416_v51 = vmax.f32 %v8415_v57, 0.0  ;;  %v6526_v16 = vadd.f32 %v2173_v2, %v2163_v20  ;;  %v2611_v48 = vmul.f32 %v2570_v58, %v6298_v1  ;;  %v8420_v58 = vld [vmem:[#allocation121_spill] sm:$0xff] }
 0x2de   :  { %v3295_v56 = vsub.f32 %v8410_v31, %v8405_v15  ;;  %v3299_v62 = vsub.f32 %v8412_v24, %v8405_v15  ;;  %v3303_v13 = vsub.f32 %v8414_v9, %v8405_v15  ;;  %v2621_v42 = vadd.f32 %v2620_v44, %v2605_v29 }
 0x2df   :  { %v3307_v12 = vsub.f32 %v8416_v51, %v8405_v15  ;;  %v3311_v14 = vmul.f32 1.442695, %v3291_v40  ;;  %v6529_v7 = vpop.eup %4314  ;;  %v3057_v31 = vmul.f32 %v2998_v61, %v6178_v25  ;;  %v3061_v20 = vmul.f32 %v3014_v10, %v6183_v41 }
 0x2e0   :  { %8417 = vst [vmem:[#allocation72_spill] sm:$0xff] %v6529_v7  ;;  %v3319_v8 = vmul.f32 1.442695, %v3295_v56  ;;  %v3327_v24 = vmul.f32 1.442695, %v3299_v62  ;;  %v6532_v4 = vpop.eup %4316  ;;  %v2622_v23 = vadd.f32 %v2621_v42, %v2607_v45  ;;  %v2974_v9 = vrot.slane %v6529_v7, %v8300_v53  ;;  %v8423_v56 = vld [vmem:[#allocation122_spill] sm:$0xff] }
 0x2e1   :  { %v3335_v30 = vmul.f32 1.442695, %v3303_v13  ;;  %8418 = vst [vmem:[#allocation114_spill] sm:$0xff] %v6532_v4  ;;  %4324 = vpow2.f32 %v3311_v14  ;;  %v6537_v2 = vpop.eup %4318  ;;  %v2990_v29 = vrot.slane %v6532_v4, %v8300_v53  ;;  %v3343_v40 = vmul.f32 1.442695, %v3307_v12 }
 0x2e2   :  { %8419 = vst [vmem:[#allocation31_spill] sm:$0xff] %v6537_v2  ;;  %4326 = vpow2.f32 %v3319_v8  ;;  %v3434_v61 = vrot.slane %v8420_v58, %v8300_v53  ;;  %v6543_v62 = vpop.eup %4320  ;;  %v2623_v44 = vadd.f32 %v2622_v23, %v2609_v35  ;;  %v3006_v42 = vrot.slane %v6537_v2, %v8300_v53  ;;  %v8424_v8 = vld [vmem:[#allocation123_spill] sm:$0xff]  ;;  %v8425_v23 = vld [vmem:[#allocation124_spill] sm:$0xff] }
 0x2e3   :  { %8421 = vst [vmem:[#allocation32_spill] sm:$0xff] %v6543_v62  ;;  %v3051_v45 = vmul.f32 %v2974_v9, %v6173_v22  ;;  %4328 = vpow2.f32 %v3327_v24  ;;  %v6548_v14 = vpop.eup %4322  ;;  %v3022_v10 = vrot.slane %v6543_v62, %v8300_v53  ;;  %v3065_v15 = vmul.f32 %v3030_v54, %v6213_v21 }
 0x2e4   :  { %8422 = vst [vmem:[#allocation33_spill] sm:$0xff] %v6548_v14  ;;  %4330 = vpow2.f32 %v3335_v30  ;;  %v3450_v13 = vrot.slane %v8423_v56, %v8300_v53  ;;  %v2624_v57 = vadd.f32 %v2623_v44, %v2611_v48  ;;  %v3038_v35 = vrot.slane %v6548_v14, %v8300_v53  ;;  %v8426_v56 = vld [vmem:[#allocation120_spill] sm:$0xff]  ;;  %v8427_v14 = vld [vmem:[#allocation35_spill] sm:$0xff] }
 0x2e5   :  { %v3055_v51 = vmul.f32 %v2990_v29, %v6242_v19  ;;  %v3071_v12 = vadd.f32 %v3053_v18, %v3051_v45  ;;  %4332 = vpow2.f32 %v3343_v40  ;;  %v3466_v24 = vrot.slane %v8424_v8, %v8300_v53  ;;  %v8429_v18 = vld [vmem:[#allocation36_spill] sm:$0xff]  ;;  %v8431_v8 = vld [vmem:[#allocation37_spill] sm:$0xff] }
 0x2e6   :  { %v3482_v9 = vrot.slane %v8425_v23, %v8300_v53  ;;  %v3505_v54 = vmul.f32 %v3434_v61, %v6160_v28  ;;  %v2625_v30 = vadd.f32 %v2624_v57, %v2613_v11  ;;  %v3059_v58 = vmul.f32 %v3006_v42, %v6275_v5  ;;  %v8433_v61 = vld [vmem:[#allocation38_spill] sm:$0xff] }
 0x2e7   :  { %v3067_v48 = vmul.f32 %v3038_v35, %v5830_v37  ;;  %v3072_v44 = vadd.f32 %v3071_v12, %v3055_v51  ;;  %v8428_v62 = vmax.f32 %v8427_v14, 0.0  ;;  %v8430_v40 = vmax.f32 %v8429_v18, 0.0  ;;  %v8435_v14 = vld [vmem:[#allocation74_spill] sm:$0xff] }
 0x2e8   :  { %v8432_v2 = vmax.f32 %v8431_v8, 0.0  ;;  %v8434_v11 = vmax.f32 %v8433_v61, 0.0  ;;  %v6577_v42 = vadd.f32 %v2625_v30, %v2615_v49  ;;  %v3063_v35 = vmul.f32 %v3022_v10, %v6298_v1 }
 0x2e9   :  { %v3743_v29 = vsub.f32 %v8428_v62, %v8426_v56  ;;  %v3747_v45 = vsub.f32 %v8430_v40, %v8426_v56  ;;  %v3073_v51 = vadd.f32 %v3072_v44, %v3057_v31  ;;  %v8436_v62 = vmax.f32 %v8435_v14, 0.0 }
 0x2ea   :  { %v3751_v23 = vsub.f32 %v8432_v2, %v8426_v56  ;;  %v3755_v57 = vsub.f32 %v8434_v11, %v8426_v56  ;;  %v3509_v18 = vmul.f32 %v3450_v13, %v6178_v25  ;;  %v3513_v61 = vmul.f32 %v3466_v24, %v6183_v41  ;;  %v8440_v24 = vld [vmem:[#allocation128_spill] sm:$0xff] }
 0x2eb   :  { %v3759_v12 = vsub.f32 %v8436_v62, %v8426_v56  ;;  %v3763_v40 = vmul.f32 1.442695, %v3743_v29  ;;  %v3771_v4 = vmul.f32 1.442695, %v3747_v45  ;;  %v6584_v8 = vpop.eup %4324  ;;  %v3074_v2 = vadd.f32 %v3073_v51, %v3059_v58 }
 0x2ec   :  { %v3779_v7 = vmul.f32 1.442695, %v3751_v23  ;;  %8437 = vst [vmem:[#allocation34_spill] sm:$0xff] %v6584_v8  ;;  %v3787_v11 = vmul.f32 1.442695, %v3755_v57  ;;  %v3886_v49 = vrot.slane %v5887_v52, %v8300_v53  ;;  %v6589_v10 = vpop.eup %4326  ;;  %v3426_v31 = vrot.slane %v6584_v8, %v8300_v53  ;;  %v8442_v57 = vld [vmem:[#allocation129_spill] sm:$0xff] }
 0x2ed   :  { %8438 = vst [vmem:[#allocation73_spill] sm:$0xff] %v6589_v10  ;;  %v6594_v56 = vmul.f32 %v3482_v9, %v6213_v21  ;;  %4334 = vpow2.f32 %v3763_v40  ;;  %v3795_v13 = vmul.f32 1.442695, %v3759_v12  ;;  %v6596_v23 = vpop.eup %4328  ;;  %v3075_v30 = vadd.f32 %v3074_v2, %v3061_v20  ;;  %v8443_v20 = vld [vmem:[#allocation132_spill] sm:$0xff] }
 0x2ee   :  { %8439 = vst [vmem:[#allocation120_spill] sm:$0xff] %v6596_v23  ;;  %v3442_v58 = vrot.slane %v6589_v10, %v8300_v53  ;;  %4336 = vpow2.f32 %v3771_v4  ;;  %v3902_v44 = vrot.slane %v8440_v24, %v8300_v53  ;;  %v6602_v29 = vpop.eup %4330  ;;  %v3458_v45 = vrot.slane %v6596_v23, %v8300_v53 }
 0x2ef   :  { %8441 = vst [vmem:[#allocation35_spill] sm:$0xff] %v6602_v29  ;;  %v3503_v9 = vmul.f32 %v3426_v31, %v6173_v22  ;;  %4338 = vpow2.f32 %v3779_v7  ;;  %v3918_v51 = vrot.slane %v8442_v57, %v8300_v53  ;;  %v3076_v14 = vadd.f32 %v3075_v30, %v3063_v35  ;;  %v6612_v12 = vpop.eup %4332  ;;  %v8447_v57 = vld [vmem:[#allocation100_spill] sm:$0xff] }
 0x2f0   :  { %4340 = vpow2.f32 %v3787_v11  ;;  %v3934_v62 = vrot.slane %v8443_v20, %v8300_v53  ;;  %v3957_v4 = vmul.f32 %v3886_v49, %v6160_v28  ;;  %8444 = vst [vmem:[#allocation36_spill] sm:$0xff] %v6612_v12  ;;  %v3474_v40 = vrot.slane %v6602_v29, %v8300_v53  ;;  %v8445_v11 = vld [vmem:[#allocation88_spill] sm:$0xff]  ;;  %v8446_v28 = vld [vmem:[#allocation95_spill] sm:$0xff] }
 0x2f1   :  { %v3507_v2 = vmul.f32 %v3442_v58, %v6242_v19  ;;  %v3523_v24 = vadd.f32 %v3505_v54, %v3503_v9  ;;  %4342 = vpow2.f32 %v3795_v13  ;;  %v3077_v7 = vadd.f32 %v3076_v14, %v3065_v15  ;;  %v8448_v58 = vld [vmem:[#allocation107_spill] sm:$0xff] }
 0x2f2   :  { %v3490_v31 = vrot.slane %v6612_v12, %v8300_v53  ;;  %v3511_v35 = vmul.f32 %v3458_v45, %v6275_v5  ;;  %v786_v30 = vrot.slane %v8445_v11, %v8300_v53  ;;  %v1238_v49 = vrot.slane %v8446_v28, %v8300_v53  ;;  %v8449_v45 = vld [vmem:[#allocation110_spill] sm:$0xff] }
 0x2f3   :  { %v3524_v20 = vadd.f32 %v3523_v24, %v3507_v2  ;;  %v1690_v52 = vrot.slane %v8447_v57, %v8300_v53  ;;  %v2142_v54 = vrot.slane %v8448_v58, %v8300_v53  ;;  %v3078_v13 = vadd.f32 %v3077_v7, %v3067_v48  ;;  %v8516_v28 = vld [vmem:[#allocation146_spill] sm:$0xff] }
 0x2f4   :  { %v3519_v15 = vmul.f32 %v3490_v31, %v5830_v37  ;;  %v809_v9 = vmul.f32 %v786_v30, %v6030_v46  ;;  %v2594_v14 = vrot.slane %v8449_v45, %v8300_v53  ;;  %v1261_v24 = vmul.f32 %v1238_v49, %v6030_v46 }
 0x2f5   :  { %v3525_v12 = vadd.f32 %v3524_v20, %v3509_v18  ;;  %v1713_v2 = vmul.f32 %v1690_v52, %v6030_v46  ;;  %v2165_v29 = vmul.f32 %v2142_v54, %v6030_v46  ;;  %v3961_v23 = vmul.f32 %v3902_v44, %v6178_v25  ;;  %v8456_v54 = vld [vmem:[#allocation119_spill] sm:$0xff] }
 0x2f6   :  { %v3965_v8 = vmul.f32 %v3918_v51, %v6183_v41  ;;  %v819_v48 = vadd.f32 %v6361_v43, %v809_v9  ;;  %v2617_v7 = vmul.f32 %v2594_v14, %v6030_v46  ;;  %v1271_v10 = vadd.f32 %v6403_v50, %v1261_v24  ;;  %v8457_v14 = vld [vmem:[#allocation126_spill] sm:$0xff] }
 0x2f7   :  { %v6639_v31 = vpop.eup %4334  ;;  %v3526_v30 = vadd.f32 %v3525_v12, %v3511_v35  ;;  %v1723_v18 = vadd.f32 %v6470_v39, %v1713_v2  ;;  %v2175_v20 = vadd.f32 %v6526_v16, %v2165_v29  ;;  %v3515_v49 = vmul.f32 %v3474_v40, %v6298_v1 }
 0x2f8   :  { %8450 = vst [vmem:[#allocation37_spill] sm:$0xff] %v6639_v31  ;;  %v6644_v52 = vpop.eup %4336  ;;  %v3878_v25 = vrot.slane %v6639_v31, %v8300_v53  ;;  %v831_v41 = vmul.f32 0.01, %v819_v48  ;;  %v6650_v43 = vadd.f32 %v6577_v42, %v2617_v7  ;;  %vm829_vm1 = vcmp.gt.f32.partialorder %v819_v48, 0.0 }
 0x2f9   :  { %8451 = vst [vmem:[#allocation38_spill] sm:$0xff] %v6644_v52  ;;  %v6652_v44 = vpop.eup %4338  ;;  %v3527_v51 = vadd.f32 %v3526_v30, %v3513_v61  ;;  %v3894_v50 = vrot.slane %v6644_v52, %v8300_v53  ;;  %v1283_v39 = vmul.f32 0.01, %v1271_v10  ;;  %v3969_v40 = vmul.f32 %v3934_v62, %v6213_v21 }
 0x2fa   :  { %8452 = vst [vmem:[#allocation74_spill] sm:$0xff] %v6650_v43  ;;  %8453 = vst [vmem:[#allocation88_spill] sm:$0xff] %v6652_v44  ;;  %v6656_v16 = vpop.eup %4340  ;;  %v3910_v29 = vrot.slane %v6652_v44, %v8300_v53  ;;  %v3955_v12 = vmul.f32 %v3878_v25, %v6173_v22  ;;  %vm1281_vm2 = vcmp.gt.f32.partialorder %v1271_v10, 0.0  ;;  %v3046_v9 = vrot.slane %v8456_v54, %v8300_v53 }
 0x2fb   :  { %8454 = vst [vmem:[#allocation165_spill] sm:$0xff] %v6656_v16  ;;  %v6662_v42 = vpop.eup %4342  ;;  %v3528_v35 = vadd.f32 %v3527_v51, %v3515_v49  ;;  %v3926_v61 = vrot.slane %v6656_v16, %v8300_v53  ;;  %v3498_v24 = vrot.slane %v8457_v14, %v8300_v53  ;;  %v3959_v22 = vmul.f32 %v3894_v50, %v6242_v19 }
 0x2fc   :  { %8455 = vst [vmem:[#allocation166_spill] sm:$0xff] %v6662_v42  ;;  %v3942_v2 = vrot.slane %v6662_v42, %v8300_v53  ;;  %v3975_v7 = vadd.f32 %v3957_v4, %v3955_v12  ;;  %v6673_v21 = vsel %vm829_vm1, %v819_v48, %v831_v41  ;;  %v3963_v30 = vmul.f32 %v3910_v29, %v6275_v5  ;;  %v8466_v29 = vld [vmem:[#allocation41_spill] sm:$0xff] }
 0x2fd   :  { %8458 = vst [vmem:[#allocation167_spill] sm:$0xff] %v6673_v21  ;;  %v3529_v62 = vadd.f32 %v3528_v35, %v6594_v56  ;;  %v6677_v49 = vsel %vm1281_vm2, %v1271_v10, %v1283_v39  ;;  %vm1733_vm3 = vcmp.gt.f32.partialorder %v1723_v18, 0.0  ;;  %v3967_v25 = vmul.f32 %v3926_v61, %v6298_v1  ;;  %v8460_v10 = vld [vmem:[#allocation125_spill] sm:$0xff]  ;;  %v8461_v56 = vld [vmem:[#allocation39_spill] sm:$0xff] }
 0x2fe   :  { %8459 = vst [vmem:[#allocation168_spill] sm:$0xff] %v6677_v49  ;;  %v3971_v51 = vmul.f32 %v3942_v2, %v5830_v37  ;;  %v3976_v16 = vadd.f32 %v3975_v7, %v3959_v22  ;;  %v1735_v44 = vmul.f32 0.01, %v1723_v18  ;;  %vm2185_vm4 = vcmp.gt.f32.partialorder %v2175_v20, 0.0  ;;  %v8464_v37 = vld [vmem:[#allocation40_spill] sm:$0xff] }
 0x2ff   :  { %v3530_v31 = vadd.f32 %v3529_v62, %v3519_v15  ;;  %v2187_v42 = vmul.f32 0.01, %v2175_v20  ;;  %v3069_v19 = vmul.f32 %v3046_v9, %v6030_v46  ;;  %v3521_v48 = vmul.f32 %v3498_v24, %v6030_v46 }
 0x300   :  { %v3977_v4 = vadd.f32 %v3976_v16, %v3961_v23  ;;  %v3950_v5 = vrot.slane %v5939_v63, %v8300_v53  ;;  %v8462_v41 = vmax.f32 %v8461_v56, 0.0  ;;  %v8465_v39 = vmax.f32 %v8464_v37, 0.0  ;;  %v8468_v23 = vld [vmem:[#allocation42_spill] sm:$0xff] }
 0x301   :  { %v6688_v1 = vadd.f32 %v3078_v13, %v3069_v19  ;;  %v8467_v12 = vmax.f32 %v8466_v29, 0.0  ;;  %v8469_v16 = vmax.f32 %v8468_v23, 0.0  ;;  %v6699_v24 = vadd.f32 %v3530_v31, %v3521_v48  ;;  %v8471_v13 = vld [vmem:[#allocation79_spill] sm:$0xff] }
 0x302   :  { %v572_v50 = vsub.f32 %v8462_v41, %v8460_v10  ;;  %v576_v15 = vsub.f32 %v8465_v39, %v8460_v10  ;;  %v3978_v9 = vadd.f32 %v3977_v4, %v3963_v30  ;;  %v3973_v2 = vmul.f32 %v3950_v5, %v6030_v46  ;;  %v8474_v41 = vld [vmem:[#allocation130_spill] sm:$0xff]  ;;  %v6733_v23 = vld [vmem:[%s7759_s0 + $0x38] sm:$0xff] }
 0x303   :  { %8463 = vst [vmem:[#allocation125_spill] sm:$0xff] %v6688_v1  ;;  %v580_v35 = vsub.f32 %v8467_v12, %v8460_v10  ;;  %v584_v61 = vsub.f32 %v8469_v16, %v8460_v10  ;;  %8470 = vst [vmem:[#allocation39_spill] sm:$0xff] %v6699_v24  ;;  %v8472_v22 = vmax.f32 %v8471_v13, 0.0  ;;  %v6706_v62 = vsel %vm1733_vm3, %v1723_v18, %v1735_v44  ;;  %v8478_v44 = vld [vmem:[#allocation43_spill] sm:$0xff]  ;;  %v8483_v12 = vld [vmem:[#allocation134_spill] sm:$0xff] }
 0x304   :  { %8473 = vst [vmem:[#allocation40_spill] sm:$0xff] %v6706_v62  ;;  %v593_v19 = vmul.f32 1.442695, %v572_v50  ;;  %v601_v56 = vmul.f32 1.442695, %v576_v15  ;;  %4344 = vpow2.f32 %v8474_v41  ;;  %v3979_v37 = vadd.f32 %v3978_v9, %v3965_v8  ;;  %v8480_v8 = vld [vmem:[#allocation44_spill] sm:$0xff] }
 0x305   :  { %v588_v7 = vsub.f32 %v8472_v22, %v8460_v10  ;;  %v6710_v39 = vsel %vm2185_vm4, %v2175_v20, %v2187_v42  ;;  %v609_v30 = vmul.f32 1.442695, %v580_v35  ;;  %v617_v31 = vmul.f32 1.442695, %v584_v61  ;;  %v8482_v15 = vld [vmem:[#allocation133_spill] sm:$0xff]  ;;  %v8486_v13 = vld [vmem:[#allocation46_spill] sm:$0xff] }
 0x306   :  { %8475 = vst [vmem:[#allocation41_spill] sm:$0xff] %v6710_v39  ;;  %v6713_v4 = vmul.f32 0.01, %v6650_v43  ;;  %v6716_v46 = vmul.f32 0.01, %v6688_v1  ;;  %4346 = vpow2.f32 %v593_v19  ;;  %v3980_v18 = vadd.f32 %v3979_v37, %v3967_v25  ;;  %v8484_v16 = vld [vmem:[#allocation45_spill] sm:$0xff] }
 0x307   :  { %v625_v48 = vmul.f32 1.442695, %v588_v7  ;;  %4348 = vpow2.f32 %v601_v56  ;;  %v8479_v5 = vmax.f32 %v8478_v44, 0.0  ;;  %v8481_v20 = vmax.f32 %v8480_v8, 0.0  ;;  %v8488_v19 = vld [vmem:[#allocation80_spill] sm:$0xff] }
 0x308   :  { %8476 = vst [vmem:[#allocation42_spill] sm:$0xff] %v6713_v4  ;;  %8477 = vst [vmem:[#allocation79_spill] sm:$0xff] %v6716_v46  ;;  %4350 = vpow2.f32 %v609_v30  ;;  %v726_v50 = vrot.slane %v5916_v27, %v8300_v53  ;;  %v742_v29 = vrot.slane %v8482_v15, %v8300_v53  ;;  %v758_v35 = vrot.slane %v8483_v12, %v8300_v53 }
 0x309   :  { %v1032_v10 = vsub.f32 %v8479_v5, %v5912_v17  ;;  %v1036_v42 = vsub.f32 %v8481_v20, %v5912_v17  ;;  %v3981_v25 = vadd.f32 %v3980_v18, %v3969_v40  ;;  %4352 = vpow2.f32 %v617_v31  ;;  %v6747_v31 = vld [vmem:[%s7759_s0 + $0x78] sm:$0xff] }
 0x30a   :  { %v8485_v61 = vmax.f32 %v8484_v16, 0.0  ;;  %v8487_v22 = vmax.f32 %v8486_v13, 0.0  ;;  %4354 = vpow2.f32 %v625_v48  ;;  %v8489_v56 = vmax.f32 %v8488_v19, 0.0  ;;  %v6752_v18 = vld [vmem:[%s7759_s0 + $0xb8] sm:$0xff]  ;;  %v8490_v48 = vld [vmem:[#allocation136_spill] sm:$0xff]  ;;  %v8494_v16 = vld [vmem:[#allocation138_spill] sm:$0xff] }
 0x30b   :  { %v1053_v40 = vmul.f32 1.442695, %v1032_v10  ;;  %v1061_v37 = vmul.f32 1.442695, %v1036_v42  ;;  %v3982_v30 = vadd.f32 %v3981_v25, %v3971_v51  ;;  %4356 = vpow2.f32 %v8490_v48  ;;  %v8491_v51 = vld [vmem:[#allocation139_spill] sm:$0xff]  ;;  %v8493_v42 = vld [vmem:[#allocation140_spill] sm:$0xff] }
 0x30c   :  { %v1040_v9 = vsub.f32 %v8485_v61, %v5912_v17  ;;  %v1044_v7 = vsub.f32 %v8487_v22, %v5912_v17  ;;  %v1048_v41 = vsub.f32 %v8489_v56, %v5912_v17  ;;  %v794_v8 = vmul.f32 %v726_v50, %v6733_v23  ;;  %v8495_v61 = vld [vmem:[#allocation47_spill] sm:$0xff]  ;;  %v8498_v19 = vld [vmem:[#allocation48_spill] sm:$0xff] }
 0x30d   :  { %4358 = vpow2.f32 %v1053_v40  ;;  %v1178_v10 = vrot.slane %v8491_v51, %v8300_v53  ;;  %v6758_v20 = vadd.f32 %v3982_v30, %v3973_v2  ;;  %v1194_v25 = vrot.slane %v8493_v42, %v8300_v53  ;;  %v8500_v40 = vld [vmem:[#allocation141_spill] sm:$0xff] }
 0x30e   :  { %v1069_v44 = vmul.f32 1.442695, %v1040_v9  ;;  %v1077_v5 = vmul.f32 1.442695, %v1044_v7  ;;  %v1085_v17 = vmul.f32 1.442695, %v1048_v41  ;;  %4360 = vpow2.f32 %v1061_v37  ;;  %v6765_v22 = vpop.eup %4344 }
 0x30f   :  { %8492 = vst [vmem:[#allocation130_spill] sm:$0xff] %v6758_v20  ;;  %v8496_v13 = vmax.f32 %v8495_v61, 0.0  ;;  %8497 = vst [vmem:[#allocation43_spill] sm:$0xff] %v6765_v22  ;;  %v798_v7 = vmul.f32 %v742_v29, %v6747_v31  ;;  %v6769_v50 = vmul.f32 %v758_v35, %v6752_v18  ;;  %v8499_v2 = vmax.f32 %v8498_v19, 0.0  ;;  %v6786_v29 = vld [vmem:[%s7759_s0 + $0x18] sm:$0xff] }
 0x310   :  { %4362 = vpow2.f32 %v1069_v44  ;;  %v774_v41 = vrot.slane %v6765_v22, %v8300_v53  ;;  %v1210_v37 = vrot.slane %v8500_v40, %v8300_v53  ;;  %v6779_v30 = vmul.f32 %v1178_v10, %v6733_v23  ;;  %v6781_v48 = vpop.eup %4346  ;;  %v6791_v35 = vld [vmem:[%s7759_s0 + $0xf8] sm:$0xff]  ;;  %v8501_v44 = vld [vmem:[#allocation49_spill] sm:$0xff]  ;;  %v8503_v10 = vld [vmem:[#allocation50_spill] sm:$0xff] }
 0x311   :  { %v1484_v9 = vsub.f32 %v8496_v13, %v8494_v16  ;;  %v1488_v56 = vsub.f32 %v8499_v2, %v8494_v16  ;;  %4364 = vpow2.f32 %v1077_v5  ;;  %v8502_v5 = vmax.f32 %v8501_v44, 0.0  ;;  %v8505_v2 = vld [vmem:[#allocation81_spill] sm:$0xff]  ;;  %v6802_v52 = vpop.eup %4348 }
 0x312   :  { %4366 = vpow2.f32 %v1085_v17  ;;  %v8504_v13 = vmax.f32 %v8503_v10, 0.0  ;;  %v8506_v20 = vmax.f32 %v8505_v2, 0.0  ;;  %v718_v24 = vrot.slane %v6781_v48, %v8300_v53  ;;  %v6809_v44 = vpop.eup %4350 }
 0x313   :  { %v1492_v61 = vsub.f32 %v8502_v5, %v8494_v16  ;;  %v6807_v14 = vmul.f32 %v1194_v25, %v6747_v31  ;;  %v1505_v17 = vmul.f32 1.442695, %v1484_v9  ;;  %v1513_v46 = vmul.f32 1.442695, %v1488_v56  ;;  %v6814_v5 = vld [vmem:[%s7759_s0 + $0x58] sm:$0xff]  ;;  %v6819_v2 = vpop.eup %4352 }
 0x314   :  { %v1496_v19 = vsub.f32 %v8504_v13, %v8494_v16  ;;  %v1500_v63 = vsub.f32 %v8506_v20, %v8494_v16  ;;  %v734_v20 = vrot.slane %v6802_v52, %v8300_v53  ;;  %8507 = vst [vmem:[#allocation44_spill] sm:$0xff] %v6819_v2  ;;  %v792_v25 = vmul.f32 %v718_v24, %v6786_v29  ;;  %v6828_v1 = vpop.eup %4354  ;;  %v6840_v24 = vld [vmem:[%s7759_s0 + $0x98] sm:$0xff] }
 0x315   :  { %v1521_v16 = vmul.f32 1.442695, %v1492_v61  ;;  %v6823_v9 = vmul.f32 %v774_v41, %v6791_v35  ;;  %v6826_v56 = vmul.f32 %v1210_v37, %v6752_v18  ;;  %4368 = vpow2.f32 %v1505_v17  ;;  %v6845_v41 = vld [vmem:[%s7759_s0 + $0xd8] sm:$0xff] }
 0x316   :  { %v1529_v13 = vmul.f32 1.442695, %v1496_v19  ;;  %v750_v54 = vrot.slane %v6809_v44, %v8300_v53  ;;  %v766_v61 = vrot.slane %v6819_v2, %v8300_v53  ;;  %4370 = vpow2.f32 %v1513_v46  ;;  %v6835_v19 = vpop.eup %4356 }
 0x317   :  { %8508 = vst [vmem:[#allocation133_spill] sm:$0xff] %v6835_v19  ;;  %v782_v37 = vrot.slane %v6828_v1, %v8300_v53  ;;  %v796_v17 = vmul.f32 %v734_v20, %v6814_v5  ;;  %v820_v10 = vadd.f32 %v794_v8, %v792_v25  ;;  %4372 = vpow2.f32 %v1521_v16  ;;  %v6850_v46 = vpop.eup %4358  ;;  %v8511_v8 = vld [vmem:[#allocation142_spill] sm:$0xff] }
 0x318   :  { %8509 = vst [vmem:[#allocation134_spill] sm:$0xff] %v6850_v46  ;;  %v1226_v43 = vrot.slane %v6835_v19, %v8300_v53  ;;  %4374 = vpow2.f32 %v1529_v13  ;;  %v6856_v39 = vpop.eup %4360  ;;  %v1170_v20 = vrot.slane %v6850_v46, %v8300_v53  ;;  %v800_v25 = vmul.f32 %v750_v54, %v6840_v24  ;;  %v8515_v19 = vld [vmem:[#allocation145_spill] sm:$0xff]  ;;  %v8527_v46 = vld [vmem:[#allocation54_spill] sm:$0xff] }
 0x319   :  { %8510 = vst [vmem:[#allocation45_spill] sm:$0xff] %v6856_v39  ;;  %v808_v58 = vmul.f32 %v782_v37, %v6050_v3  ;;  %v821_v62 = vadd.f32 %v820_v10, %v796_v17  ;;  %4376 = vpow2.f32 %v8511_v8  ;;  %v804_v45 = vmul.f32 %v766_v61, %v6845_v41 }
 0x31a   :  { %v6862_v16 = vpop.eup %4362  ;;  %v1186_v4 = vrot.slane %v6856_v39, %v8300_v53  ;;  %v1537_v13 = vmul.f32 1.442695, %v1500_v63  ;;  %v1244_v17 = vmul.f32 %v1170_v20, %v6786_v29  ;;  %v1258_v40 = vmul.f32 %v1226_v43, %v6791_v35 }
 0x31b   :  { %8512 = vst [vmem:[#allocation46_spill] sm:$0xff] %v6862_v16  ;;  %v6868_v57 = vpop.eup %4364  ;;  %v822_v49 = vadd.f32 %v821_v62, %v798_v7  ;;  %v1202_v54 = vrot.slane %v6862_v16, %v8300_v53  ;;  %v1630_v42 = vrot.slane %v8515_v19, %v8300_v53  ;;  %v1646_v39 = vrot.slane %v8516_v28, %v8300_v53 }
 0x31c   :  { %8513 = vst [vmem:[#allocation80_spill] sm:$0xff] %v6868_v57  ;;  %v6873_v8 = vpop.eup %4366  ;;  %v1218_v61 = vrot.slane %v6868_v57, %v8300_v53  ;;  %4378 = vpow2.f32 %v1537_v13  ;;  %v1248_v7 = vmul.f32 %v1186_v4, %v6814_v5  ;;  %v1272_v37 = vadd.f32 %v6779_v30, %v1244_v17  ;;  %v8518_v4 = vld [vmem:[#allocation147_spill] sm:$0xff] }
 0x31d   :  { %8514 = vst [vmem:[#allocation136_spill] sm:$0xff] %v6873_v8  ;;  %v823_v63 = vadd.f32 %v822_v49, %v800_v25  ;;  %v1234_v62 = vrot.slane %v6873_v8, %v8300_v53  ;;  %v1662_v30 = vrot.slane %v8518_v4, %v8300_v53  ;;  %v1252_v10 = vmul.f32 %v1202_v54, %v6840_v24 }
 0x31e   :  { %v1273_v13 = vadd.f32 %v1272_v37, %v1248_v7  ;;  %v1256_v20 = vmul.f32 %v1218_v61, %v6845_v41  ;;  %v1698_v28 = vmul.f32 %v1630_v42, %v6733_v23  ;;  %v8521_v7 = vld [vmem:[#allocation51_spill] sm:$0xff]  ;;  %v8523_v42 = vld [vmem:[#allocation52_spill] sm:$0xff]  ;;  %vm694_vm2 = vcmask 1041408  }
 0x31f   :  { %v6890_v43 = vpop.eup %4368  ;;  %v824_v49 = vadd.f32 %v823_v63, %v6769_v50  ;;  %v1260_v25 = vmul.f32 %v1234_v62, %v6050_v3  ;;  %v8520_v62 = vld [vmem:[#allocation144_spill] sm:$0xff]  ;;  %v8522_v4 = vmax.f32 %v8521_v7, 0.0  ;;  %v8524_v8 = vmax.f32 %v8523_v42, 0.0 }
 0x320   :  { %8517 = vst [vmem:[#allocation138_spill] sm:$0xff] %v6890_v43  ;;  %v6896_v17 = vpop.eup %4370  ;;  %v1622_v19 = vrot.slane %v6890_v43, %v8300_v53  ;;  %v1274_v63 = vadd.f32 %v1273_v13, %v6807_v14  ;;  %v1702_v43 = vmul.f32 %v1646_v39, %v6747_v31 }
 0x321   :  { %8519 = vst [vmem:[#allocation47_spill] sm:$0xff] %v6896_v17  ;;  %v6903_v57 = vpop.eup %4372  ;;  %v825_v50 = vadd.f32 %v824_v49, %v804_v45  ;;  %v1638_v37 = vrot.slane %v6896_v17, %v8300_v53  ;;  %v1936_v16 = vsub.f32 %v8522_v4, %v8520_v62  ;;  %v1940_v51 = vsub.f32 %v8524_v8, %v8520_v62  ;;  %v8525_v45 = vld [vmem:[#allocation53_spill] sm:$0xff] }
 0x322   :  { %v6911_v54 = vpop.eup %4374  ;;  %v1696_v61 = vmul.f32 %v1622_v19, %v6786_v29  ;;  %v8526_v14 = vmax.f32 %v8525_v45, 0.0  ;;  %v1275_v7 = vadd.f32 %v1274_v63, %v1252_v10  ;;  %v1706_v4 = vmul.f32 %v1662_v30, %v6752_v18  ;;  %v8529_v45 = vld [vmem:[#allocation82_spill] sm:$0xff] }
 0x323   :  { %v6921_v13 = vpop.eup %4376  ;;  %v826_v17 = vadd.f32 %v825_v50, %v6823_v9  ;;  %v8528_v19 = vmax.f32 %v8527_v46, 0.0  ;;  %v1654_v39 = vrot.slane %v6903_v57, %v8300_v53  ;;  %v1700_v8 = vmul.f32 %v1638_v37, %v6814_v5 }
 0x324   :  { %v1944_v49 = vsub.f32 %v8526_v14, %v8520_v62  ;;  %v1724_v42 = vadd.f32 %v1698_v28, %v1696_v61  ;;  %v8530_v14 = vmax.f32 %v8529_v45, 0.0  ;;  %v1276_v9 = vadd.f32 %v1275_v7, %v6826_v56 }
 0x325   :  { %v1948_v21 = vsub.f32 %v8528_v19, %v8520_v62  ;;  %v6934_v2 = vadd.f32 %v826_v17, %v808_v58  ;;  %v1670_v10 = vrot.slane %v6911_v54, %v8300_v53  ;;  %v1957_v30 = vmul.f32 1.442695, %v1936_v16 }
 0x326   :  { %v1952_v22 = vsub.f32 %v8530_v14, %v8520_v62  ;;  %v6939_v46 = vpop.eup %4378  ;;  %v1678_v50 = vrot.slane %v6921_v13, %v8300_v53  ;;  %v1725_v63 = vadd.f32 %v1724_v42, %v1700_v8  ;;  %v1965_v37 = vmul.f32 1.442695, %v1940_v51  ;;  %v8534_v14 = vld [vmem:[#allocation151_spill] sm:$0xff] }
 0x327   :  { %v1973_v28 = vmul.f32 1.442695, %v1944_v49  ;;  %v1277_v61 = vadd.f32 %v1276_v9, %v1256_v20  ;;  %v1686_v62 = vrot.slane %v6939_v46, %v8300_v53  ;;  %4380 = vpow2.f32 %v1957_v30 }
 0x328   :  { %v1981_v58 = vmul.f32 1.442695, %v1948_v21  ;;  %v1704_v56 = vmul.f32 %v1654_v39, %v6840_v24  ;;  %v1726_v17 = vadd.f32 %v1725_v63, %v1702_v43  ;;  %4382 = vpow2.f32 %v1965_v37  ;;  %v8539_v37 = vld [vmem:[#allocation58_spill] sm:$0xff] }
 0x329   :  { %v1989_v7 = vmul.f32 1.442695, %v1952_v22  ;;  %v1278_v16 = vadd.f32 %v1277_v61, %v1258_v40  ;;  %v1708_v19 = vmul.f32 %v1670_v10, %v6845_v41  ;;  %v1712_v45 = vmul.f32 %v1686_v62, %v6050_v3  ;;  %v8531_v22 = vld [vmem:[#allocation149_spill] sm:$0xff]  ;;  %v8532_v40 = vld [vmem:[#allocation55_spill] sm:$0xff]  ;;  %v8535_v10 = vld [vmem:[#allocation56_spill] sm:$0xff] }
 0x32a   :  { %4384 = vpow2.f32 %v1973_v28  ;;  %v1710_v51 = vmul.f32 %v1678_v50, %v6791_v35  ;;  %v1727_v49 = vadd.f32 %v1726_v17, %v1704_v56  ;;  %v2082_v20 = vrot.slane %v6041_v36, %v8300_v53  ;;  %v8541_v62 = vld [vmem:[#allocation83_spill] sm:$0xff] }
 0x32b   :  { %4386 = vpow2.f32 %v1981_v58  ;;  %v6951_v8 = vadd.f32 %v1278_v16, %v1260_v25  ;;  %v2098_v21 = vrot.slane %v6043_v32, %v8300_v53  ;;  %v8533_v43 = vmax.f32 %v8532_v40, 0.0  ;;  %v8537_v25 = vld [vmem:[#allocation57_spill] sm:$0xff] }
 0x32c   :  { %4388 = vpow2.f32 %v6026_v34  ;;  %v1728_v42 = vadd.f32 %v1727_v49, %v1706_v4  ;;  %v2114_v9 = vrot.slane %v8534_v14, %v8300_v53  ;;  %v8536_v30 = vmax.f32 %v8535_v10, 0.0  ;;  %v8543_v49 = vld [vmem:[#allocation150_spill] sm:$0xff] }
 0x32d   :  { %v2388_v39 = vsub.f32 %v8533_v43, %v8531_v22  ;;  %4390 = vpow2.f32 %v1989_v7  ;;  %v8538_v63 = vmax.f32 %v8537_v25, 0.0  ;;  %v8540_v28 = vmax.f32 %v8539_v37, 0.0 }
 0x32e   :  { %v2392_v50 = vsub.f32 %v8536_v30, %v8531_v22  ;;  %v8542_v58 = vmax.f32 %v8541_v62, 0.0  ;;  %v1729_v17 = vadd.f32 %v1728_v42, %v1708_v19  ;;  %v2150_v7 = vmul.f32 %v2082_v20, %v6733_v23  ;;  %v8544_v20 = vld [vmem:[#allocation59_spill] sm:$0xff]  ;;  %v8546_v42 = vld [vmem:[#allocation60_spill] sm:$0xff] }
 0x32f   :  { %v2396_v34 = vsub.f32 %v8538_v63, %v8531_v22  ;;  %v2400_v61 = vsub.f32 %v8540_v28, %v8531_v22  ;;  %v2409_v56 = vmul.f32 1.442695, %v2388_v39  ;;  %4392 = vpow2.f32 %v8543_v49 }
 0x330   :  { %v2404_v4 = vsub.f32 %v8542_v58, %v8531_v22  ;;  %v2417_v16 = vmul.f32 1.442695, %v2392_v50  ;;  %v1730_v30 = vadd.f32 %v1729_v17, %v1710_v51  ;;  %v2154_v25 = vmul.f32 %v2098_v21, %v6747_v31 }
 0x331   :  { %4394 = vpow2.f32 %v2409_v56  ;;  %v2425_v40 = vmul.f32 1.442695, %v2396_v34  ;;  %v2433_v43 = vmul.f32 1.442695, %v2400_v61  ;;  %v2534_v63 = vrot.slane %v6083_v55, %v8300_v53  ;;  %v6978_v37 = vpop.eup %4380  ;;  %v8548_v56 = vld [vmem:[#allocation61_spill] sm:$0xff] }
 0x332   :  { %v2441_v10 = vmul.f32 1.442695, %v2404_v4  ;;  %4396 = vpow2.f32 %v2417_v16  ;;  %v2550_v19 = vrot.slane %v6095_v33, %v8300_v53  ;;  %v8545_v22 = vmax.f32 %v8544_v20, 0.0  ;;  %v6988_v34 = vpop.eup %4382  ;;  %v8553_v20 = vld [vmem:[#allocation84_spill] sm:$0xff] }
 0x333   :  { %4398 = vpow2.f32 %v2425_v40  ;;  %v8547_v50 = vmax.f32 %v8546_v42, 0.0  ;;  %v6990_v21 = vadd.f32 %v1730_v30, %v1712_v45  ;;  %v2074_v28 = vrot.slane %v6978_v37, %v8300_v53  ;;  %v8551_v40 = vld [vmem:[#allocation62_spill] sm:$0xff] }
 0x334   :  { %v2840_v39 = vsub.f32 %v8545_v22, %v6074_v38  ;;  %v2158_v61 = vmul.f32 %v2114_v9, %v6752_v18  ;;  %4400 = vpow2.f32 %v2433_v43  ;;  %v6995_v62 = vpop.eup %4384  ;;  %v2090_v58 = vrot.slane %v6988_v34, %v8300_v53 }
 0x335   :  { %v2844_v51 = vsub.f32 %v8547_v50, %v6074_v38  ;;  %4402 = vpow2.f32 %v2441_v10  ;;  %v2566_v4 = vrot.slane %v6107_v47, %v8300_v53  ;;  %v8549_v17 = vmax.f32 %v8548_v56, 0.0  ;;  %v7004_v16 = vpop.eup %4386 }
 0x336   :  { %8550 = vst [vmem:[#allocation48_spill] sm:$0xff] %v7004_v16  ;;  %v2148_v49 = vmul.f32 %v2074_v28, %v6786_v29  ;;  %v2602_v9 = vmul.f32 %v2534_v63, %v6733_v23  ;;  %v8552_v43 = vmax.f32 %v8551_v40, 0.0  ;;  %v8554_v10 = vmax.f32 %v8553_v20, 0.0  ;;  %v7014_v42 = vpop.eup %4388 }
 0x337   :  { %v2848_v45 = vsub.f32 %v8549_v17, %v6074_v38  ;;  %8555 = vst [vmem:[#allocation49_spill] sm:$0xff] %v7014_v42  ;;  %v2106_v50 = vrot.slane %v6995_v62, %v8300_v53  ;;  %v2606_v56 = vmul.f32 %v2550_v19, %v6747_v31  ;;  %v2861_v17 = vmul.f32 1.442695, %v2840_v39  ;;  %v7019_v28 = vpop.eup %4390 }
 0x338   :  { %v2852_v30 = vsub.f32 %v8552_v43, %v6074_v38  ;;  %v2856_v22 = vsub.f32 %v8554_v10, %v6074_v38  ;;  %v2869_v47 = vmul.f32 1.442695, %v2844_v51  ;;  %8556 = vst [vmem:[#allocation50_spill] sm:$0xff] %v7019_v28  ;;  %v2122_v63 = vrot.slane %v7004_v16, %v8300_v53 }
 0x339   :  { %v2152_v40 = vmul.f32 %v2090_v58, %v6814_v5  ;;  %v2176_v43 = vadd.f32 %v2150_v7, %v2148_v49  ;;  %v2877_v33 = vmul.f32 1.442695, %v2848_v45  ;;  %v2138_v38 = vrot.slane %v7019_v28, %v8300_v53  ;;  %v7029_v19 = vpop.eup %4392 }
 0x33a   :  { %v7027_v20 = vmul.f32 %v2566_v4, %v6752_v18  ;;  %4404 = vpow2.f32 %v2861_v17  ;;  %v2885_v10 = vmul.f32 1.442695, %v2852_v30  ;;  %8557 = vst [vmem:[#allocation81_spill] sm:$0xff] %v7029_v19  ;;  %v2130_v39 = vrot.slane %v7014_v42, %v8300_v53 }
 0x33b   :  { %v2177_v51 = vadd.f32 %v2176_v43, %v2152_v40  ;;  %4406 = vpow2.f32 %v2869_v47  ;;  %v2893_v55 = vmul.f32 1.442695, %v2856_v22  ;;  %v7033_v16 = vpop.eup %4394  ;;  %v2156_v7 = vmul.f32 %v2106_v50, %v6840_v24 }
 0x33c   :  { %8558 = vst [vmem:[#allocation142_spill] sm:$0xff] %v7033_v16  ;;  %v2164_v58 = vmul.f32 %v2138_v38, %v6050_v3  ;;  %v2582_v4 = vrot.slane %v7029_v19, %v8300_v53  ;;  %4408 = vpow2.f32 %v2877_v33  ;;  %v7039_v45 = vpop.eup %4396  ;;  %v2160_v49 = vmul.f32 %v2122_v63, %v6845_v41  ;;  %v8563_v19 = vld [vmem:[#allocation75_spill] sm:$0xff] }
 0x33d   :  { %8559 = vst [vmem:[#allocation144_spill] sm:$0xff] %v7039_v45  ;;  %v2178_v30 = vadd.f32 %v2177_v51, %v2154_v25  ;;  %v2526_v17 = vrot.slane %v7033_v16, %v8300_v53  ;;  %4410 = vpow2.f32 %v2885_v10  ;;  %v7044_v47 = vpop.eup %4398  ;;  %v2542_v22 = vrot.slane %v7039_v45, %v8300_v53 }
 0x33e   :  { %8560 = vst [vmem:[#allocation51_spill] sm:$0xff] %v7044_v47  ;;  %4412 = vpow2.f32 %v6091_v26  ;;  %v2986_v50 = vrot.slane %v6129_v60, %v8300_v53  ;;  %v3002_v33 = vrot.slane %v6144_v6, %v8300_v53  ;;  %v7053_v40 = vpop.eup %4400  ;;  %v2162_v25 = vmul.f32 %v2130_v39, %v6791_v35 }
 0x33f   :  { %8561 = vst [vmem:[#allocation52_spill] sm:$0xff] %v7053_v40  ;;  %v2179_v63 = vadd.f32 %v2178_v30, %v2156_v7  ;;  %v2600_v43 = vmul.f32 %v2526_v17, %v6786_v29  ;;  %4414 = vpow2.f32 %v2893_v55  ;;  %v7057_v38 = vpop.eup %4402  ;;  %v2558_v10 = vrot.slane %v7044_v47, %v8300_v53 }
 0x340   :  { %8562 = vst [vmem:[#allocation53_spill] sm:$0xff] %v7057_v38  ;;  %v2574_v26 = vrot.slane %v7053_v40, %v8300_v53  ;;  %v2614_v51 = vmul.f32 %v2582_v4, %v6791_v35  ;;  %v3018_v6 = vrot.slane %v6205_v59, %v8300_v53  ;;  %v2590_v39 = vrot.slane %v7057_v38, %v8300_v53  ;;  %v8565_v4 = vld [vmem:[#allocation76_spill] sm:$0xff]  ;;  %v8567_v38 = vld [vmem:[#allocation77_spill] sm:$0xff] }
 0x341   :  { %v2180_v60 = vadd.f32 %v2179_v63, %v2158_v61  ;;  %v2604_v7 = vmul.f32 %v2542_v22, %v6814_v5  ;;  %v2628_v55 = vadd.f32 %v2602_v9, %v2600_v43  ;;  %v3054_v30 = vmul.f32 %v2986_v50, %v6733_v23  ;;  %v8569_v50 = vld [vmem:[#allocation78_spill] sm:$0xff] }
 0x342   :  { %v3058_v17 = vmul.f32 %v3002_v33, %v6747_v31  ;;  %v8564_v47 = vmax.f32 %v8563_v19, 0.0  ;;  %v8566_v45 = vmax.f32 %v8565_v4, 0.0  ;;  %v2616_v61 = vmul.f32 %v2590_v39, %v6050_v3  ;;  %v8571_v19 = vld [vmem:[#allocation85_spill] sm:$0xff] }
 0x343   :  { %v2181_v59 = vadd.f32 %v2180_v60, %v2160_v49  ;;  %v2629_v63 = vadd.f32 %v2628_v55, %v2604_v7  ;;  %v8568_v22 = vmax.f32 %v8567_v38, 0.0  ;;  %v8570_v33 = vmax.f32 %v8569_v50, 0.0 }
 0x344   :  { %v3292_v40 = vsub.f32 %v8564_v47, %v6113_v0  ;;  %v3296_v16 = vsub.f32 %v8566_v45, %v6113_v0  ;;  %v7081_v43 = vpop.eup %4404  ;;  %v8572_v47 = vmax.f32 %v8571_v19, 0.0  ;;  %v2608_v39 = vmul.f32 %v2558_v10, %v6840_v24 }
 0x345   :  { %v3300_v9 = vsub.f32 %v8568_v22, %v6113_v0  ;;  %v3304_v28 = vsub.f32 %v8570_v33, %v6113_v0  ;;  %v7089_v60 = vpop.eup %4406  ;;  %v2182_v49 = vadd.f32 %v2181_v59, %v2162_v25  ;;  %v2630_v7 = vadd.f32 %v2629_v63, %v2606_v56 }
 0x346   :  { %v3308_v42 = vsub.f32 %v8572_v47, %v6113_v0  ;;  %v3313_v4 = vmul.f32 1.442695, %v3292_v40  ;;  %v3321_v45 = vmul.f32 1.442695, %v3296_v16  ;;  %v2978_v38 = vrot.slane %v7081_v43, %v8300_v53  ;;  %v7094_v55 = vpop.eup %4408 }
 0x347   :  { %8573 = vst [vmem:[#allocation54_spill] sm:$0xff] %v7094_v55  ;;  %v2994_v22 = vrot.slane %v7089_v60, %v8300_v53  ;;  %v3329_v50 = vmul.f32 1.442695, %v3300_v9  ;;  %v3337_v33 = vmul.f32 1.442695, %v3304_v28  ;;  %v7098_v0 = vpop.eup %4410  ;;  %v7100_v16 = vadd.f32 %v2182_v49, %v2164_v58 }
 0x348   :  { %4416 = vpow2.f32 %v3313_v4  ;;  %8574 = vst [vmem:[#allocation82_spill] sm:$0xff] %v7098_v0  ;;  %v2631_v40 = vadd.f32 %v2630_v7, %v2608_v39  ;;  %v3010_v59 = vrot.slane %v7094_v55, %v8300_v53  ;;  %v3052_v56 = vmul.f32 %v2978_v38, %v6786_v29  ;;  %v7105_v25 = vpop.eup %4412  ;;  %v8577_v39 = vld [vmem:[#allocation13_spill] sm:$0xff] }
 0x349   :  { %8575 = vst [vmem:[#allocation149_spill] sm:$0xff] %v7105_v25  ;;  %v2612_v10 = vmul.f32 %v2574_v26, %v6845_v41  ;;  %v3026_v63 = vrot.slane %v7098_v0, %v8300_v53  ;;  %4418 = vpow2.f32 %v3321_v45  ;;  %v3345_v9 = vmul.f32 1.442695, %v3308_v42  ;;  %v7110_v28 = vpop.eup %4414 }
 0x34a   :  { %8576 = vst [vmem:[#allocation55_spill] sm:$0xff] %v7110_v28  ;;  %v2632_v58 = vadd.f32 %v2631_v40, %v7027_v20  ;;  %v3034_v19 = vrot.slane %v7105_v25, %v8300_v53  ;;  %v3056_v47 = vmul.f32 %v2994_v22, %v6814_v5  ;;  %v3080_v4 = vadd.f32 %v3054_v30, %v3052_v56  ;;  %v8578_v22 = vld [vmem:[#allocation11_spill] sm:$0xff]  ;;  %v8579_v30 = vld [vmem:[#allocation14_spill] sm:$0xff] }
 0x34b   :  { %v3042_v49 = vrot.slane %v7110_v28, %v8300_v53  ;;  %v3062_v26 = vmul.f32 %v3018_v6, %v6752_v18  ;;  %4420 = vpow2.f32 %v3329_v50  ;;  %v3438_v45 = vrot.slane %v8577_v39, %v8300_v53 }
 0x34c   :  { %v2633_v42 = vadd.f32 %v2632_v58, %v2612_v10  ;;  %v3060_v7 = vmul.f32 %v3010_v59, %v6840_v24  ;;  %v3081_v38 = vadd.f32 %v3080_v4, %v3056_v47  ;;  %4422 = vpow2.f32 %v3337_v33  ;;  %v8580_v10 = vld [vmem:[#allocation157_spill] sm:$0xff]  ;;  %v8581_v59 = vld [vmem:[#allocation10_spill] sm:$0xff]  ;;  %v8582_v47 = vld [vmem:[#allocation63_spill] sm:$0xff] }
 0x34d   :  { %v3064_v20 = vmul.f32 %v3026_v63, %v6845_v41  ;;  %v3068_v40 = vmul.f32 %v3042_v49, %v6050_v3  ;;  %4424 = vpow2.f32 %v8578_v22  ;;  %v3454_v56 = vrot.slane %v8579_v30, %v8300_v53  ;;  %v8584_v63 = vld [vmem:[#allocation64_spill] sm:$0xff]  ;;  %v8586_v22 = vld [vmem:[#allocation66_spill] sm:$0xff] }
 0x34e   :  { %v2634_v28 = vadd.f32 %v2633_v42, %v2614_v51  ;;  %v3066_v6 = vmul.f32 %v3034_v19, %v6791_v35  ;;  %v3082_v50 = vadd.f32 %v3081_v38, %v3058_v17  ;;  %4426 = vpow2.f32 %v3345_v9  ;;  %v8588_v17 = vld [vmem:[#allocation65_spill] sm:$0xff]  ;;  %v8590_v38 = vld [vmem:[#allocation86_spill] sm:$0xff] }
 0x34f   :  { %v3470_v58 = vrot.slane %v8580_v10, %v8300_v53  ;;  %v8583_v33 = vmax.f32 %v8582_v47, 0.0  ;;  %v8585_v49 = vmax.f32 %v8584_v63, 0.0  ;;  %v8587_v25 = vmax.f32 %v8586_v22, 0.0 }
 0x350   :  { %v7139_v51 = vadd.f32 %v2634_v28, %v2616_v61  ;;  %v3083_v19 = vadd.f32 %v3082_v50, %v3060_v7  ;;  %v8589_v9 = vmax.f32 %v8588_v17, 0.0  ;;  %v8591_v10 = vmax.f32 %v8590_v38, 0.0  ;;  %v8592_v28 = vld [vmem:[#allocation161_spill] sm:$0xff]  ;;  %v8593_v50 = vld [vmem:[#allocation163_spill] sm:$0xff] }
 0x351   :  { %v3744_v4 = vsub.f32 %v8583_v33, %v8581_v59  ;;  %v3748_v39 = vsub.f32 %v8585_v49, %v8581_v59  ;;  %v3752_v30 = vsub.f32 %v8587_v25, %v8581_v59  ;;  %v3506_v63 = vmul.f32 %v3438_v45, %v6733_v23  ;;  %v8595_v45 = vld [vmem:[#allocation98_spill] sm:$0xff] }
 0x352   :  { %v3756_v42 = vsub.f32 %v8589_v9, %v8581_v59  ;;  %v3760_v47 = vsub.f32 %v8591_v10, %v8581_v59  ;;  %v7147_v33 = vpop.eup %4416  ;;  %v3084_v22 = vadd.f32 %v3083_v19, %v3062_v26  ;;  %4428 = vpow2.f32 %v8592_v28  ;;  %v8594_v59 = vld [vmem:[#allocation164_spill] sm:$0xff] }
 0x353   :  { %v3765_v49 = vmul.f32 1.442695, %v3744_v4  ;;  %v3773_v0 = vmul.f32 1.442695, %v3748_v39  ;;  %v3781_v55 = vmul.f32 1.442695, %v3752_v30  ;;  %v3430_v61 = vrot.slane %v7147_v33, %v8300_v53  ;;  %v7153_v7 = vpop.eup %4418 }
 0x354   :  { %v3789_v25 = vmul.f32 1.442695, %v3756_v42  ;;  %v3890_v10 = vrot.slane %v8593_v50, %v8300_v53  ;;  %v3906_v17 = vrot.slane %v8594_v59, %v8300_v53  ;;  %v3922_v39 = vrot.slane %v8595_v45, %v8300_v53  ;;  %v8614_v50 = vld [vmem:[#allocation87_spill] sm:$0xff] }
 0x355   :  { %4430 = vpow2.f32 %v3765_v49  ;;  %v3085_v30 = vadd.f32 %v3084_v22, %v3064_v20  ;;  %v3446_v26 = vrot.slane %v7153_v7, %v8300_v53  ;;  %v3504_v4 = vmul.f32 %v3430_v61, %v6786_v29  ;;  %v7164_v19 = vpop.eup %4420 }
 0x356   :  { %4432 = vpow2.f32 %v3773_v0  ;;  %v3510_v9 = vmul.f32 %v3454_v56, %v6747_v31  ;;  %v3514_v42 = vmul.f32 %v3470_v58, %v6752_v18  ;;  %v3797_v38 = vmul.f32 1.442695, %v3760_v47  ;;  %v7168_v49 = vpop.eup %4422  ;;  %v8596_v56 = vld [vmem:[#allocation158_spill] sm:$0xff] }
 0x357   :  { %4434 = vpow2.f32 %v3781_v55  ;;  %v3086_v28 = vadd.f32 %v3085_v30, %v3066_v6  ;;  %v3462_v20 = vrot.slane %v7164_v19, %v8300_v53  ;;  %v3508_v22 = vmul.f32 %v3446_v26, %v6814_v5  ;;  %v7173_v59 = vpop.eup %4424 }
 0x358   :  { %v3532_v45 = vadd.f32 %v3506_v63, %v3504_v4  ;;  %4436 = vpow2.f32 %v3789_v25  ;;  %v3958_v0 = vmul.f32 %v3890_v10, %v6733_v23  ;;  %v654_v61 = vrot.slane %v8596_v56, 6  ;;  %v7177_v58 = vpop.eup %4426  ;;  %v8597_v25 = vld [vmem:[#allocation6_spill] sm:$0xff]  ;;  %v8598_v10 = vld [vmem:[#allocation67_spill] sm:$0xff] }
 0x359   :  { %v7179_v55 = vadd.f32 %v3086_v28, %v3068_v40  ;;  %v7182_v6 = vmul.f32 %v3906_v17, %v6747_v31  ;;  %v7185_v30 = vmul.f32 %v3922_v39, %v6752_v18  ;;  %v3478_v63 = vrot.slane %v7168_v49, %v8300_v53  ;;  %v8600_v31 = vld [vmem:[#allocation131_spill] sm:$0xff]  ;;  %v8601_v17 = vld [vmem:[#allocation137_spill] sm:$0xff] }
 0x35a   :  { %v3533_v47 = vadd.f32 %v3532_v45, %v3508_v22  ;;  %v3494_v23 = vrot.slane %v7177_v58, %v8300_v53  ;;  %4438 = vpow2.f32 %v3797_v38  ;;  %v8599_v26 = vrot.slane %v8598_v10, 7  ;;  %v8603_v56 = vld [vmem:[#allocation143_spill] sm:$0xff]  ;;  %v8607_v10 = vld [vmem:[#allocation148_spill] sm:$0xff] }
 0x35b   :  { %v3512_v45 = vmul.f32 %v3462_v20, %v6840_v24  ;;  %4440 = vpow2.f32 %v8600_v31  ;;  %v3486_v38 = vrot.slane %v7173_v59, %v8300_v53  ;;  %v8604_v20 = vld [vmem:[#allocation68_spill] sm:$0xff] }
 0x35c   :  { %v653_v40 = vsel %vm652_vm5, %v8599_v26, %v8597_v25  ;;  %v3534_v4 = vadd.f32 %v3533_v47, %v3510_v9  ;;  %v3520_v18 = vmul.f32 %v3494_v23, %v6050_v3  ;;  %4442 = vpow2.f32 %v8601_v17  ;;  %v7200_v28 = vpop.eup %4428 }
 0x35d   :  { %v656_v39 = vsel %vm655_vm6, %v654_v61, %v653_v40  ;;  %8602 = vst [vmem:[#allocation151_spill] sm:$0xff] %v7200_v28  ;;  %4444 = vpow2.f32 %v8603_v56  ;;  %v8605_v9 = vrot.slane %v8604_v20, 5  ;;  %v3516_v23 = vmul.f32 %v3478_v63, %v6845_v41  ;;  %v8608_v61 = vld [vmem:[#allocation159_spill] sm:$0xff] }
 0x35e   :  { %v3535_v22 = vadd.f32 %v3534_v4, %v3512_v45  ;;  %4446 = vpow2.f32 %v8607_v10  ;;  %v660_v26 = vrot.slane %v8608_v61, 4  ;;  %v8610_v4 = vld [vmem:[#allocation152_spill] sm:$0xff]  ;;  %v3938_v63 = vrot.slane %v7200_v28, %v8300_v53  ;;  %v8611_v56 = vld [vmem:[#allocation7_spill] sm:$0xff] }
 0x35f   :  { %v659_v47 = vsel %vm658_vm7, %v8605_v9, %v656_v39  ;;  %v7208_v25 = vpop.eup %4430  ;;  %4448 = vpow2.f32 %v8610_v4  ;;  %v8612_v10 = vld [vmem:[#allocation160_spill] sm:$0xff]  ;;  %v8615_v28 = vrot.slane %v8614_v50, 3 }
 0x360   :  { %8606 = vst [vmem:[#allocation56_spill] sm:$0xff] %v7208_v25  ;;  %v7213_v40 = vpop.eup %4432  ;;  %v3536_v31 = vadd.f32 %v3535_v22, %v3514_v42  ;;  %v3882_v45 = vrot.slane %v7208_v25, %v8300_v53  ;;  %4450 = vpow2.f32 %v8611_v56  ;;  %v662_v20 = vsel %vm661_vm8, %v660_v26, %v659_v47 }
 0x361   :  { %8609 = vst [vmem:[#allocation57_spill] sm:$0xff] %v7213_v40  ;;  %v7218_v17 = vpop.eup %4434  ;;  %v3898_v39 = vrot.slane %v7213_v40, %v8300_v53  ;;  %v3518_v42 = vmul.f32 %v3486_v38, %v6791_v35  ;;  %v666_v61 = vrot.slane %v8612_v10, 2  ;;  %v8613_v40 = vld [vmem:[#allocation156_spill] sm:$0xff]  ;;  %v665_v56 = vsel %vm664_vm9, %v8615_v28, %v662_v20 }
 0x362   :  { %v3537_v22 = vadd.f32 %v3536_v31, %v3516_v23  ;;  %v3956_v9 = vmul.f32 %v3882_v45, %v6786_v29  ;;  %v7229_v4 = vpop.eup %4436  ;;  %v3914_v25 = vrot.slane %v7218_v17, %v8300_v53  ;;  %4452 = vpow2.f32 %v8613_v40  ;;  %v8617_v45 = vld [vmem:[#allocation17_spill] sm:$0xff] }
 0x363   :  { %v3930_v38 = vrot.slane %v7229_v4, %v8300_v53  ;;  %v3960_v29 = vmul.f32 %v3898_v39, %v6814_v5  ;;  %v3970_v31 = vmul.f32 %v3938_v63, %v6791_v35  ;;  %4454 = vpow2.f32 %v8617_v45 }
 0x364   :  { %v3538_v47 = vadd.f32 %v3537_v22, %v3518_v42  ;;  %v3984_v23 = vadd.f32 %v3958_v0, %v3956_v9  ;;  %v7240_v26 = vpop.eup %4438  ;;  %v668_v40 = vsel %vm667_vm10, %v666_v61, %v665_v56  ;;  %v8618_v5 = vrot.slane %v5916_v27, 7 }
 0x365   :  { %8616 = vst [vmem:[#allocation58_spill] sm:$0xff] %v7240_v26  ;;  %v7245_v50 = vpop.eup %4440  ;;  %v3946_v20 = vrot.slane %v7240_v26, %v8300_v53  ;;  %v3964_v35 = vmul.f32 %v3914_v25, %v6840_v24  ;;  %v3968_v63 = vmul.f32 %v3930_v38, %v6845_v41  ;;  %v8620_v24 = vld [vmem:[#allocation30_spill] sm:$0xff] }
 0x366   :  { %v7247_v28 = vadd.f32 %v3538_v47, %v3520_v18  ;;  %v3985_v42 = vadd.f32 %v3984_v23, %v3960_v29  ;;  %v673_v0 = vsel %vm652_vm5, %v8618_v5, %v6781_v48  ;;  %v7255_v39 = vpop.eup %4442  ;;  %v790_v22 = vrot.slane %v7245_v50, %v8300_v53  ;;  %v8619_v18 = vld [vmem:[#allocation89_spill] sm:$0xff] }
 0x367   :  { %v669_v9 = vrot.slane %v8619_v18, 1  ;;  %v7262_v10 = vpop.eup %4444  ;;  %v3972_v61 = vmul.f32 %v3946_v20, %v6050_v3  ;;  %v688_v27 = vrot.slane %v7245_v50, 7  ;;  %v1242_v48 = vrot.slane %v7255_v39, %v8300_v53 }
 0x368   :  { %v3986_v56 = vadd.f32 %v3985_v42, %v7182_v6  ;;  %v7269_v47 = vpop.eup %4446  ;;  %v810_v41 = vmul.f32 %v790_v22, %v8620_v24  ;;  %v1694_v25 = vrot.slane %v7262_v10, %v8300_v53  ;;  %v8621_v29 = vrot.slane %v6802_v52, 6 }
 0x369   :  { %v671_v38 = vsel %vm670_vm11, %v669_v9, %v668_v40  ;;  %v7278_v23 = vpop.eup %4448  ;;  %v1262_v50 = vmul.f32 %v1242_v48, %v8620_v24  ;;  %v2146_v20 = vrot.slane %v7269_v47, %v8300_v53  ;;  %v8622_v40 = vrot.slane %v8482_v15, 5 }
 0x36a   :  { %v675_v3 = vsel %vm655_vm6, %v8621_v29, %v673_v0  ;;  %v3987_v6 = vadd.f32 %v3986_v56, %v3964_v35  ;;  %v7284_v42 = vpop.eup %4450  ;;  %v828_v5 = vadd.f32 %v6934_v2, %v810_v41  ;;  %v1714_v52 = vmul.f32 %v1694_v25, %v8620_v24 }
 0x36b   :  { %v2598_v0 = vrot.slane %v7278_v23, %v8300_v53  ;;  %v1280_v22 = vadd.f32 %v6951_v8, %v1262_v50  ;;  %v2166_v18 = vmul.f32 %v2146_v20, %v8620_v24  ;;  %v3050_v9 = vrot.slane %v7284_v42, %v8300_v53 }
 0x36c   :  { %v3988_v35 = vadd.f32 %v3987_v6, %v7185_v30  ;;  %v7296_v56 = vpop.eup %4452  ;;  %vm830_vm12 = vcmp.gt.f32.partialorder %v828_v5, 0.0  ;;  %v832_v2 = vmul.f32 0.01, %v828_v5  ;;  %v1732_v48 = vadd.f32 %v6990_v21, %v1714_v52 }
 0x36d   :  { %v2618_v41 = vmul.f32 %v2598_v0, %v8620_v24  ;;  %vm1282_vm13 = vcmp.gt.f32.partialorder %v1280_v22, 0.0  ;;  %v1284_v29 = vmul.f32 0.01, %v1280_v22  ;;  %v2184_v30 = vadd.f32 %v7100_v16, %v2166_v18  ;;  %v7301_v6 = vpop.eup %4454 }
 0x36e   :  { %v3989_v25 = vadd.f32 %v3988_v35, %v3968_v63  ;;  %v677_v45 = vsel %vm658_vm7, %v8622_v40, %v675_v3  ;;  %v834_v52 = vsel %vm830_vm12, %v828_v5, %v832_v2  ;;  %vm1734_vm14 = vcmp.gt.f32.partialorder %v1732_v48, 0.0  ;;  %v8624_v40 = vld [vmem:[#allocation90_spill] sm:$0xff] }
 0x36f   :  { %v2636_v20 = vadd.f32 %v7139_v51, %v2618_v41  ;;  %v1736_v63 = vmul.f32 0.01, %v1732_v48  ;;  %v7309_v0 = vsel %vm1282_vm13, %v1280_v22, %v1284_v29  ;;  %vm2186_vm15 = vcmp.gt.f32.partialorder %v2184_v30, 0.0  ;;  %v7326_v41 = vpop.permute.xlu0 %389 }
 0x370   :  { %v3990_v21 = vadd.f32 %v3989_v25, %v3970_v31  ;;  %v2188_v16 = vmul.f32 0.01, %v2184_v30  ;;  %v3070_v35 = vmul.f32 %v3050_v9, %v8620_v24  ;;  %v3502_v50 = vrot.slane %v7296_v56, %v8300_v53 }
 0x371   :  { %vm2638_vm0 = vcmp.gt.f32.partialorder %v2636_v20, 0.0  ;;  %v3954_v15 = vrot.slane %v7301_v6, %v8300_v53  ;;  %v2640_v51 = vmul.f32 0.01, %v2636_v20  ;;  %v8623_v3 = vrot.slane %v6809_v44, 4 }
 0x372   :  { %v3991_v18 = vadd.f32 %v3990_v21, %v3972_v61  ;;  %v3088_v31 = vadd.f32 %v7179_v55, %v3070_v35  ;;  %v8625_v22 = vrot.slane %v8445_v11, 7  ;;  %v3522_v61 = vmul.f32 %v3502_v50, %v8620_v24  ;;  %v8629_v21 = vld [vmem:[#allocation43_spill] sm:$0xff] }
 0x373   :  { %v679_v5 = vsel %vm661_vm8, %v8623_v3, %v677_v45  ;;  %v3974_v2 = vmul.f32 %v3954_v15, %v8620_v24  ;;  %v8626_v53 = vrot.slane %v8483_v12, 3  ;;  %v689_v44 = vsel %vm652_vm5, %v688_v27, %v6828_v1  ;;  %v8627_v45 = vld [vmem:[#allocation44_spill] sm:$0xff] }
 0x374   :  { %v687_v9 = vsel %vm652_vm5, %v8625_v22, %v8624_v40  ;;  %vm3090_vm1 = vcmp.gt.f32.partialorder %v3088_v31, 0.0  ;;  %v3092_v55 = vmul.f32 0.01, %v3088_v31  ;;  %v8628_v29 = vrot.slane %v8627_v45, 2  ;;  %v8635_v45 = vld [vmem:[#allocation16_spill] sm:$0xff] }
 0x375   :  { %v681_v25 = vsel %vm664_vm9, %v8626_v53, %v679_v5  ;;  %v7337_v50 = vadd.f32 %v7247_v28, %v3522_v61  ;;  %v7339_v24 = vadd.f32 %v3991_v18, %v3974_v2  ;;  %v8630_v35 = vrot.slane %v8629_v21, 1  ;;  %v8631_v5 = vld [vmem:[#allocation167_spill] sm:$0xff]  ;;  %v8638_v21 = vld [vmem:[#allocation134_spill] sm:$0xff] }
 0x376   :  { %v683_v11 = vsel %vm667_vm10, %v8628_v29, %v681_v25  ;;  %v695_v15 = vsel %vm694_vm2, %v687_v9, 0.0  ;;  %v7346_v1 = vsel %vm1734_vm14, %v1732_v48, %v1736_v63  ;;  %v703_v3 = vsel %vm694_vm2, %v689_v44, 0.0  ;;  %v8632_v63 = vld [vmem:[#allocation15_spill] sm:$0xff] }
 0x377   :  { %v685_v12 = vsel %vm670_vm11, %v8630_v35, %v683_v11  ;;  %v696_v27 = vadd.f32 %v695_v15, %v671_v38  ;;  %v835_v40 = vmul.f32 %v8631_v5, %v7326_v41  ;;  %v7352_v28 = vsel %vm2186_vm15, %v2184_v30, %v2188_v16  ;;  %v8633_v38 = vld [vmem:[#allocation91_spill] sm:$0xff]  ;;  %v8636_v30 = vld [vmem:[#allocation18_spill] sm:$0xff]  ;;  %v8637_v11 = vld [vmem:[#allocation69_spill] sm:$0xff] }
 0x378   :  { %v7355_v18 = vsel %vm2638_vm0, %v2636_v20, %v2640_v51  ;;  %v7357_v22 = vsel %vm3090_vm1, %v3088_v31, %v3092_v55  ;;  %v704_v61 = vadd.f32 %v703_v3, %v685_v12  ;;  %v836_v9 = vmul.f32 %v834_v52, %v7326_v41  ;;  %v8639_v35 = vld [vmem:[#allocation139_spill] sm:$0xff]  ;;  %v8641_v5 = vld [vmem:[#allocation45_spill] sm:$0xff] }
 0x379   :  { %v697_v2 = vrot.slane %v696_v27, 4  ;;  %v837_v48 = vrot.slane %v835_v40, 4  ;;  %v8634_v53 = vrot.slane %v8633_v38, 7  ;;  %v1113_v29 = vrot.slane %v8635_v45, 6  ;;  %v8644_v45 = vld [vmem:[#allocation95_spill] sm:$0xff] }
 0x37a   :  { %v705_v44 = vrot.slane %v704_v61, 4  ;;  %v1117_v16 = vrot.slane %v8636_v30, 4  ;;  %v1121_v20 = vrot.slane %v8637_v11, 2  ;;  %v843_v55 = vrot.slane %v836_v9, 4 }
 0x37b   :  { %v1112_v25 = vsel %vm652_vm5, %v8634_v53, %v8632_v63  ;;  %v698_v51 = vadd.f32 %v697_v2, %v696_v27  ;;  %v838_v31 = vadd.f32 %v837_v48, %v835_v40  ;;  %v8640_v12 = vrot.slane %v8639_v35, 7  ;;  %v8643_v53 = vld [vmem:[#allocation162_spill] sm:$0xff]  ;;  %v8646_v48 = vld [vmem:[#allocation92_spill] sm:$0xff] }
 0x37c   :  { %v706_v15 = vadd.f32 %v705_v44, %v704_v61  ;;  %v1114_v3 = vsel %vm655_vm6, %v1113_v29, %v1112_v25  ;;  %v8642_v63 = vrot.slane %v8641_v5, 6  ;;  %v8645_v30 = vrot.slane %v8644_v45, 7  ;;  %v8648_v25 = vld [vmem:[#allocation140_spill] sm:$0xff] }
 0x37d   :  { %v1126_v52 = vsel %vm652_vm5, %v8640_v12, %v8638_v21  ;;  %v699_v27 = vrot.slane %v698_v51, 2  ;;  %v839_v40 = vrot.slane %v838_v31, 2  ;;  %v844_v2 = vadd.f32 %v843_v55, %v836_v9  ;;  %v8650_v12 = vld [vmem:[#allocation136_spill] sm:$0xff]  ;;  %v8652_v9 = vld [vmem:[#allocation93_spill] sm:$0xff] }
 0x37e   :  { %v1128_v38 = vsel %vm655_vm6, %v8642_v63, %v1126_v52  ;;  %v1140_v11 = vsel %vm652_vm5, %v8645_v30, %v8643_v53  ;;  %v8647_v8 = vrot.slane %v8646_v48, 5  ;;  %v707_v21 = vrot.slane %v706_v15, 2 }
 0x37f   :  { %v8649_v44 = vrot.slane %v8648_v25, 5  ;;  %v8651_v52 = vrot.slane %v7255_v39, 7  ;;  %v700_v63 = vadd.f32 %v699_v27, %v698_v51  ;;  %v840_v53 = vadd.f32 %v839_v40, %v838_v31  ;;  %v8658_v40 = vld [vmem:[#allocation141_spill] sm:$0xff] }
 0x380   :  { %v1116_v35 = vsel %vm658_vm7, %v8647_v8, %v1114_v3  ;;  %v845_v45 = vrot.slane %v844_v2, 2  ;;  %v8653_v55 = vrot.slane %v8652_v9, 3  ;;  %v708_v8 = vadd.f32 %v707_v21, %v706_v15 }
 0x381   :  { %v1118_v61 = vsel %vm661_vm8, %v1117_v16, %v1116_v35  ;;  %v1130_v29 = vsel %vm658_vm7, %v8649_v44, %v1128_v38  ;;  %v1142_v5 = vsel %vm652_vm5, %v8651_v52, %v8650_v12  ;;  %v8654_v16 = vld [vmem:[#allocation46_spill] sm:$0xff]  ;;  %v1147_v38 = vsel %vm694_vm2, %v1140_v11, 0.0 }
 0x382   :  { %v1120_v30 = vsel %vm664_vm9, %v8653_v55, %v1118_v61  ;;  %v8655_v48 = vrot.slane %v8654_v16, 4  ;;  %v701_v25 = vrot.slane %v700_v63, 1  ;;  %v841_v39 = vrot.slane %v840_v53, 1  ;;  %v8656_v12 = vld [vmem:[#allocation94_spill] sm:$0xff]  ;;  %v8660_v55 = vld [vmem:[#allocation80_spill] sm:$0xff] }
 0x383   :  { %v1122_v3 = vsel %vm667_vm10, %v1121_v20, %v1120_v30  ;;  %v846_v44 = vadd.f32 %v845_v45, %v844_v2  ;;  %v8657_v51 = vrot.slane %v8656_v12, 1  ;;  %v709_v27 = vrot.slane %v708_v8, 1  ;;  %v8662_v45 = vld [vmem:[#allocation133_spill] sm:$0xff]  ;;  %v8664_v12 = vld [vmem:[#allocation168_spill] sm:$0xff] }
 0x384   :  { %v1132_v35 = vsel %vm661_vm8, %v8655_v48, %v1130_v29  ;;  %v8659_v52 = vrot.slane %v8658_v40, 3  ;;  %v1155_v20 = vsel %vm694_vm2, %v1142_v5, 0.0  ;;  %v702_v61 = vadd.f32 %v701_v25, %v700_v63  ;;  %v8665_v25 = vld [vmem:[#allocation19_spill] sm:$0xff] }
 0x385   :  { %v1124_v31 = vsel %vm670_vm11, %v8657_v51, %v1122_v3  ;;  %v842_v9 = vadd.f32 %v841_v39, %v840_v53  ;;  %v847_v29 = vrot.slane %v846_v44, 1  ;;  %v8661_v11 = vrot.slane %v8660_v55, 2  ;;  %v8666_v39 = vld [vmem:[#allocation96_spill] sm:$0xff]  ;;  %v8669_v55 = vld [vmem:[#allocation21_spill] sm:$0xff] }
 0x386   :  { %v1134_v15 = vsel %vm664_vm9, %v8659_v52, %v1132_v35  ;;  %v1148_v21 = vadd.f32 %v1147_v38, %v1124_v31  ;;  %v710_v2 = vadd.f32 %v709_v27, %v708_v8  ;;  %v8663_v16 = vrot.slane %v8662_v45, 1  ;;  %v8668_v52 = vld [vmem:[#allocation20_spill] sm:$0xff] }
 0x387   :  { %v1136_v30 = vsel %vm667_vm10, %v8661_v11, %v1134_v15  ;;  %v1287_v51 = vmul.f32 %v8664_v12, %v7326_v41  ;;  %v848_v35 = vadd.f32 %v847_v29, %v846_v44  ;;  %4456 = vrcp.f32 %v702_v61 }
 0x388   :  { %v1138_v3 = vsel %vm670_vm11, %v8663_v16, %v1136_v30  ;;  %v1149_v48 = vrot.slane %v1148_v21, 4  ;;  %v1288_v5 = vmul.f32 %v7309_v0, %v7326_v41  ;;  %4458 = vrcp.f32 %v710_v2  ;;  %v8671_v30 = vld [vmem:[#allocation101_spill] sm:$0xff]  ;;  %v8672_v16 = vld [vmem:[#allocation138_spill] sm:$0xff] }
 0x389   :  { %v1156_v38 = vadd.f32 %v1155_v20, %v1138_v3  ;;  %v1289_v53 = vrot.slane %v1287_v51, 4  ;;  %v8667_v8 = vrot.slane %v8666_v39, 7  ;;  %v1565_v15 = vrot.slane %v8668_v52, 6  ;;  %v8670_v20 = vld [vmem:[#allocation22_spill] sm:$0xff]  ;;  %v8673_v3 = vld [vmem:[#allocation145_spill] sm:$0xff] }
 0x38a   :  { %v1150_v63 = vadd.f32 %v1149_v48, %v1148_v21  ;;  %v1295_v40 = vrot.slane %v1288_v5, 4  ;;  %v1569_v11 = vrot.slane %v8669_v55, 4  ;;  %v1573_v29 = vrot.slane %v8670_v20, 2 }
 0x38b   :  { %v1564_v31 = vsel %vm652_vm5, %v8667_v8, %v8665_v25  ;;  %v1157_v27 = vrot.slane %v1156_v38, 4  ;;  %v1290_v61 = vadd.f32 %v1289_v53, %v1287_v51  ;;  %v1575_v0 = vrot.slane %v8671_v30, 1  ;;  %v8675_v8 = vld [vmem:[#allocation97_spill] sm:$0xff]  ;;  %v8677_v51 = vld [vmem:[#allocation47_spill] sm:$0xff] }
 0x38c   :  { %v1151_v44 = vrot.slane %v1150_v63, 2  ;;  %v1296_v21 = vadd.f32 %v1295_v40, %v1288_v5  ;;  %v1566_v45 = vsel %vm655_vm6, %v1565_v15, %v1564_v31  ;;  %v8674_v48 = vrot.slane %v8673_v3, 7  ;;  %v8678_v40 = vld [vmem:[#allocation99_spill] sm:$0xff]  ;;  %v8680_v3 = vld [vmem:[#allocation146_spill] sm:$0xff] }
 0x38d   :  { %v1158_v2 = vadd.f32 %v1157_v27, %v1156_v38  ;;  %v1291_v39 = vrot.slane %v1290_v61, 2  ;;  %v8676_v52 = vrot.slane %v8675_v8, 5  ;;  %v1579_v53 = vrot.slane %v8677_v51, 6 }
 0x38e   :  { %v1578_v12 = vsel %vm652_vm5, %v8674_v48, %v8672_v16  ;;  %v1152_v25 = vadd.f32 %v1151_v44, %v1150_v63  ;;  %v1297_v26 = vrot.slane %v1296_v21, 2  ;;  %v1583_v5 = vrot.slane %v6903_v57, 4 }
 0x38f   :  { %v1568_v55 = vsel %vm658_vm7, %v8676_v52, %v1566_v45  ;;  %v1159_v20 = vrot.slane %v1158_v2, 2  ;;  %v1292_v27 = vadd.f32 %v1291_v39, %v1290_v61  ;;  %v8679_v15 = vrot.slane %v8678_v40, 3 }
 0x390   :  { %v1570_v38 = vsel %vm661_vm8, %v1569_v11, %v1568_v55  ;;  %v1153_v31 = vrot.slane %v1152_v25, 1  ;;  %v1580_v63 = vsel %vm655_vm6, %v1579_v53, %v1578_v12  ;;  %v1298_v16 = vadd.f32 %v1297_v26, %v1296_v21 }
 0x391   :  { %v1572_v30 = vsel %vm664_vm9, %v8679_v15, %v1570_v38  ;;  %v1160_v44 = vadd.f32 %v1159_v20, %v1158_v2  ;;  %v8681_v48 = vrot.slane %v8680_v3, 5  ;;  %v1293_v11 = vrot.slane %v1292_v27, 1  ;;  %v4457_v39 = vpop.eup %4456  ;;  %v8682_v38 = vld [vmem:[#allocation147_spill] sm:$0xff]  ;;  %v8684_v15 = vld [vmem:[#allocation70_spill] sm:$0xff] }
 0x392   :  { %v1574_v45 = vsel %vm667_vm10, %v1573_v29, %v1572_v30  ;;  %v1154_v52 = vadd.f32 %v1153_v31, %v1152_v25  ;;  %v1299_v51 = vrot.slane %v1298_v16, 1  ;;  %v8683_v40 = vrot.slane %v8682_v38, 3  ;;  %v4459_v29 = vpop.eup %4458  ;;  %v8685_v30 = vld [vmem:[#allocation100_spill] sm:$0xff] }
 0x393   :  { %v1582_v8 = vsel %vm658_vm7, %v8681_v48, %v1580_v63  ;;  %v1576_v57 = vsel %vm670_vm11, %v1575_v0, %v1574_v45  ;;  %v1161_v55 = vrot.slane %v1160_v44, 1  ;;  %v1587_v26 = vrot.slane %v6911_v54, 2 }
 0x394   :  { %v1584_v61 = vsel %vm661_vm8, %v1583_v5, %v1582_v8  ;;  %v7448_v21 = vmul.f32 %v4457_v39, %v842_v9  ;;  %v1294_v12 = vadd.f32 %v1293_v11, %v1292_v27  ;;  %4460 = vrcp.f32 %v1154_v52  ;;  %v8689_v52 = vld [vmem:[#allocation102_spill] sm:$0xff]  ;;  %v8690_v11 = vld [vmem:[#allocation103_spill] sm:$0xff] }
 0x395   :  { %v1586_v2 = vsel %vm664_vm9, %v8683_v40, %v1584_v61  ;;  %v1589_v25 = vrot.slane %v6921_v13, 1  ;;  %v7451_v53 = vmul.f32 %v4459_v29, %v848_v35  ;;  %v1162_v0 = vadd.f32 %v1161_v55, %v1160_v44  ;;  %v8688_v13 = vld [vmem:[#allocation40_spill] sm:$0xff]  ;;  %v8692_v39 = vld [vmem:[#allocation23_spill] sm:$0xff]  ;;  %v8694_v40 = vld [vmem:[#allocation105_spill] sm:$0xff] }
 0x396   :  { %v1300_v20 = vadd.f32 %v1299_v51, %v1298_v16  ;;  %v1588_v5 = vsel %vm667_vm10, %v1587_v26, %v1586_v2  ;;  %v8686_v63 = vrot.slane %v8685_v30, 7  ;;  %v8687_v9 = vrot.slane %v7262_v10, 7  ;;  %v8693_v51 = vld [vmem:[#allocation24_spill] sm:$0xff] }
 0x397   :  { %v1590_v31 = vsel %vm670_vm11, %v1589_v25, %v1588_v5  ;;  %v1739_v35 = vmul.f32 %v8688_v13, %v7326_v41  ;;  %4462 = vrcp.f32 %v1162_v0  ;;  %v1740_v45 = vmul.f32 %v7346_v1, %v7326_v41  ;;  %v8695_v0 = vld [vmem:[#allocation25_spill] sm:$0xff]  ;;  %v8698_v13 = vld [vmem:[#allocation104_spill] sm:$0xff] }
 0x398   :  { %v1592_v54 = vsel %vm652_vm5, %v8686_v63, %v8684_v15  ;;  %v1594_v27 = vsel %vm652_vm5, %v8687_v9, %v6939_v46  ;;  %v8691_v61 = vrot.slane %v8690_v11, 7  ;;  %v2017_v55 = vrot.slane %v8692_v39, 6 }
 0x399   :  { %v1599_v44 = vsel %vm694_vm2, %v1592_v54, 0.0  ;;  %v1607_v16 = vsel %vm694_vm2, %v1594_v27, 0.0  ;;  %v1741_v8 = vrot.slane %v1739_v35, 4  ;;  %v1747_v46 = vrot.slane %v1740_v45, 4 }
 0x39a   :  { %v1600_v3 = vadd.f32 %v1599_v44, %v1576_v57  ;;  %v1608_v48 = vadd.f32 %v1607_v16, %v1590_v31  ;;  %v2016_v10 = vsel %vm652_vm5, %v8691_v61, %v8689_v52  ;;  %v2021_v38 = vrot.slane %v8693_v51, 4  ;;  %v8696_v31 = vld [vmem:[#allocation106_spill] sm:$0xff] }
 0x39b   :  { %v2023_v2 = vrot.slane %v8694_v40, 3  ;;  %v1742_v25 = vadd.f32 %v1741_v8, %v1739_v35  ;;  %v2025_v1 = vrot.slane %v8695_v0, 2  ;;  %v1748_v57 = vadd.f32 %v1747_v46, %v1740_v45 }
 0x39c   :  { %v1601_v26 = vrot.slane %v1600_v3, 4  ;;  %v1609_v29 = vrot.slane %v1608_v48, 4  ;;  %v2018_v5 = vsel %vm655_vm6, %v2017_v55, %v2016_v10  ;;  %v2027_v15 = vrot.slane %v8696_v31, 1 }
 0x39d   :  { %v8697_v30 = vrot.slane %v6041_v36, 7  ;;  %v1743_v27 = vrot.slane %v1742_v25, 2  ;;  %v8699_v44 = vrot.slane %v8698_v13, 5  ;;  %v1749_v35 = vrot.slane %v1748_v57, 2 }
 0x39e   :  { %v1602_v54 = vadd.f32 %v1601_v26, %v1600_v3  ;;  %v1610_v9 = vadd.f32 %v1609_v29, %v1608_v48  ;;  %v2031_v45 = vrot.slane %v6988_v34, 6  ;;  %v2035_v52 = vrot.slane %v6995_v62, 4  ;;  %v4461_v11 = vpop.eup %4460 }
 0x39f   :  { %v2030_v63 = vsel %vm652_vm5, %v8697_v30, %v6978_v37  ;;  %v2020_v16 = vsel %vm658_vm7, %v8699_v44, %v2018_v5  ;;  %v1744_v36 = vadd.f32 %v1743_v27, %v1742_v25  ;;  %v7490_v3 = vmul.f32 %v4461_v11, %v1294_v12  ;;  %v8701_v12 = vld [vmem:[#allocation48_spill] sm:$0xff]  ;;  %v8708_v11 = vld [vmem:[#allocation41_spill] sm:$0xff] }
 0x3a0   :  { %v2022_v8 = vsel %vm661_vm8, %v2021_v38, %v2020_v16  ;;  %v1603_v61 = vrot.slane %v1602_v54, 2  ;;  %v1611_v10 = vrot.slane %v1610_v9, 2  ;;  %v1750_v48 = vadd.f32 %v1749_v35, %v1748_v57 }
 0x3a1   :  { %v2024_v37 = vsel %vm664_vm9, %v2023_v2, %v2022_v8  ;;  %v2032_v39 = vsel %vm655_vm6, %v2031_v45, %v2030_v63  ;;  %v1745_v38 = vrot.slane %v1744_v36, 1  ;;  %v4463_v40 = vpop.eup %4462  ;;  %v8700_v26 = vrot.slane %v6043_v32, 5 }
 0x3a2   :  { %v2026_v46 = vsel %vm667_vm10, %v2025_v1, %v2024_v37  ;;  %v1604_v55 = vadd.f32 %v1603_v61, %v1602_v54  ;;  %v1612_v51 = vadd.f32 %v1611_v10, %v1610_v9  ;;  %v1751_v62 = vrot.slane %v1750_v48, 1  ;;  %v8703_v54 = vld [vmem:[#allocation26_spill] sm:$0xff]  ;;  %v8704_v9 = vld [vmem:[#allocation107_spill] sm:$0xff] }
 0x3a3   :  { %v2028_v34 = vsel %vm670_vm11, %v2027_v15, %v2026_v46  ;;  %v2034_v29 = vsel %vm658_vm7, %v8700_v26, %v2032_v39  ;;  %v2037_v2 = vrot.slane %v8534_v14, 3  ;;  %v2039_v25 = vrot.slane %v8701_v12, 2  ;;  %v8702_v15 = vld [vmem:[#allocation49_spill] sm:$0xff]  ;;  %v8709_v46 = vld [vmem:[#allocation71_spill] sm:$0xff]  ;;  %v8714_v12 = vld [vmem:[#allocation74_spill] sm:$0xff] }
 0x3a4   :  { %v7500_v0 = vmul.f32 %v4463_v40, %v1300_v20  ;;  %v1605_v1 = vrot.slane %v1604_v55, 1  ;;  %v1613_v57 = vrot.slane %v1612_v51, 1  ;;  %v1746_v5 = vadd.f32 %v1745_v38, %v1744_v36  ;;  %v8706_v20 = vld [vmem:[#allocation50_spill] sm:$0xff]  ;;  %v8710_v39 = vld [vmem:[#allocation109_spill] sm:$0xff] }
 0x3a5   :  { %v7502_v31 = vadd.f32 %v1751_v62, %v1750_v48  ;;  %v2036_v30 = vsel %vm661_vm8, %v2035_v52, %v2034_v29  ;;  %v2041_v63 = vrot.slane %v8702_v15, 1  ;;  %v8705_v32 = vrot.slane %v8704_v9, 7  ;;  %v8712_v62 = vld [vmem:[#allocation108_spill] sm:$0xff]  ;;  %v8713_v29 = vld [vmem:[#allocation111_spill] sm:$0xff] }
 0x3a6   :  { %v1606_v13 = vadd.f32 %v1605_v1, %v1604_v55  ;;  %v1614_v14 = vadd.f32 %v1613_v57, %v1612_v51  ;;  %v2038_v44 = vsel %vm664_vm9, %v2037_v2, %v2036_v30  ;;  %v8707_v16 = vrot.slane %v7269_v47, 7  ;;  %v8715_v1 = vld [vmem:[#allocation27_spill] sm:$0xff]  ;;  %v8716_v57 = vld [vmem:[#allocation112_spill] sm:$0xff] }
 0x3a7   :  { %v2044_v27 = vsel %vm652_vm5, %v8705_v32, %v8703_v54  ;;  %v2040_v8 = vsel %vm667_vm10, %v2039_v25, %v2038_v44  ;;  %v2191_v61 = vmul.f32 %v8708_v11, %v7326_v41  ;;  %v2192_v37 = vmul.f32 %v7352_v28, %v7326_v41  ;;  %v8717_v9 = vld [vmem:[#allocation28_spill] sm:$0xff]  ;;  %v8718_v44 = vld [vmem:[#allocation113_spill] sm:$0xff] }
 0x3a8   :  { %v2046_v35 = vsel %vm652_vm5, %v8707_v16, %v8706_v20  ;;  %v2051_v45 = vsel %vm694_vm2, %v2044_v27, 0.0  ;;  %4464 = vrcp.f32 %v1606_v13  ;;  %v2042_v10 = vsel %vm670_vm11, %v2041_v63, %v2040_v8 }
 0x3a9   :  { %v2059_v52 = vsel %vm694_vm2, %v2046_v35, 0.0  ;;  %v2052_v36 = vadd.f32 %v2051_v45, %v2028_v34  ;;  %4466 = vrcp.f32 %v1614_v14  ;;  %v2193_v48 = vrot.slane %v2191_v61, 4  ;;  %v8719_v45 = vld [vmem:[#allocation142_spill] sm:$0xff] }
 0x3aa   :  { %v2060_v47 = vadd.f32 %v2059_v52, %v2042_v10  ;;  %v8711_v55 = vrot.slane %v8710_v39, 7  ;;  %v2199_v40 = vrot.slane %v2192_v37, 4  ;;  %v2469_v26 = vrot.slane %v8712_v62, 6  ;;  %v8720_v52 = vld [vmem:[#allocation153_spill] sm:$0xff] }
 0x3ab   :  { %v2053_v38 = vrot.slane %v2052_v36, 4  ;;  %v2471_v2 = vrot.slane %v8713_v29, 5  ;;  %vm2637_vm3 = vcmp.gt.f32.partialorder %v8714_v12, 0.0  ;;  %v2194_v25 = vadd.f32 %v2193_v48, %v2191_v61  ;;  %v8722_v48 = vld [vmem:[#allocation144_spill] sm:$0xff] }
 0x3ac   :  { %v2468_v51 = vsel %vm652_vm5, %v8711_v55, %v8709_v46  ;;  %v2061_v34 = vrot.slane %v2060_v47, 4  ;;  %v2473_v28 = vrot.slane %v8715_v1, 4  ;;  %v2475_v30 = vrot.slane %v8716_v57, 3 }
 0x3ad   :  { %v2054_v15 = vadd.f32 %v2053_v38, %v2052_v36  ;;  %v2200_v63 = vadd.f32 %v2199_v40, %v2192_v37  ;;  %v2470_v54 = vsel %vm655_vm6, %v2469_v26, %v2468_v51  ;;  %v2477_v32 = vrot.slane %v8717_v9, 2  ;;  %v8723_v51 = vld [vmem:[#allocation154_spill] sm:$0xff]  ;;  %v8725_v9 = vld [vmem:[#allocation155_spill] sm:$0xff] }
 0x3ae   :  { %v2062_v27 = vadd.f32 %v2061_v34, %v2060_v47  ;;  %v2195_v13 = vrot.slane %v2194_v25, 2  ;;  %v2472_v14 = vsel %vm658_vm7, %v2471_v2, %v2470_v54  ;;  %v2479_v20 = vrot.slane %v8718_v44, 1 }
 0x3af   :  { %v2055_v16 = vrot.slane %v2054_v15, 2  ;;  %v2201_v35 = vrot.slane %v2200_v63, 2  ;;  %v2474_v8 = vsel %vm661_vm8, %v2473_v28, %v2472_v14  ;;  %v8721_v11 = vrot.slane %v8720_v52, 7  ;;  %v8724_v28 = vld [vmem:[#allocation51_spill] sm:$0xff] }
 0x3b0   :  { %v2063_v10 = vrot.slane %v2062_v27, 2  ;;  %v2196_v36 = vadd.f32 %v2195_v13, %v2194_v25  ;;  %v2476_v37 = vsel %vm664_vm9, %v2475_v30, %v2474_v8  ;;  %v2483_v47 = vrot.slane %v8722_v48, 6  ;;  %v8733_v48 = vld [vmem:[#allocation42_spill] sm:$0xff] }
 0x3b1   :  { %v2482_v61 = vsel %vm652_vm5, %v8721_v11, %v8719_v45  ;;  %v2056_v46 = vadd.f32 %v2055_v16, %v2054_v15  ;;  %v2202_v39 = vadd.f32 %v2201_v35, %v2200_v63  ;;  %v2478_v55 = vsel %vm667_vm10, %v2477_v32, %v2476_v37  ;;  %v8726_v35 = vld [vmem:[#allocation52_spill] sm:$0xff]  ;;  %v8727_v45 = vld [vmem:[#allocation81_spill] sm:$0xff]  ;;  %v8729_v11 = vld [vmem:[#allocation110_spill] sm:$0xff] }
 0x3b2   :  { %v2485_v38 = vrot.slane %v8723_v51, 5  ;;  %v2064_v40 = vadd.f32 %v2063_v10, %v2062_v27  ;;  %v2197_v62 = vrot.slane %v2196_v36, 1  ;;  %v2480_v26 = vsel %vm670_vm11, %v2479_v20, %v2478_v55  ;;  %v4465_v2 = vpop.eup %4464 }
 0x3b3   :  { %v2484_v29 = vsel %vm655_vm6, %v2483_v47, %v2482_v61  ;;  %v2057_v34 = vrot.slane %v2056_v46, 1  ;;  %v2203_v1 = vrot.slane %v2202_v39, 1  ;;  %v2487_v57 = vrot.slane %v8724_v28, 4  ;;  %v4467_v30 = vpop.eup %4466  ;;  %v8738_v28 = vld [vmem:[#allocation116_spill] sm:$0xff] }
 0x3b4   :  { %v2486_v25 = vsel %vm658_vm7, %v2485_v38, %v2484_v29  ;;  %v7549_v15 = vmul.f32 %v4465_v2, %v1746_v5  ;;  %v2065_v63 = vrot.slane %v2064_v40, 1  ;;  %v2198_v54 = vadd.f32 %v2197_v62, %v2196_v36  ;;  %v8728_v5 = vld [vmem:[#allocation29_spill] sm:$0xff]  ;;  %v8734_v29 = vld [vmem:[#allocation72_spill] sm:$0xff]  ;;  %v8735_v2 = vld [vmem:[#allocation115_spill] sm:$0xff] }
 0x3b5   :  { %v2489_v32 = vrot.slane %v8725_v9, 3  ;;  %v7553_v27 = vmul.f32 %v4467_v30, %v7502_v31  ;;  %v2058_v13 = vadd.f32 %v2057_v34, %v2056_v46  ;;  %v2204_v14 = vadd.f32 %v2203_v1, %v2202_v39  ;;  %v8731_v36 = vld [vmem:[#allocation53_spill] sm:$0xff]  ;;  %v8737_v1 = vld [vmem:[#allocation114_spill] sm:$0xff] }
 0x3b6   :  { %v2488_v44 = vsel %vm661_vm8, %v2487_v57, %v2486_v25  ;;  %v2066_v20 = vadd.f32 %v2065_v63, %v2064_v40  ;;  %v2491_v8 = vrot.slane %v8726_v35, 2  ;;  %v2493_v52 = vrot.slane %v8727_v45, 1 }
 0x3b7   :  { %v2490_v16 = vsel %vm664_vm9, %v2489_v32, %v2488_v44  ;;  %4468 = vrcp.f32 %v2058_v13  ;;  %v8730_v61 = vrot.slane %v8729_v11, 7  ;;  %v8732_v31 = vrot.slane %v7278_v23, 7  ;;  %v8739_v32 = vld [vmem:[#allocation31_spill] sm:$0xff] }
 0x3b8   :  { %v2641_v47 = vsel %vm2637_vm3, %v8714_v12, %v8733_v48  ;;  %4470 = vrcp.f32 %v2066_v20  ;;  %v2492_v46 = vsel %vm667_vm10, %v2491_v8, %v2490_v16  ;;  %v2644_v23 = vmul.f32 %v7355_v18, %v7326_v41  ;;  %v8740_v20 = vld [vmem:[#allocation117_spill] sm:$0xff]  ;;  %v8741_v16 = vld [vmem:[#allocation32_spill] sm:$0xff] }
 0x3b9   :  { %v2496_v10 = vsel %vm652_vm5, %v8730_v61, %v8728_v5  ;;  %v2498_v37 = vsel %vm652_vm5, %v8732_v31, %v8731_v36  ;;  %v2494_v51 = vsel %vm670_vm11, %v2493_v52, %v2492_v46  ;;  %v2643_v40 = vmul.f32 %v2641_v47, %v7326_v41  ;;  %v8743_v31 = vld [vmem:[#allocation8_spill] sm:$0xff] }
 0x3ba   :  { %v2503_v39 = vsel %vm694_vm2, %v2496_v10, 0.0  ;;  %v2511_v55 = vsel %vm694_vm2, %v2498_v37, 0.0  ;;  %v8736_v34 = vrot.slane %v8735_v2, 7  ;;  %v2921_v25 = vrot.slane %v8737_v1, 6  ;;  %v8742_v10 = vld [vmem:[#allocation118_spill] sm:$0xff] }
 0x3bb   :  { %v2504_v38 = vadd.f32 %v2503_v39, %v2480_v26  ;;  %v2512_v62 = vadd.f32 %v2511_v55, %v2494_v51  ;;  %v2923_v57 = vrot.slane %v8738_v28, 5  ;;  %v2645_v63 = vrot.slane %v2643_v40, 4 }
 0x3bc   :  { %v2920_v12 = vsel %vm652_vm5, %v8736_v34, %v8734_v29  ;;  %v2651_v9 = vrot.slane %v2644_v23, 4  ;;  %v2925_v26 = vrot.slane %v8739_v32, 4  ;;  %v2927_v18 = vrot.slane %v8740_v20, 3  ;;  %v8747_v20 = vld [vmem:[#allocation9_spill] sm:$0xff] }
 0x3bd   :  { %v2505_v30 = vrot.slane %v2504_v38, 4  ;;  %v2513_v13 = vrot.slane %v2512_v62, 4  ;;  %v2922_v44 = vsel %vm655_vm6, %v2921_v25, %v2920_v12  ;;  %v2929_v35 = vrot.slane %v8741_v16, 2  ;;  %v8748_v16 = vld [vmem:[#allocation82_spill] sm:$0xff] }
 0x3be   :  { %v2646_v45 = vadd.f32 %v2645_v63, %v2643_v40  ;;  %v2652_v52 = vadd.f32 %v2651_v9, %v2644_v23  ;;  %v2924_v5 = vsel %vm658_vm7, %v2923_v57, %v2922_v44  ;;  %v2931_v36 = vrot.slane %v8742_v10, 1  ;;  %v8745_v23 = vld [vmem:[#allocation12_spill] sm:$0xff]  ;;  %v8750_v10 = vld [vmem:[#allocation119_spill] sm:$0xff] }
 0x3bf   :  { %v2506_v8 = vadd.f32 %v2505_v30, %v2504_v38  ;;  %v2514_v11 = vadd.f32 %v2513_v13, %v2512_v62  ;;  %v2926_v61 = vsel %vm661_vm8, %v2925_v26, %v2924_v5  ;;  %v8744_v37 = vrot.slane %v8743_v31, 7  ;;  %v8746_v30 = vld [vmem:[#allocation54_spill] sm:$0xff] }
 0x3c0   :  { %v2647_v46 = vrot.slane %v2646_v45, 2  ;;  %v2653_v39 = vrot.slane %v2652_v52, 2  ;;  %v2928_v55 = vsel %vm664_vm9, %v2927_v18, %v2926_v61  ;;  %v2935_v40 = vrot.slane %v7089_v60, 6 }
 0x3c1   :  { %v2934_v48 = vsel %vm652_vm5, %v8744_v37, %v7081_v43  ;;  %v2507_v47 = vrot.slane %v2506_v8, 2  ;;  %v2515_v51 = vrot.slane %v2514_v11, 2  ;;  %v2930_v38 = vsel %vm667_vm10, %v2929_v35, %v2928_v55  ;;  %v4469_v29 = vpop.eup %4468  ;;  %v8753_v55 = vld [vmem:[#allocation79_spill] sm:$0xff] }
 0x3c2   :  { %v2937_v62 = vrot.slane %v8745_v23, 5  ;;  %v2648_v34 = vadd.f32 %v2647_v46, %v2646_v45  ;;  %v2654_v12 = vadd.f32 %v2653_v39, %v2652_v52  ;;  %v2932_v1 = vsel %vm670_vm11, %v2931_v36, %v2930_v38  ;;  %v4471_v25 = vpop.eup %4470  ;;  %v8752_v46 = vld [vmem:[#allocation33_spill] sm:$0xff]  ;;  %v8754_v38 = vld [vmem:[#allocation55_spill] sm:$0xff] }
 0x3c3   :  { %v2508_v2 = vadd.f32 %v2507_v47, %v2506_v8  ;;  %v7600_v43 = vmul.f32 %v4469_v29, %v2198_v54  ;;  %v2516_v28 = vadd.f32 %v2515_v51, %v2514_v11  ;;  %v2936_v57 = vsel %vm655_vm6, %v2935_v40, %v2934_v48  ;;  %v8751_v48 = vld [vmem:[#allocation125_spill] sm:$0xff] }
 0x3c4   :  { %v2939_v63 = vrot.slane %v8746_v30, 4  ;;  %v7604_v9 = vmul.f32 %v4471_v25, %v2204_v14  ;;  %v2649_v60 = vrot.slane %v2648_v34, 1  ;;  %v2655_v26 = vrot.slane %v2654_v12, 1  ;;  %v8749_v14 = vld [vmem:[#allocation149_spill] sm:$0xff] }
 0x3c5   :  { %v2509_v32 = vrot.slane %v2508_v2, 1  ;;  %v2517_v13 = vrot.slane %v2516_v28, 1  ;;  %v2938_v44 = vsel %vm658_vm7, %v2937_v62, %v2936_v57  ;;  %v2941_v18 = vrot.slane %v8747_v20, 3  ;;  %v8756_v25 = vld [vmem:[#allocation73_spill] sm:$0xff]  ;;  %v8759_v20 = vld [vmem:[#allocation120_spill] sm:$0xff] }
 0x3c6   :  { %v2943_v35 = vrot.slane %v8748_v16, 2  ;;  %v2650_v54 = vadd.f32 %v2649_v60, %v2648_v34  ;;  %v2656_v45 = vadd.f32 %v2655_v26, %v2654_v12  ;;  %v2940_v52 = vsel %vm661_vm8, %v2939_v63, %v2938_v44  ;;  %v8755_v34 = vld [vmem:[#allocation121_spill] sm:$0xff]  ;;  %v8760_v16 = vld [vmem:[#allocation123_spill] sm:$0xff] }
 0x3c7   :  { %v2510_v8 = vadd.f32 %v2509_v32, %v2508_v2  ;;  %v2518_v5 = vadd.f32 %v2517_v13, %v2516_v28  ;;  %v2942_v11 = vsel %vm664_vm9, %v2941_v18, %v2940_v52  ;;  %v2945_v61 = vrot.slane %v8749_v14, 1  ;;  %v8757_v32 = vld [vmem:[#allocation122_spill] sm:$0xff]  ;;  %v8761_v14 = vld [vmem:[#allocation35_spill] sm:$0xff] }
 0x3c8   :  { %v2947_v36 = vrot.slane %v8750_v10, 7  ;;  %v2944_v31 = vsel %vm667_vm10, %v2943_v35, %v2942_v11  ;;  %v2949_v37 = vrot.slane %v7284_v42, 7  ;;  %vm3089_vm4 = vcmp.gt.f32.partialorder %v8751_v48, 0.0  ;;  %v8758_v13 = vld [vmem:[#allocation34_spill] sm:$0xff]  ;;  %v8762_v10 = vld [vmem:[#allocation124_spill] sm:$0xff] }
 0x3c9   :  { %4472 = vrcp.f32 %v2510_v8  ;;  %v2946_v47 = vsel %vm670_vm11, %v2945_v61, %v2944_v31  ;;  %v3093_v51 = vsel %vm3089_vm4, %v8751_v48, %v8753_v55  ;;  %v3096_v42 = vmul.f32 %v7357_v22, %v7326_v41  ;;  %v8763_v55 = vld [vmem:[#allocation13_spill] sm:$0xff] }
 0x3ca   :  { %4474 = vrcp.f32 %v2518_v5  ;;  %v2948_v39 = vsel %vm652_vm5, %v2947_v36, %v8752_v46  ;;  %v2950_v40 = vsel %vm652_vm5, %v2949_v37, %v8754_v38  ;;  %v3095_v62 = vmul.f32 %v3093_v51, %v7326_v41 }
 0x3cb   :  { %v2955_v23 = vsel %vm694_vm2, %v2948_v39, 0.0  ;;  %v2963_v2 = vsel %vm694_vm2, %v2950_v40, 0.0  ;;  %v3371_v12 = vrot.slane %v8755_v34, 7  ;;  %v3373_v28 = vrot.slane %v8756_v25, 6 }
 0x3cc   :  { %v2956_v29 = vadd.f32 %v2955_v23, %v2932_v1  ;;  %v2964_v57 = vadd.f32 %v2963_v2, %v2946_v47  ;;  %v3097_v30 = vrot.slane %v3095_v62, 4  ;;  %v3103_v63 = vrot.slane %v3096_v42, 4 }
 0x3cd   :  { %v3375_v60 = vrot.slane %v8757_v32, 5  ;;  %v3372_v44 = vsel %vm652_vm5, %v3371_v12, %v8758_v13  ;;  %v3377_v18 = vrot.slane %v8759_v20, 4  ;;  %v3379_v22 = vrot.slane %v8760_v16, 3  ;;  %v8764_v13 = vld [vmem:[#allocation14_spill] sm:$0xff]  ;;  %v8765_v16 = vld [vmem:[#allocation157_spill] sm:$0xff] }
 0x3ce   :  { %v2957_v26 = vrot.slane %v2956_v29, 4  ;;  %v2965_v1 = vrot.slane %v2964_v57, 4  ;;  %v3098_v35 = vadd.f32 %v3097_v30, %v3095_v62  ;;  %v3104_v8 = vadd.f32 %v3103_v63, %v3096_v42 }
 0x3cf   :  { %v3374_v52 = vsel %vm655_vm6, %v3373_v28, %v3372_v44  ;;  %v3381_v61 = vrot.slane %v8761_v14, 2  ;;  %v3383_v36 = vrot.slane %v8762_v10, 1  ;;  %vm3542_vm12 = vcmp.gt.f32.partialorder %v7337_v50, 0.0 }
 0x3d0   :  { %v2958_v5 = vadd.f32 %v2957_v26, %v2956_v29  ;;  %v3376_v11 = vsel %vm658_vm7, %v3375_v60, %v3374_v52  ;;  %v2966_v31 = vadd.f32 %v2965_v1, %v2964_v57  ;;  %v3099_v37 = vrot.slane %v3098_v35, 2 }
 0x3d1   :  { %v3105_v48 = vrot.slane %v3104_v8, 2  ;;  %v3378_v47 = vsel %vm661_vm8, %v3377_v18, %v3376_v11  ;;  %v3385_v51 = vrot.slane %v8763_v55, 7  ;;  %v3387_v38 = vrot.slane %v7153_v7, 6 }
 0x3d2   :  { %v2959_v46 = vrot.slane %v2958_v5, 2  ;;  %v3380_v39 = vsel %vm664_vm9, %v3379_v22, %v3378_v47  ;;  %v2967_v23 = vrot.slane %v2966_v31, 2  ;;  %v3100_v62 = vadd.f32 %v3099_v37, %v3098_v35 }
 0x3d3   :  { %v4473_v40 = vpop.eup %4472  ;;  %v3106_v42 = vadd.f32 %v3105_v48, %v3104_v8  ;;  %v3382_v29 = vsel %vm667_vm10, %v3381_v61, %v3380_v39  ;;  %v3544_v34 = vmul.f32 0.01, %v7337_v50  ;;  %v3386_v28 = vsel %vm652_vm5, %v3385_v51, %v7147_v33 }
 0x3d4   :  { %v4475_v2 = vpop.eup %4474  ;;  %v7646_v12 = vmul.f32 %v4473_v40, %v2650_v54  ;;  %v2960_v25 = vadd.f32 %v2959_v46, %v2958_v5  ;;  %v2968_v30 = vadd.f32 %v2967_v23, %v2966_v31  ;;  %v3101_v63 = vrot.slane %v3100_v62, 1  ;;  %v8766_v5 = vld [vmem:[#allocation126_spill] sm:$0xff] }
 0x3d5   :  { %v7650_v57 = vmul.f32 %v4475_v2, %v2656_v45  ;;  %v3384_v7 = vsel %vm670_vm11, %v3383_v36, %v3382_v29  ;;  %v3107_v60 = vrot.slane %v3106_v42, 1  ;;  %v3388_v26 = vsel %vm655_vm6, %v3387_v38, %v3386_v28 }
 0x3d6   :  { %v2961_v32 = vrot.slane %v2960_v25, 1  ;;  %v3389_v44 = vrot.slane %v8764_v13, 5  ;;  %v2969_v20 = vrot.slane %v2968_v30, 1  ;;  %v3102_v18 = vadd.f32 %v3101_v63, %v3100_v62  ;;  %v8770_v62 = vld [vmem:[#allocation38_spill] sm:$0xff]  ;;  %v8773_v13 = vld [vmem:[#allocation88_spill] sm:$0xff] }
 0x3d7   :  { %v3391_v54 = vrot.slane %v7164_v19, 4  ;;  %v3393_v22 = vrot.slane %v8765_v16, 3  ;;  %v3395_v45 = vrot.slane %v7168_v49, 2  ;;  %v3397_v35 = vrot.slane %v7173_v59, 1  ;;  %v8767_v19 = vld [vmem:[#allocation39_spill] sm:$0xff]  ;;  %v8768_v49 = vld [vmem:[#allocation36_spill] sm:$0xff] }
 0x3d8   :  { %v2962_v1 = vadd.f32 %v2961_v32, %v2960_v25  ;;  %v3390_v33 = vsel %vm658_vm7, %v3389_v44, %v3388_v26  ;;  %v2970_v8 = vadd.f32 %v2969_v20, %v2968_v30  ;;  %v3399_v11 = vrot.slane %v8766_v5, 7  ;;  %v8771_v30 = vld [vmem:[#allocation128_spill] sm:$0xff]  ;;  %v8772_v32 = vld [vmem:[#allocation37_spill] sm:$0xff] }
 0x3d9   :  { %v3392_v52 = vsel %vm661_vm8, %v3391_v54, %v3390_v33  ;;  %v3401_v14 = vrot.slane %v7296_v56, 7  ;;  %vm3541_vm13 = vcmp.gt.f32.partialorder %v8767_v19, 0.0  ;;  %v3543_v10 = vmul.f32 0.01, %v8767_v19 }
 0x3da   :  { %4476 = vrcp.f32 %v2962_v1  ;;  %v3394_v61 = vsel %vm664_vm9, %v3393_v22, %v3392_v52  ;;  %v3400_v59 = vsel %vm652_vm5, %v3399_v11, %v8768_v49  ;;  %v3546_v55 = vsel %vm3542_vm12, %v7337_v50, %v3544_v34  ;;  %v8774_v34 = vld [vmem:[#allocation129_spill] sm:$0xff] }
 0x3db   :  { %4478 = vrcp.f32 %v2970_v8  ;;  %v3396_v36 = vsel %vm667_vm10, %v3395_v45, %v3394_v61  ;;  %v3402_v31 = vsel %vm652_vm5, %v3401_v14, %v7177_v58  ;;  %v3407_v56 = vsel %vm694_vm2, %v3400_v59, 0.0  ;;  %v8769_v58 = vld [vmem:[#allocation127_spill] sm:$0xff]  ;;  %v8775_v1 = vld [vmem:[#allocation165_spill] sm:$0xff] }
 0x3dc   :  { %v3398_v37 = vsel %vm670_vm11, %v3397_v35, %v3396_v36  ;;  %v3415_v48 = vsel %vm694_vm2, %v3402_v31, 0.0  ;;  %v3545_v47 = vsel %vm3541_vm13, %v8767_v19, %v3543_v10  ;;  %v3408_v46 = vadd.f32 %v3407_v56, %v3384_v7  ;;  %v8776_v45 = vld [vmem:[#allocation163_spill] sm:$0xff]  ;;  %v8777_v10 = vld [vmem:[#allocation56_spill] sm:$0xff]  ;;  %v8778_v49 = vld [vmem:[#allocation57_spill] sm:$0xff] }
 0x3dd   :  { %v3416_v39 = vadd.f32 %v3415_v48, %v3398_v37  ;;  %v3547_v51 = vmul.f32 %v3545_v47, %v7326_v41  ;;  %v3108_v38 = vadd.f32 %v3107_v60, %v3106_v42  ;;  %v3548_v40 = vmul.f32 %v3546_v55, %v7326_v41 }
 0x3de   :  { %v3823_v23 = vrot.slane %v8769_v58, 7  ;;  %v3825_v29 = vrot.slane %v8770_v62, 6  ;;  %v3409_v2 = vrot.slane %v3408_v46, 4  ;;  %v3827_v63 = vrot.slane %v8771_v30, 5 }
 0x3df   :  { %v3417_v25 = vrot.slane %v3416_v39, 4  ;;  %v3549_v28 = vrot.slane %v3547_v51, 4  ;;  %v3555_v7 = vrot.slane %v3548_v40, 4  ;;  %v3829_v50 = vrot.slane %v8773_v13, 4 }
 0x3e0   :  { %v3824_v26 = vsel %vm652_vm5, %v3823_v23, %v8772_v32  ;;  %v3831_v44 = vrot.slane %v8774_v34, 3  ;;  %v3410_v42 = vadd.f32 %v3409_v2, %v3408_v46  ;;  %v3833_v33 = vrot.slane %v8775_v1, 2  ;;  %v8781_v32 = vld [vmem:[#allocation98_spill] sm:$0xff]  ;;  %v8782_v34 = vld [vmem:[#allocation151_spill] sm:$0xff] }
 0x3e1   :  { %v3418_v60 = vadd.f32 %v3417_v25, %v3416_v39  ;;  %v3550_v20 = vadd.f32 %v3549_v28, %v3547_v51  ;;  %v3826_v54 = vsel %vm655_vm6, %v3825_v29, %v3824_v26  ;;  %v3556_v16 = vadd.f32 %v3555_v7, %v3548_v40  ;;  %v8779_v51 = vld [vmem:[#allocation132_spill] sm:$0xff] }
 0x3e2   :  { %v3828_v22 = vsel %vm658_vm7, %v3827_v63, %v3826_v54  ;;  %v3837_v35 = vrot.slane %v8776_v45, 7  ;;  %v3411_v8 = vrot.slane %v3410_v42, 2  ;;  %v3839_v59 = vrot.slane %v8778_v49, 6  ;;  %v8780_v28 = vld [vmem:[#allocation164_spill] sm:$0xff] }
 0x3e3   :  { %v3419_v52 = vrot.slane %v3418_v60, 2  ;;  %v3551_v5 = vrot.slane %v3550_v20, 2  ;;  %v3830_v11 = vsel %vm661_vm8, %v3829_v50, %v3828_v22  ;;  %v3557_v61 = vrot.slane %v3556_v16, 2  ;;  %v8785_v22 = vld [vmem:[#allocation166_spill] sm:$0xff] }
 0x3e4   :  { %v4477_v14 = vpop.eup %4476  ;;  %v3832_v19 = vsel %vm664_vm9, %v3831_v44, %v3830_v11  ;;  %v3838_v36 = vsel %vm652_vm5, %v3837_v35, %v8777_v10  ;;  %v3412_v56 = vadd.f32 %v3411_v8, %v3410_v42  ;;  %v3835_v40 = vrot.slane %v8779_v51, 1  ;;  %v8783_v42 = vld [vmem:[#allocation135_spill] sm:$0xff] }
 0x3e5   :  { %v4479_v31 = vpop.eup %4478  ;;  %v7696_v37 = vmul.f32 %v4477_v14, %v3102_v18  ;;  %v3420_v48 = vadd.f32 %v3419_v52, %v3418_v60  ;;  %v3552_v47 = vadd.f32 %v3551_v5, %v3550_v20  ;;  %v3558_v39 = vadd.f32 %v3557_v61, %v3556_v16  ;;  %v8784_v16 = vld [vmem:[#allocation130_spill] sm:$0xff] }
 0x3e6   :  { %v7698_v46 = vmul.f32 %v4479_v31, %v3108_v38  ;;  %v3834_v55 = vsel %vm667_vm10, %v3833_v33, %v3832_v19  ;;  %v3996_v58 = vmul.f32 0.01, %v7339_v24  ;;  %v3413_v23 = vrot.slane %v3412_v56, 1  ;;  %v8786_v33 = vld [vmem:[#allocation58_spill] sm:$0xff] }
 0x3e7   :  { %v3421_v62 = vrot.slane %v3420_v48, 1  ;;  %v3840_v29 = vsel %vm655_vm6, %v3839_v59, %v3838_v36  ;;  %v3553_v2 = vrot.slane %v3552_v47, 1  ;;  %v3559_v25 = vrot.slane %v3558_v39, 1 }
 0x3e8   :  { %v3836_v18 = vsel %vm670_vm11, %v3835_v40, %v3834_v55  ;;  %v3841_v30 = vrot.slane %v8780_v28, 5  ;;  %v3414_v63 = vadd.f32 %v3413_v23, %v3412_v56  ;;  %v3843_v7 = vrot.slane %v7218_v17, 4 }
 0x3e9   :  { %v3422_v38 = vadd.f32 %v3421_v62, %v3420_v48  ;;  %v3845_v26 = vrot.slane %v8781_v32, 3  ;;  %v3847_v50 = vrot.slane %v7229_v4, 2  ;;  %v3849_v44 = vrot.slane %v8782_v34, 1 }
 0x3ea   :  { %v3842_v13 = vsel %vm658_vm7, %v3841_v30, %v3840_v29  ;;  %v3851_v60 = vrot.slane %v8783_v42, 7  ;;  %4480 = vrcp.f32 %v3414_v63  ;;  %v3853_v54 = vrot.slane %v7301_v6, 7 }
 0x3eb   :  { %v3844_v20 = vsel %vm661_vm8, %v3843_v7, %v3842_v13  ;;  %vm3993_vm6 = vcmp.gt.f32.partialorder %v8784_v16, 0.0  ;;  %4482 = vrcp.f32 %v3422_v38  ;;  %vm3994_vm7 = vcmp.gt.f32.partialorder %v7339_v24, 0.0 }
 0x3ec   :  { %v3846_v17 = vsel %vm664_vm9, %v3845_v26, %v3844_v20  ;;  %v3852_v1 = vsel %vm652_vm5, %v3851_v60, %v8785_v22  ;;  %v3854_v45 = vsel %vm652_vm5, %v3853_v54, %v8786_v33  ;;  %v3995_v8 = vmul.f32 0.01, %v8784_v16 }
 0x3ed   :  { %v3848_v4 = vsel %vm667_vm10, %v3847_v50, %v3846_v17  ;;  %v3859_v35 = vsel %vm694_vm2, %v3852_v1, 0.0  ;;  %v3867_v5 = vsel %vm694_vm2, %v3854_v45, 0.0  ;;  %v3998_v11 = vsel %vm3994_vm7, %v7339_v24, %v3996_v58 }
 0x3ee   :  { %v3850_v6 = vsel %vm670_vm11, %v3849_v44, %v3848_v4  ;;  %v3860_v52 = vadd.f32 %v3859_v35, %v3836_v18  ;;  %v3997_v61 = vsel %vm3993_vm6, %v8784_v16, %v3995_v8  ;;  %v4000_v19 = vmul.f32 %v3998_v11, %v7326_v41 }
 0x3ef   :  { %v3868_v14 = vadd.f32 %v3867_v5, %v3850_v6  ;;  %v3554_v10 = vadd.f32 %v3553_v2, %v3552_v47  ;;  %v3999_v49 = vmul.f32 %v3997_v61, %v7326_v41  ;;  %v4019_v56 = vrot.slane %v7490_v3, 7 }
 0x3f0   :  { %v3861_v36 = vrot.slane %v3860_v52, 4  ;;  %v4007_v31 = vrot.slane %v4000_v19, 4  ;;  %v4020_v48 = vrot.slane %v7500_v0, 7  ;;  %v3560_v55 = vadd.f32 %v3559_v25, %v3558_v39 }
 0x3f1   :  { %v3869_v59 = vrot.slane %v3868_v14, 4  ;;  %v4001_v40 = vrot.slane %v3999_v49, 4  ;;  %v4025_v24 = vrot.slane %v7549_v15, 6  ;;  %v4026_v62 = vrot.slane %v7553_v27, 6 }
 0x3f2   :  { %v3862_v51 = vadd.f32 %v3861_v36, %v3860_v52  ;;  %v4008_v23 = vadd.f32 %v4007_v31, %v4000_v19  ;;  %v4031_v47 = vrot.slane %v7600_v43, 5  ;;  %v4032_v41 = vrot.slane %v7604_v9, 5 }
 0x3f3   :  { %v3870_v58 = vadd.f32 %v3869_v59, %v3868_v14  ;;  %v4002_v2 = vadd.f32 %v4001_v40, %v3999_v49  ;;  %vm4059_vm5 = vcmask 1040384   ;;  %v4037_v7 = vrot.slane %v7646_v12, 4 }
 0x3f4   :  { %v3863_v29 = vrot.slane %v3862_v51, 2  ;;  %v4481_v18 = vpop.eup %4480  ;;  %v4009_v28 = vrot.slane %v4008_v23, 2  ;;  %v4060_v0 = vsel %vm4059_vm5, %v7448_v21, %v4019_v56  ;;  %v4061_v39 = vsel %vm4059_vm5, %v7451_v53, %v4020_v48 }
 0x3f5   :  { %v3871_v3 = vrot.slane %v3870_v58, 2  ;;  %v4483_v25 = vpop.eup %4482  ;;  %v3563_v15 = vmul.f32 %v4481_v18, %v3554_v10  ;;  %v4003_v63 = vrot.slane %v4002_v2, 2  ;;  %v4062_v27 = vsel %vm694_vm2, %v4060_v0, %v4025_v24 }
 0x3f6   :  { %v3864_v30 = vadd.f32 %v3863_v29, %v3862_v51  ;;  %v3564_v38 = vmul.f32 %v4483_v25, %v3560_v55  ;;  %v4063_v9 = vsel %vm694_vm2, %v4061_v39, %v4026_v62  ;;  %v4038_v26 = vrot.slane %v7650_v57, 4 }
 0x3f7   :  { %v3872_v43 = vadd.f32 %v3871_v3, %v3870_v58  ;;  %v4043_v13 = vrot.slane %v7696_v37, 3  ;;  %vm4064_vm8 = vcmask 1042432   ;;  %v4010_v53 = vadd.f32 %v4009_v28, %v4008_v23 }
 0x3f8   :  { %v3865_v32 = vrot.slane %v3864_v30, 1  ;;  %v4044_v50 = vrot.slane %v7698_v46, 3  ;;  %v4065_v34 = vsel %vm4064_vm8, %v4062_v27, %v4031_v47  ;;  %v4004_v42 = vadd.f32 %v4003_v63, %v4002_v2 }
 0x3f9   :  { %v3873_v21 = vrot.slane %v3872_v43, 1  ;;  %v4066_v60 = vsel %vm4064_vm8, %v4063_v9, %v4032_v41  ;;  %vm4067_vm9 = vcmask 1043456   ;;  %v4049_v54 = vrot.slane %v3563_v15, 2 }
 0x3fa   :  { %v3866_v44 = vadd.f32 %v3865_v32, %v3864_v30  ;;  %v4068_v12 = vsel %vm4067_vm9, %v4065_v34, %v4037_v7  ;;  %v4069_v16 = vsel %vm4067_vm9, %v4066_v60, %v4038_v26  ;;  %v4050_v17 = vrot.slane %v3564_v38, 2 }
 0x3fb   :  { %v3874_v20 = vadd.f32 %v3873_v21, %v3872_v43  ;;  %vm4070_vm10 = vcmask 1044480   ;;  %vm4073_vm11 = vcmask 1045504   ;;  %v4005_v4 = vrot.slane %v4004_v42, 1 }
 0x3fc   :  { %4484 = vrcp.f32 %v3866_v44  ;;  %v4071_v57 = vsel %vm4070_vm10, %v4068_v12, %v4043_v13  ;;  %v4072_v37 = vsel %vm4070_vm10, %v4069_v16, %v4044_v50  ;;  %v4011_v46 = vrot.slane %v4010_v53, 1 }
 0x3fd   :  { %4486 = vrcp.f32 %v3874_v20  ;;  %v4074_v22 = vsel %vm4073_vm11, %v4071_v57, %v4049_v54  ;;  %v4075_v1 = vsel %vm4073_vm11, %v4072_v37, %v4050_v17  ;;  %v4006_v33 = vadd.f32 %v4005_v4, %v4004_v42 }
 0x3fe   :  { %v4012_v45 = vadd.f32 %v4011_v46, %v4010_v53  ;;  %vm4076_vm14 = vcmask 1046528   ;;  %v4079_v11 = vstv %s7766_s7 }
 0x406   :  { %v4485_v35 = vpop.eup %4484 }
 0x407   :  { %v4487_v8 = vpop.eup %4486  ;;  %v4015_v6 = vmul.f32 %v4485_v35, %v4006_v33 }
 0x408   :  { %v4016_v52 = vmul.f32 %v4487_v8, %v4012_v45 }
 0x409   :  { %v4055_v5 = vrot.slane %v4015_v6, 1 }
 0x40a   :  { %v4056_v14 = vrot.slane %v4016_v52, 1 }
 0x40b   :  { %v4077_v61 = vsel %vm4076_vm14, %v4074_v22, %v4055_v5 }
 0x40c   :  { %v4078_v19 = vsel %vm4076_vm14, %v4075_v1, %v4056_v14  ;;  %v4080_v10 = vadd.f32 %v4079_v11, %v4077_v61 }
 0x40d   :  { %v4081_v36 = vadd.f32 %v4079_v11, %v4078_v19 }
 0x40e   :  { %4082 = vst [vmem:[#allocation3] sm:$0xff] %v4080_v10 }
 0x40f   :  { %4083 = vst [vmem:[#allocation3 + $0x8] sm:$0xff] %v4081_v36 }
 0x410   :  { %4515 = shalt.err (!%p4512_p4)
}
 0x411   :  { %s4516_s7 = scalar_lea.hbm %s7767_s8, 256 }
 0x412   :  { %p4517_p5 = scmp.ne.s32.totalorder %s7767_s8, %s4516_s7  ;;  %p4520_p6 = scmp.lt.u32.totalorder %s4516_s7, %s7767_s8 }
 0x414   :  { %p4522_p7 = pnand %p4520_p6, %p4517_p5 }
 0x416   :  { %4525 = shalt.err (!%p4522_p7)
}
 0x417   :  { %4093 = dma.vmem_to_hbm [thread:$0]  %s4091_s15, 256, %s7767_s8, [#allocation4]  }
 0x418   :  { %4526 = dma.done.wait [#allocation4], 256  }
 0x419   :  { %4527 = vsyncadd [#allocation4], 4294967040 }
 0x41a   :  { %4097 = vsyncpa [#allocation4], 1 }

</bundles_post_ra>
